<compile_context>
chip_gen: v6e
topology: v6e:2x2x1
jax: 0.10.0
libtpu: 0.0.40
codegen_flags: <defaults>
</compile_context>

<pallas_src>
import functools

import jax
import jax.numpy as jnp
from jax import lax
from jax.experimental import pallas as pl
from jax.experimental.pallas import tpu as pltpu


# ----------------------------- Pallas kernels ------------------------------


def _conv_gemm_kernel(p_ref, w_ref, b_ref, o_ref):
    # out = relu(patches @ w_folded + bias_folded); 1/255 and BN scale already in w/bias.
    y = jnp.dot(p_ref[...], w_ref[...], preferred_element_type=jnp.float32)
    y = y + b_ref[...]
    o_ref[...] = jnp.maximum(y, 0.0).astype(o_ref.dtype)


def _row_tile(P, target=512):
    """Largest row tile <= target that exactly divides P (multiple of 8), else full P."""
    if P <= target:
        return P
    for t in range(target, 7, -1):
        if P % t == 0 and t % 8 == 0:
            return t
    return P


def conv_gemm_bias_relu(patches, w, bias, *, out_dtype=jnp.bfloat16, target_rows=512):
    """patches: (P, K) bf16, w: (K, C) bf16 (scales folded), bias: (1, C) f32 -> (P, C)."""
    P, K = patches.shape
    C = w.shape[1]
    tp = _row_tile(P, target_rows)
    return pl.pallas_call(
        _conv_gemm_kernel,
        out_shape=jax.ShapeDtypeStruct((P, C), out_dtype),
        grid=(P // tp,),
        in_specs=[pl.BlockSpec((tp, K), lambda i: (i, 0)),   # streamed patch rows
                  pl.BlockSpec((K, C), lambda i: (0, 0)),    # resident weight
                  pl.BlockSpec((1, C), lambda i: (0, 0))],   # resident bias
        out_specs=pl.BlockSpec((tp, C), lambda i: (i, 0)),
        compiler_params=pltpu.CompilerParams(
            dimension_semantics=("parallel",)),
    )(patches, w, bias)


def _dueling_head_kernel(f_ref, w1_ref, b1_ref, w2_ref, b2_ref, q_ref):
    # One fused hidden matmul for both streams: cols [:256] = value, [256:] = advantage.
    h = jnp.dot(f_ref[...], w1_ref[...], preferred_element_type=jnp.float32) + b1_ref[...]
    h = jnp.maximum(h, 0.0)
    # Block-diagonal second layer: column 0 = V, columns 1.. = A.
    va = jnp.dot(h, w2_ref[...], preferred_element_type=jnp.float32) + b2_ref[...]
    v = va[:, :1]
    a = va[:, 1:]
    # Q = V + (A - A.mean())  -- mean over ALL elements of A (incl. batch), as in PyTorch code.
    q_ref[...] = v + (a - jnp.mean(a))


def dueling_head(f, w1, b1, w2, b2):
    B, D = f.shape
    H = w1.shape[1]          # 512 = 256 (value) + 256 (advantage)
    NA = w2.shape[1]         # 1 + outputs
    full = lambda shp: pl.BlockSpec(shp, lambda i: (0,) * len(shp))
    return pl.pallas_call(
        _dueling_head_kernel,
        out_shape=jax.ShapeDtypeStruct((B, NA - 1), jnp.float32),
        grid=(1,),
        in_specs=[full((B, D)), full((D, H)), full((1, H)), full((H, NA)), full((1, NA))],
        out_specs=full((B, NA - 1)),
        compiler_params=pltpu.CompilerParams(dimension_semantics=("arbitrary",)),
    )(f, w1, b1, w2, b2)


# ------------------------------- glue (JAX) --------------------------------


@jax.jit
def model2layer_forward(x, kp):
    """x: (B, 4, 84, 84) float32 raw frames (0..255). Returns Q: (B, outputs) float32."""
    B, C, _, _ = x.shape
    xb = x.astype(jnp.bfloat16)                       # 0..255 integers are exact in bf16
    # conv1 im2col -> (B, 20, 20, C*8*8), feature order (Cin, kh, kw) == torch w.reshape(16,-1)
    p1 = lax.conv_general_dilated_patches(
        xb, (8, 8), (4, 4), "VALID", dimension_numbers=("NCHW", "OIHW", "NHWC"))
    ho1, wo1, k1 = p1.shape[1], p1.shape[2], p1.shape[3]
    y1 = conv_gemm_bias_relu(p1.reshape(B * ho1 * wo1, k1), kp["w1"], kp["b1"])  # (B*400,16) bf16
    # conv2 im2col directly on the NHWC activation (no NCHW transpose round-trip)
    p2 = lax.conv_general_dilated_patches(
        y1.reshape(B, ho1, wo1, 16), (4, 4), (2, 2), "VALID",
        dimension_numbers=("NHWC", "HWIO", "NHWC"))
    ho2, wo2, k2 = p2.shape[1], p2.shape[2], p2.shape[3]
    y2 = conv_gemm_bias_relu(p2.reshape(B * ho2 * wo2, k2), kp["w2"], kp["b2"])  # (B*81,32) bf16
    # Flatten in NHWC order; the head weight rows were permuted at fold time to compensate,
    # so this is numerically identical to nn.Flatten on NCHW.
    f = y2.reshape(B, ho2 * wo2 * 32)                                            # (B, 2592) bf16
    return dueling_head(f, kp["w1h"], kp["b1h"], kp["w2h"], kp["b2h"])


# ------------------------- params (PyTorch layout) --------------------------


def init_torch_params(key, outputs):
    """Random parameters in PyTorch tensor layouts."""
    ks = jax.random.split(key, 20)
    n = lambda k, shp, s: jax.random.normal(k, shp, jnp.float32) * s
    u = lambda k, shp: jax.random.uniform(k, shp, jnp.float32)
    return {
        "conv1_w": n(ks[0], (16, 4, 8, 8), 0.05), "conv1_b": n(ks[1], (16,), 0.05),
        "bn1_gamma": 1.0 + n(ks[2], (16,), 0.1), "bn1_beta": n(ks[3], (16,), 0.1),
        "bn1_mean": n(ks[4], (16,), 0.05), "bn1_var": 1.0 + 0.1 * u(ks[5], (16,)),
        "conv2_w": n(ks[6], (32, 16, 4, 4), 0.05), "conv2_b": n(ks[7], (32,), 0.05),
        "bn2_gamma": 1.0 + n(ks[8], (32,), 0.1), "bn2_beta": n(ks[9], (32,), 0.1),
        "bn2_mean": n(ks[10], (32,), 0.05), "bn2_var": 1.0 + 0.1 * u(ks[11], (32,)),
        "v1_w": n(ks[12], (256, 2592), 0.02), "v1_b": n(ks[13], (256,), 0.02),
        "v2_w": n(ks[14], (1, 256), 0.05),    "v2_b": n(ks[15], (1,), 0.05),
        "a1_w": n(ks[16], (256, 2592), 0.02), "a1_b": n(ks[17], (256,), 0.02),
        "a2_w": n(ks[18], (outputs, 256), 0.05), "a2_b": n(ks[19], (outputs,), 0.05),
    }


def fold_params(tp, outputs):
    """One-time host-side folding: 1/255 + eval-mode BN into conv GEMM weights, NHWC
    row permutation + stream concatenation for the dueling head, bf16 MXU operands."""
    eps = 1e-5
    s1 = tp["bn1_gamma"] / jnp.sqrt(tp["bn1_var"] + eps)
    s2 = tp["bn2_gamma"] / jnp.sqrt(tp["bn2_var"] + eps)
    w1 = tp["conv1_w"].reshape(16, -1).T * (s1 / 255.0)[None, :]          # (256, 16)
    b1 = (tp["conv1_b"] - tp["bn1_mean"]) * s1 + tp["bn1_beta"]
    w2 = tp["conv2_w"].reshape(32, -1).T * s2[None, :]                    # (256, 32)
    b2 = (tp["conv2_b"] - tp["bn2_mean"]) * s2 + tp["bn2_beta"]

    def nchw_to_nhwc_rows(W):   # W: (out, 2592) with input order (C=32,H=9,W=9)
        return W.reshape(W.shape[0], 32, 9, 9).transpose(0, 2, 3, 1).reshape(W.shape[0], 2592).T

    w1h = jnp.concatenate([nchw_to_nhwc_rows(tp["v1_w"]),
                           nchw_to_nhwc_rows(tp["a1_w"])], axis=1)        # (2592, 512)
    b1h = jnp.concatenate([tp["v1_b"], tp["a1_b"]]).reshape(1, 512)
    w2h = jnp.zeros((512, 1 + outputs), jnp.float32)
    w2h = w2h.at[:256, 0].set(tp["v2_w"][0])                              # value column
    w2h = w2h.at[256:, 1:].set(tp["a2_w"].T)                              # advantage columns
    b2h = jnp.concatenate([tp["v2_b"], tp["a2_b"]]).reshape(1, 1 + outputs)
    return {
        "w1": w1.astype(jnp.bfloat16), "b1": b1.reshape(1, 16).astype(jnp.float32),
        "w2": w2.astype(jnp.bfloat16), "b2": b2.reshape(1, 32).astype(jnp.float32),
        "w1h": w1h.astype(jnp.bfloat16), "b1h": b1h.astype(jnp.float32),
        "w2h": w2h.astype(jnp.float32), "b2h": b2h.astype(jnp.float32),
    }


# ------------------------ pure-JAX reference (f32) --------------------------


@jax.jit
def reference_forward(x, tp):
    """Direct f32 mirror of the PyTorch forward (independent of the kernel path)."""
    eps = 1e-5
    hi = lax.Precision.HIGHEST

    def bn(z, g, b, m, v):
        return ((z - m[None, :, None, None]) / jnp.sqrt(v + eps)[None, :, None, None]
                * g[None, :, None, None] + b[None, :, None, None])

    B = x.shape[0]
    h = x / 255.0
    z = lax.conv_general_dilated(h, tp["conv1_w"], (4, 4), "VALID",
                                 dimension_numbers=("NCHW", "OIHW", "NCHW"), precision=hi)
    z = z + tp["conv1_b"][None, :, None, None]
    z = jnp.maximum(bn(z, tp["bn1_gamma"], tp["bn1_beta"], tp["bn1_mean"], tp["bn1_var"]), 0.0)
    z = lax.conv_general_dilated(z, tp["conv2_w"], (2, 2), "VALID",
                                 dimension_numbers=("NCHW", "OIHW", "NCHW"), precision=hi)
    z = z + tp["conv2_b"][None, :, None, None]
    z = jnp.maximum(bn(z, tp["bn2_gamma"], tp["bn2_beta"], tp["bn2_mean"], tp["bn2_var"]), 0.0)
    f = z.reshape(B, -1)                                        # nn.Flatten on NCHW
    hv = jnp.maximum(jnp.dot(f, tp["v1_w"].T, precision=hi) + tp["v1_b"], 0.0)
    v = jnp.dot(hv, tp["v2_w"].T, precision=hi) + tp["v2_b"]
    ha = jnp.maximum(jnp.dot(f, tp["a1_w"].T, precision=hi) + tp["a1_b"], 0.0)
    a = jnp.dot(ha, tp["a2_w"].T, precision=hi) + tp["a2_b"]
    return v + (a - jnp.mean(a))


if __name__ == "__main__":
    OUTPUTS = 6
    key = jax.random.PRNGKey(0)
    kx, kp = jax.random.split(key)
    torch_params = init_torch_params(kp, OUTPUTS)
    kernel_params = fold_params(torch_params, OUTPUTS)

    # Module asserts (1,4,84,84) or (32,4,84,84); run both (B=32 exercises the tiled grid).
    for batch in (1, 32):
        xk = jax.random.fold_in(kx, batch)
        x = jax.random.randint(xk, (batch, 4, 84, 84), 0, 256).astype(jnp.float32)

        q = jax.block_until_ready(model2layer_forward(x, kernel_params))
        assert q.shape == (batch, OUTPUTS) and q.dtype == jnp.float32

        q_ref = jax.block_until_ready(reference_forward(x, torch_params))
        max_err = float(jnp.max(jnp.abs(q - q_ref)))
        assert jnp.allclose(q, q_ref, rtol=1e-2, atol=1e-2), (batch, max_err, q, q_ref)

    print("KERNEL_OK")
</pallas_src>

<mosaic_0001>
module attributes {stable_mosaic.version = 11 : i64} {
  func.func @_conv_gemm_kernel(%arg0: i32, %arg1: memref<400x256xbf16, #tpu.memory_space<vmem>>, %arg2: memref<256x16xbf16, #tpu.memory_space<vmem>>, %arg3: memref<1x16xf32, #tpu.memory_space<vmem>>, %arg4: memref<400x16xbf16, #tpu.memory_space<vmem>>) attributes {dimension_semantics = [#tpu.dimension_semantics<parallel>], iteration_bounds = array<i64: 1>, scalar_prefetch = 0 : i64, scratch_operands = 0 : i64, tpu.core_type = #tpu.core_type<tc>, window_params = [{transform_indices = @transform_0, window_bounds = array<i64: 400, 256>}, {pipeline_mode = #tpu.pipeline_mode<synchronous>, transform_indices = @transform_1, window_bounds = array<i64: 256, 16>}, {pipeline_mode = #tpu.pipeline_mode<synchronous>, transform_indices = @transform_2, window_bounds = array<i64: 1, 16>}, {transform_indices = @transform_3, window_bounds = array<i64: 400, 16>}]} {
    %c0 = arith.constant 0 : index
    %c0_0 = arith.constant 0 : index
    %0 = vector.load %arg1[%c0, %c0_0] : memref<400x256xbf16, #tpu.memory_space<vmem>>, vector<400x256xbf16>
    %c0_1 = arith.constant 0 : index
    %c0_2 = arith.constant 0 : index
    %1 = vector.load %arg2[%c0_1, %c0_2] : memref<256x16xbf16, #tpu.memory_space<vmem>>, vector<256x16xbf16>
    %cst = arith.constant dense<0.000000e+00> : vector<400x16xf32>
    %2 = tpu.matmul %0, %1, %cst {dimension_numbers = #tpu.dot_dimension_numbers<[1], [0], [0], [1], [0, 0, 1, 1], [], []>} : vector<400x256xbf16>, vector<256x16xbf16>, vector<400x16xf32> -> vector<400x16xf32>
    %c0_3 = arith.constant 0 : index
    %c0_4 = arith.constant 0 : index
    %3 = vector.load %arg3[%c0_3, %c0_4] : memref<1x16xf32, #tpu.memory_space<vmem>>, vector<1x16xf32>
    %4 = vector.broadcast %3 : vector<1x16xf32> to vector<400x16xf32>
    %5 = arith.addf %2, %4 : vector<400x16xf32>
    %cst_5 = arith.constant 0.000000e+00 : f32
    %6 = vector.broadcast %cst_5 : f32 to vector<400x16xf32>
    %7 = arith.maximumf %5, %6 : vector<400x16xf32>
    %8 = arith.truncf %7 : vector<400x16xf32> to vector<400x16xbf16>
    %c0_6 = arith.constant 0 : index
    %c0_7 = arith.constant 0 : index
    %9 = vector.load %arg4[%c0_6, %c0_7] : memref<400x16xbf16, #tpu.memory_space<vmem>>, vector<400x16xbf16>
    tpu.vector_store %arg4[%c0_6, %c0_7], %8 {strides = array<i32>} : memref<400x16xbf16, #tpu.memory_space<vmem>>, vector<400x16xbf16>,
    return
  }
  func.func @transform_0(%arg0: i32) -> (i32, i32) {
    %c0_i32 = arith.constant 0 : i32
    %c0_i32_0 = arith.constant 0 : i32
    return %arg0, %c0_i32 : i32, i32
  }
  func.func @transform_1(%arg0: i32) -> (i32, i32) {
    %c0_i32 = arith.constant 0 : i32
    %c0_i32_0 = arith.constant 0 : i32
    %c0_i32_1 = arith.constant 0 : i32
    return %c0_i32, %c0_i32_0 : i32, i32
  }
  func.func @transform_2(%arg0: i32) -> (i32, i32) {
    %c0_i32 = arith.constant 0 : i32
    %c0_i32_0 = arith.constant 0 : i32
    %c0_i32_1 = arith.constant 0 : i32
    return %c0_i32, %c0_i32_0 : i32, i32
  }
  func.func @transform_3(%arg0: i32) -> (i32, i32) {
    %c0_i32 = arith.constant 0 : i32
    %c0_i32_0 = arith.constant 0 : i32
    return %arg0, %c0_i32 : i32, i32
  }
}

module attributes {stable_mosaic.version = 11 : i64} {
  func.func @_conv_gemm_kernel(%arg0: i32, %arg1: memref<81x256xbf16, #tpu.memory_space<vmem>>, %arg2: memref<256x32xbf16, #tpu.memory_space<vmem>>, %arg3: memref<1x32xf32, #tpu.memory_space<vmem>>, %arg4: memref<81x32xbf16, #tpu.memory_space<vmem>>) attributes {dimension_semantics = [#tpu.dimension_semantics<parallel>], iteration_bounds = array<i64: 1>, scalar_prefetch = 0 : i64, scratch_operands = 0 : i64, tpu.core_type = #tpu.core_type<tc>, window_params = [{transform_indices = @transform_0, window_bounds = array<i64: 81, 256>}, {pipeline_mode = #tpu.pipeline_mode<synchronous>, transform_indices = @transform_1, window_bounds = array<i64: 256, 32>}, {pipeline_mode = #tpu.pipeline_mode<synchronous>, transform_indices = @transform_2, window_bounds = array<i64: 1, 32>}, {transform_indices = @transform_3, window_bounds = array<i64: 81, 32>}]} {
    %c0 = arith.constant 0 : index
    %c0_0 = arith.constant 0 : index
    %0 = vector.load %arg1[%c0, %c0_0] : memref<81x256xbf16, #tpu.memory_space<vmem>>, vector<81x256xbf16>
    %c0_1 = arith.constant 0 : index
    %c0_2 = arith.constant 0 : index
    %1 = vector.load %arg2[%c0_1, %c0_2] : memref<256x32xbf16, #tpu.memory_space<vmem>>, vector<256x32xbf16>
    %cst = arith.constant dense<0.000000e+00> : vector<81x32xf32>
    %2 = tpu.matmul %0, %1, %cst {dimension_numbers = #tpu.dot_dimension_numbers<[1], [0], [0], [1], [0, 0, 1, 1], [], []>} : vector<81x256xbf16>, vector<256x32xbf16>, vector<81x32xf32> -> vector<81x32xf32>
    %c0_3 = arith.constant 0 : index
    %c0_4 = arith.constant 0 : index
    %3 = vector.load %arg3[%c0_3, %c0_4] : memref<1x32xf32, #tpu.memory_space<vmem>>, vector<1x32xf32>
    %4 = vector.broadcast %3 : vector<1x32xf32> to vector<81x32xf32>
    %5 = arith.addf %2, %4 : vector<81x32xf32>
    %cst_5 = arith.constant 0.000000e+00 : f32
    %6 = vector.broadcast %cst_5 : f32 to vector<81x32xf32>
    %7 = arith.maximumf %5, %6 : vector<81x32xf32>
    %8 = arith.truncf %7 : vector<81x32xf32> to vector<81x32xbf16>
    %c0_6 = arith.constant 0 : index
    %c0_7 = arith.constant 0 : index
    %9 = vector.load %arg4[%c0_6, %c0_7] : memref<81x32xbf16, #tpu.memory_space<vmem>>, vector<81x32xbf16>
    tpu.vector_store %arg4[%c0_6, %c0_7], %8 {strides = array<i32>} : memref<81x32xbf16, #tpu.memory_space<vmem>>, vector<81x32xbf16>,
    return
  }
  func.func @transform_0(%arg0: i32) -> (i32, i32) {
    %c0_i32 = arith.constant 0 : i32
    %c0_i32_0 = arith.constant 0 : i32
    return %arg0, %c0_i32 : i32, i32
  }
  func.func @transform_1(%arg0: i32) -> (i32, i32) {
    %c0_i32 = arith.constant 0 : i32
    %c0_i32_0 = arith.constant 0 : i32
    %c0_i32_1 = arith.constant 0 : i32
    return %c0_i32, %c0_i32_0 : i32, i32
  }
  func.func @transform_2(%arg0: i32) -> (i32, i32) {
    %c0_i32 = arith.constant 0 : i32
    %c0_i32_0 = arith.constant 0 : i32
    %c0_i32_1 = arith.constant 0 : i32
    return %c0_i32, %c0_i32_0 : i32, i32
  }
  func.func @transform_3(%arg0: i32) -> (i32, i32) {
    %c0_i32 = arith.constant 0 : i32
    %c0_i32_0 = arith.constant 0 : i32
    return %arg0, %c0_i32 : i32, i32
  }
}

module attributes {stable_mosaic.version = 11 : i64} {
  func.func @_dueling_head_kernel(%arg0: i32, %arg1: memref<1x2592xbf16, #tpu.memory_space<vmem>>, %arg2: memref<2592x512xbf16, #tpu.memory_space<vmem>>, %arg3: memref<1x512xf32, #tpu.memory_space<vmem>>, %arg4: memref<512x7xf32, #tpu.memory_space<vmem>>, %arg5: memref<1x7xf32, #tpu.memory_space<vmem>>, %arg6: memref<1x6xf32, #tpu.memory_space<vmem>>) attributes {dimension_semantics = [#tpu.dimension_semantics<arbitrary>], iteration_bounds = array<i64: 1>, scalar_prefetch = 0 : i64, scratch_operands = 0 : i64, tpu.core_type = #tpu.core_type<tc>, window_params = [{pipeline_mode = #tpu.pipeline_mode<synchronous>, transform_indices = @transform_0, window_bounds = array<i64: 1, 2592>}, {pipeline_mode = #tpu.pipeline_mode<synchronous>, transform_indices = @transform_1, window_bounds = array<i64: 2592, 512>}, {pipeline_mode = #tpu.pipeline_mode<synchronous>, transform_indices = @transform_2, window_bounds = array<i64: 1, 512>}, {pipeline_mode = #tpu.pipeline_mode<synchronous>, transform_indices = @transform_3, window_bounds = array<i64: 512, 7>}, {pipeline_mode = #tpu.pipeline_mode<synchronous>, transform_indices = @transform_4, window_bounds = array<i64: 1, 7>}, {pipeline_mode = #tpu.pipeline_mode<synchronous>, transform_indices = @transform_5, window_bounds = array<i64: 1, 6>}]} {
    %c0 = arith.constant 0 : index
    %c0_0 = arith.constant 0 : index
    %0 = vector.load %arg1[%c0, %c0_0] : memref<1x2592xbf16, #tpu.memory_space<vmem>>, vector<1x2592xbf16>
    %c0_1 = arith.constant 0 : index
    %c0_2 = arith.constant 0 : index
    %1 = vector.load %arg2[%c0_1, %c0_2] : memref<2592x512xbf16, #tpu.memory_space<vmem>>, vector<2592x512xbf16>
    %cst = arith.constant dense<0.000000e+00> : vector<1x512xf32>
    %2 = tpu.matmul %0, %1, %cst {dimension_numbers = #tpu.dot_dimension_numbers<[1], [0], [0], [1], [0, 0, 1, 1], [], []>} : vector<1x2592xbf16>, vector<2592x512xbf16>, vector<1x512xf32> -> vector<1x512xf32>
    %c0_3 = arith.constant 0 : index
    %c0_4 = arith.constant 0 : index
    %3 = vector.load %arg3[%c0_3, %c0_4] : memref<1x512xf32, #tpu.memory_space<vmem>>, vector<1x512xf32>
    %4 = arith.addf %2, %3 : vector<1x512xf32>
    %cst_5 = arith.constant 0.000000e+00 : f32
    %5 = vector.broadcast %cst_5 : f32 to vector<1x512xf32>
    %6 = arith.maximumf %4, %5 : vector<1x512xf32>
    %c0_6 = arith.constant 0 : index
    %c0_7 = arith.constant 0 : index
    %7 = vector.load %arg4[%c0_6, %c0_7] : memref<512x7xf32, #tpu.memory_space<vmem>>, vector<512x7xf32>
    %cst_8 = arith.constant dense<0.000000e+00> : vector<1x7xf32>
    %8 = tpu.matmul %6, %7, %cst_8 {dimension_numbers = #tpu.dot_dimension_numbers<[1], [0], [0], [1], [0, 0, 1, 1], [], []>} : vector<1x512xf32>, vector<512x7xf32>, vector<1x7xf32> -> vector<1x7xf32>
    %c0_9 = arith.constant 0 : index
    %c0_10 = arith.constant 0 : index
    %9 = vector.load %arg5[%c0_9, %c0_10] : memref<1x7xf32, #tpu.memory_space<vmem>>, vector<1x7xf32>
    %10 = arith.addf %8, %9 : vector<1x7xf32>
    %11 = vector.extract_strided_slice %10 {offsets = [0, 0], sizes = [1, 1], strides = [1, 1]} : vector<1x7xf32> to vector<1x1xf32>
    %12 = vector.extract_strided_slice %10 {offsets = [0, 1], sizes = [1, 6], strides = [1, 1]} : vector<1x7xf32> to vector<1x6xf32>
    %13 = vector.shape_cast %12 : vector<1x6xf32> to vector<1x1x6xf32>
    %cst_11 = arith.constant dense<0.000000e+00> : vector<1xf32>
    %14 = vector.multi_reduction <add>, %13, %cst_11 [1, 2] : vector<1x1x6xf32> to vector<1xf32>
    %15 = vector.shape_cast %14 : vector<1xf32> to vector<1x1x1xf32>
    %16 = vector.extract %15[0, 0, 0] : f32 from vector<1x1x1xf32>
    %cst_12 = arith.constant 6.000000e+00 : f32
    %17 = arith.divf %16, %cst_12 : f32
    %18 = vector.broadcast %17 : f32 to vector<1x6xf32>
    %19 = arith.subf %12, %18 : vector<1x6xf32>
    %20 = vector.broadcast %11 : vector<1x1xf32> to vector<1x6xf32>
    %21 = arith.addf %20, %19 : vector<1x6xf32>
    %c0_13 = arith.constant 0 : index
    %c0_14 = arith.constant 0 : index
    %22 = vector.load %arg6[%c0_13, %c0_14] : memref<1x6xf32, #tpu.memory_space<vmem>>, vector<1x6xf32>
    tpu.vector_store %arg6[%c0_13, %c0_14], %21 {strides = array<i32>} : memref<1x6xf32, #tpu.memory_space<vmem>>, vector<1x6xf32>,
    return
  }
  func.func @transform_0(%arg0: i32) -> (i32, i32) {
    %c0_i32 = arith.constant 0 : i32
    %c0_i32_0 = arith.constant 0 : i32
    %c0_i32_1 = arith.constant 0 : i32
    return %c0_i32, %c0_i32_0 : i32, i32
  }
  func.func @transform_1(%arg0: i32) -> (i32, i32) {
    %c0_i32 = arith.constant 0 : i32
    %c0_i32_0 = arith.constant 0 : i32
    %c0_i32_1 = arith.constant 0 : i32
    return %c0_i32, %c0_i32_0 : i32, i32
  }
  func.func @transform_2(%arg0: i32) -> (i32, i32) {
    %c0_i32 = arith.constant 0 : i32
    %c0_i32_0 = arith.constant 0 : i32
    %c0_i32_1 = arith.constant 0 : i32
    return %c0_i32, %c0_i32_0 : i32, i32
  }
  func.func @transform_3(%arg0: i32) -> (i32, i32) {
    %c0_i32 = arith.constant 0 : i32
    %c0_i32_0 = arith.constant 0 : i32
    %c0_i32_1 = arith.constant 0 : i32
    return %c0_i32, %c0_i32_0 : i32, i32
  }
  func.func @transform_4(%arg0: i32) -> (i32, i32) {
    %c0_i32 = arith.constant 0 : i32
    %c0_i32_0 = arith.constant 0 : i32
    %c0_i32_1 = arith.constant 0 : i32
    return %c0_i32, %c0_i32_0 : i32, i32
  }
  func.func @transform_5(%arg0: i32) -> (i32, i32) {
    %c0_i32 = arith.constant 0 : i32
    %c0_i32_0 = arith.constant 0 : i32
    %c0_i32_1 = arith.constant 0 : i32
    return %c0_i32, %c0_i32_0 : i32, i32
  }
}

</mosaic_0001>

<bundles_post_ra>
// kernel: model2layer_forward.3
= control target key start
LH: loop header
LB: loop body
LE: loop exit
PB: predicated region body
PF: predicated region fallthrough
CT: control target
= control target key end

     0   :  { %v1279_v0 = vmov 0   ;;  %vm933_vm0 = vcmask 125952   ;;  %s1785_s1 = inlined_call_operand.vmem [shape: bf16[256,16], index: 1, kind: input, shape index: {}]   ;;  %s1786_s0 = inlined_call_operand.vmem [shape: bf16[400,256], index: 0, kind: input, shape index: {}]   ;;  %s1787_s2 = inlined_call_operand.vmem [shape: f32[1,16], index: 2, kind: input, shape index: {}]   ;;  %s1788_s3 = inlined_call_operand.vmem [shape: bf16[400,16], index: 3, kind: output, shape index: {}]  }
   0x1   :  { %450 = vmatprep.subr.bf16.mxu0 %v1279_v0  ;;  %v1188_v1 = vld [vmem:[%s1785_s1 + $0x38] sm:$0xff]   ;;  %1155 = vmatprep.subr.bf16.mxu1 %v1279_v0  ;;  %v1189_v2 = vld [vmem:[%s1785_s1 + $0x30] sm:$0xff]   ;;  %v1190_v3 = vld [vmem:[%s1785_s1 + $0x28] sm:$0xff]  }
   0x2   :  { %451 = vmatpush1.bf16.msra.mxu0 %v1188_v1  ;;  %1171 = vmatpush1.bf16.msra.mxu1 %v1188_v1  ;;  %v1191_v4 = vld [vmem:[%s1785_s1 + $0x20] sm:$0xff]   ;;  %v1192_v5 = vld [vmem:[%s1785_s1 + $0x18] sm:$0xff]   ;;  %v1193_v7 = vld [vmem:[%s1785_s1 + $0x10] sm:$0xff]  }
   0x3   :  { %452 = vmatprep.subr.bf16.mxu0 %v1279_v0  ;;  %1156 = vmatprep.subr.bf16.mxu1 %v1279_v0  ;;  %v1206_v6 = vld [vmem:[%s1786_s0 + $0x4] ss:$8 sps:$4 sm:$0xff]   ;;  %v1209_v8 = vld [vmem:[%s1786_s0 + $0xd4] ss:$8 sps:$4 sm:$0xff]   ;;  %v1204_v19 = vld [vmem:[%s1786_s0] ss:$8 sps:$4 sm:$0xff]  }
   0x4   :  { %482 = vmatprep.mubr.bf16.mxu0 %v1206_v6  ;;  %586 = vmatprep.mubr.bf16.mxu1 %v1209_v8  ;;  %v1194_v9 = vld [vmem:[%s1785_s1 + $0x8] sm:$0xff]   ;;  %v1195_v10 = vld [vmem:[%s1785_s1] sm:$0xff]   ;;  %v1196_v11 = vld [vmem:[%s1785_s1 + $0x78] sm:$0xff]  }
   0x5   :  { %v1197_v12 = vld [vmem:[%s1785_s1 + $0x70] sm:$0xff]   ;;  %v1198_v13 = vld [vmem:[%s1785_s1 + $0x68] sm:$0xff]   ;;  %v1199_v14 = vld [vmem:[%s1785_s1 + $0x60] sm:$0xff]  }
   0x6   :  { %453 = vmatpush1.bf16.msra.mxu0 %v1189_v2  ;;  %1172 = vmatpush1.bf16.msra.mxu1 %v1189_v2  ;;  %v1200_v15 = vld [vmem:[%s1785_s1 + $0x58] sm:$0xff]   ;;  %v1201_v16 = vld [vmem:[%s1785_s1 + $0x50] sm:$0xff]   ;;  %v1202_v17 = vld [vmem:[%s1785_s1 + $0x48] sm:$0xff]  }
   0x7   :  { %454 = vmatprep.subr.bf16.mxu0 %v1279_v0  ;;  %1157 = vmatprep.subr.bf16.mxu1 %v1279_v0  ;;  %v1203_v18 = vld [vmem:[%s1785_s1 + $0x40] sm:$0xff]   ;;  %v1207_v20 = vld [vmem:[%s1786_s0 + $0xd0] ss:$8 sps:$4 sm:$0xff]   ;;  %v1210_v21 = vld [vmem:[%s1786_s0 + $0x14] ss:$8 sps:$4 sm:$0xff]  }
   0x8   :  { %v1213_v22 = vld [vmem:[%s1786_s0 + $0xe4] ss:$8 sps:$4 sm:$0xff]   ;;  %v1212_v23 = vld [vmem:[%s1786_s0 + $0x10] ss:$8 sps:$4 sm:$0xff]   ;;  %v1215_v24 = vld [vmem:[%s1786_s0 + $0xe0] ss:$8 sps:$4 sm:$0xff]  }
   0x9   :  { %v1216_v25 = vld [vmem:[%s1786_s0 + $0x24] ss:$8 sps:$4 sm:$0xff]   ;;  %v1219_v26 = vld [vmem:[%s1786_s0 + $0xf4] ss:$8 sps:$4 sm:$0xff]   ;;  %v1218_v27 = vld [vmem:[%s1786_s0 + $0x20] ss:$8 sps:$4 sm:$0xff]  }
   0xa   :  { %455 = vmatpush1.bf16.msra.mxu0 %v1190_v3  ;;  %1173 = vmatpush1.bf16.msra.mxu1 %v1190_v3  ;;  %v1221_v28 = vld [vmem:[%s1786_s0 + $0xf0] ss:$8 sps:$4 sm:$0xff]   ;;  %v1222_v29 = vld [vmem:[%s1786_s0 + $0x34] ss:$8 sps:$4 sm:$0xff]   ;;  %v1225_v30 = vld [vmem:[%s1786_s0 + $0x104] ss:$8 sps:$4 sm:$0xff]  }
   0xb   :  { %456 = vmatprep.subr.bf16.mxu0 %v1279_v0  ;;  %1158 = vmatprep.subr.bf16.mxu1 %v1279_v0  ;;  %v1224_v31 = vld [vmem:[%s1786_s0 + $0x30] ss:$8 sps:$4 sm:$0xff]   ;;  %v1227_v32 = vld [vmem:[%s1786_s0 + $0x100] ss:$8 sps:$4 sm:$0xff]   ;;  %v1228_v33 = vld [vmem:[%s1786_s0 + $0x44] ss:$8 sps:$4 sm:$0xff]  }
   0xc   :  { %v1231_v34 = vld [vmem:[%s1786_s0 + $0x114] ss:$8 sps:$4 sm:$0xff]   ;;  %v1230_v35 = vld [vmem:[%s1786_s0 + $0x40] ss:$8 sps:$4 sm:$0xff]   ;;  %v1233_v36 = vld [vmem:[%s1786_s0 + $0x110] ss:$8 sps:$4 sm:$0xff]  }
   0xd   :  { %v1234_v37 = vld [vmem:[%s1786_s0 + $0x54] ss:$8 sps:$4 sm:$0xff]   ;;  %v1237_v38 = vld [vmem:[%s1786_s0 + $0x124] ss:$8 sps:$4 sm:$0xff]   ;;  %v1236_v39 = vld [vmem:[%s1786_s0 + $0x50] ss:$8 sps:$4 sm:$0xff]  }
   0xe   :  { %457 = vmatpush1.bf16.msra.mxu0 %v1191_v4  ;;  %1174 = vmatpush1.bf16.msra.mxu1 %v1191_v4  ;;  %v1239_v40 = vld [vmem:[%s1786_s0 + $0x120] ss:$8 sps:$4 sm:$0xff]   ;;  %v1240_v41 = vld [vmem:[%s1786_s0 + $0x64] ss:$8 sps:$4 sm:$0xff]   ;;  %v1243_v42 = vld [vmem:[%s1786_s0 + $0x134] ss:$8 sps:$4 sm:$0xff]  }
   0xf   :  { %458 = vmatprep.subr.bf16.mxu0 %v1279_v0  ;;  %1159 = vmatprep.subr.bf16.mxu1 %v1279_v0  ;;  %v1242_v43 = vld [vmem:[%s1786_s0 + $0x60] ss:$8 sps:$4 sm:$0xff]   ;;  %v1245_v44 = vld [vmem:[%s1786_s0 + $0x130] ss:$8 sps:$4 sm:$0xff]   ;;  %v1246_v45 = vld [vmem:[%s1786_s0 + $0x74] ss:$8 sps:$4 sm:$0xff]  }
  0x10   :  { %v1249_v46 = vld [vmem:[%s1786_s0 + $0x144] ss:$8 sps:$4 sm:$0xff]   ;;  %v1248_v47 = vld [vmem:[%s1786_s0 + $0x70] ss:$8 sps:$4 sm:$0xff]   ;;  %v1251_v48 = vld [vmem:[%s1786_s0 + $0x140] ss:$8 sps:$4 sm:$0xff]  }
  0x11   :  { %v1252_v49 = vld [vmem:[%s1786_s0 + $0x84] ss:$8 sps:$4 sm:$0xff]   ;;  %v1255_v50 = vld [vmem:[%s1786_s0 + $0x154] ss:$8 sps:$4 sm:$0xff]   ;;  %v1254_v51 = vld [vmem:[%s1786_s0 + $0x80] ss:$8 sps:$4 sm:$0xff]  }
  0x12   :  { %459 = vmatpush1.bf16.msra.mxu0 %v1192_v5  ;;  %1175 = vmatpush1.bf16.msra.mxu1 %v1192_v5  ;;  %v1257_v52 = vld [vmem:[%s1786_s0 + $0x150] ss:$8 sps:$4 sm:$0xff]   ;;  %v1258_v53 = vld [vmem:[%s1786_s0 + $0x94] ss:$8 sps:$4 sm:$0xff]   ;;  %v1261_v54 = vld [vmem:[%s1786_s0 + $0x164] ss:$8 sps:$4 sm:$0xff]  }
  0x13   :  { %460 = vmatprep.subr.bf16.mxu0 %v1279_v0  ;;  %1160 = vmatprep.subr.bf16.mxu1 %v1279_v0  ;;  %v1260_v55 = vld [vmem:[%s1786_s0 + $0x90] ss:$8 sps:$4 sm:$0xff]   ;;  %v1263_v56 = vld [vmem:[%s1786_s0 + $0x160] ss:$8 sps:$4 sm:$0xff]   ;;  %v1264_v57 = vld [vmem:[%s1786_s0 + $0xa4] ss:$8 sps:$4 sm:$0xff]  }
  0x14   :  { %v1267_v58 = vld [vmem:[%s1786_s0 + $0x174] ss:$8 sps:$4 sm:$0xff]   ;;  %v1266_v59 = vld [vmem:[%s1786_s0 + $0xa0] ss:$8 sps:$4 sm:$0xff]   ;;  %v1269_v60 = vld [vmem:[%s1786_s0 + $0x170] ss:$8 sps:$4 sm:$0xff]  }
  0x15   :  { %v1270_v61 = vld [vmem:[%s1786_s0 + $0xb4] ss:$8 sps:$4 sm:$0xff]   ;;  %v1273_v62 = vld [vmem:[%s1786_s0 + $0x184] ss:$8 sps:$4 sm:$0xff]   ;;  %v1272_v63 = vld [vmem:[%s1786_s0 + $0xb0] ss:$8 sps:$4 sm:$0xff]  }
  0x16   :  { %461 = vmatpush1.bf16.msra.mxu0 %v1193_v7  ;;  %1176 = vmatpush1.bf16.msra.mxu1 %v1193_v7  ;;  %v1276_v1 = vld [vmem:[%s1786_s0 + $0xc4] ss:$8 sps:$4 sm:$0xff]   ;;  %v1278_v2 = vld [vmem:[%s1786_s0 + $0xc0] ss:$8 sps:$4 sm:$0xff]  }
  0x17   :  { %462 = vmatprep.subr.bf16.mxu0 %v1279_v0  ;;  %1161 = vmatprep.subr.bf16.mxu1 %v1279_v0  ;;  %v1533_v3 = vld [vmem:[%s1787_s2] ss:$0 sm:$0xff] }
  0x1a   :  { %463 = vmatpush1.bf16.msra.mxu0 %v1194_v9  ;;  %1177 = vmatpush1.bf16.msra.mxu1 %v1194_v9 }
  0x1b   :  { %464 = vmatprep.subr.bf16.mxu0 %v1279_v0  ;;  %1162 = vmatprep.subr.bf16.mxu1 %v1279_v0 }
  0x1e   :  { %465 = vmatpush1.bf16.msra.mxu0 %v1195_v10  ;;  %1178 = vmatpush1.bf16.msra.mxu1 %v1195_v10 }
  0x1f   :  { %466 = vmatprep.subr.bf16.mxu0 %v1279_v0  ;;  %1163 = vmatprep.subr.bf16.mxu1 %v1279_v0 }
  0x22   :  { %467 = vmatpush2.bf16.msra.mxu0 %v1196_v11  ;;  %1179 = vmatpush2.bf16.msra.mxu1 %v1196_v11 }
  0x23   :  { %468 = vmatprep.subr.bf16.mxu0 %v1279_v0  ;;  %1164 = vmatprep.subr.bf16.mxu1 %v1279_v0 }
  0x26   :  { %469 = vmatpush2.bf16.msra.mxu0 %v1197_v12  ;;  %1180 = vmatpush2.bf16.msra.mxu1 %v1197_v12 }
  0x27   :  { %470 = vmatprep.subr.bf16.mxu0 %v1279_v0  ;;  %1165 = vmatprep.subr.bf16.mxu1 %v1279_v0 }
  0x2a   :  { %471 = vmatpush2.bf16.msra.mxu0 %v1198_v13  ;;  %1181 = vmatpush2.bf16.msra.mxu1 %v1198_v13 }
  0x2b   :  { %472 = vmatprep.subr.bf16.mxu0 %v1279_v0  ;;  %1166 = vmatprep.subr.bf16.mxu1 %v1279_v0 }
  0x2e   :  { %473 = vmatpush2.bf16.msra.mxu0 %v1199_v14  ;;  %1182 = vmatpush2.bf16.msra.mxu1 %v1199_v14 }
  0x2f   :  { %474 = vmatprep.subr.bf16.mxu0 %v1279_v0  ;;  %1167 = vmatprep.subr.bf16.mxu1 %v1279_v0 }
  0x32   :  { %475 = vmatpush2.bf16.msra.mxu0 %v1200_v15  ;;  %1183 = vmatpush2.bf16.msra.mxu1 %v1200_v15 }
  0x33   :  { %476 = vmatprep.subr.bf16.mxu0 %v1279_v0  ;;  %1168 = vmatprep.subr.bf16.mxu1 %v1279_v0 }
  0x36   :  { %477 = vmatpush2.bf16.msra.mxu0 %v1201_v16  ;;  %1184 = vmatpush2.bf16.msra.mxu1 %v1201_v16 }
  0x37   :  { %478 = vmatprep.subr.bf16.mxu0 %v1279_v0  ;;  %1169 = vmatprep.subr.bf16.mxu1 %v1279_v0 }
  0x3a   :  { %479 = vmatpush2.bf16.msra.mxu0 %v1202_v17  ;;  %1185 = vmatpush2.bf16.msra.mxu1 %v1202_v17 }
  0x3b   :  { %480 = vmatprep.subr.bf16.mxu0 %v1279_v0  ;;  %1170 = vmatprep.subr.bf16.mxu1 %v1279_v0  ;;  %v1275_v0 = vld [vmem:[%s1786_s0 + $0x180] ss:$8 sps:$4 sm:$0xff]  }
  0x3e   :  { %481 = vmatpush2.bf16.msra.mxu0 %v1203_v18  ;;  %1186 = vmatpush2.bf16.msra.mxu1 %v1203_v18 }
  0x41   :  { %483 = vmatmul.mubr.bf16.vlgmr.msra.gmra.mxu0 %v1204_v19  ;;  %587 = vmatmul.mubr.bf16.vlgmr.msra.gmra.mxu1 %v1207_v20 }
  0x42   :  { %490 = vmatprep.mubr.bf16.mxu0 %v1210_v21  ;;  %594 = vmatprep.mubr.bf16.mxu1 %v1213_v22 }
  0x49   :  { %491 = vmatmul.mubr.bf16.gmra.mxu0 %v1212_v23  ;;  %595 = vmatmul.mubr.bf16.gmra.mxu1 %v1215_v24 }
  0x4a   :  { %498 = vmatprep.mubr.bf16.mxu0 %v1216_v25  ;;  %602 = vmatprep.mubr.bf16.mxu1 %v1219_v26 }
  0x51   :  { %499 = vmatmul.mubr.bf16.gmra.mxu0 %v1218_v27  ;;  %603 = vmatmul.mubr.bf16.gmra.mxu1 %v1221_v28 }
  0x52   :  { %506 = vmatprep.mubr.bf16.mxu0 %v1222_v29  ;;  %610 = vmatprep.mubr.bf16.mxu1 %v1225_v30 }
  0x59   :  { %507 = vmatmul.mubr.bf16.gmra.mxu0 %v1224_v31  ;;  %611 = vmatmul.mubr.bf16.gmra.mxu1 %v1227_v32 }
  0x5a   :  { %514 = vmatprep.mubr.bf16.mxu0 %v1228_v33  ;;  %618 = vmatprep.mubr.bf16.mxu1 %v1231_v34 }
  0x61   :  { %515 = vmatmul.mubr.bf16.gmra.mxu0 %v1230_v35  ;;  %619 = vmatmul.mubr.bf16.gmra.mxu1 %v1233_v36 }
  0x62   :  { %522 = vmatprep.mubr.bf16.mxu0 %v1234_v37  ;;  %626 = vmatprep.mubr.bf16.mxu1 %v1237_v38 }
  0x69   :  { %523 = vmatmul.mubr.bf16.gmra.mxu0 %v1236_v39  ;;  %627 = vmatmul.mubr.bf16.gmra.mxu1 %v1239_v40 }
  0x6a   :  { %530 = vmatprep.mubr.bf16.mxu0 %v1240_v41  ;;  %634 = vmatprep.mubr.bf16.mxu1 %v1243_v42 }
  0x71   :  { %531 = vmatmul.mubr.bf16.gmra.mxu0 %v1242_v43  ;;  %635 = vmatmul.mubr.bf16.gmra.mxu1 %v1245_v44 }
  0x72   :  { %538 = vmatprep.mubr.bf16.mxu0 %v1246_v45  ;;  %642 = vmatprep.mubr.bf16.mxu1 %v1249_v46 }
  0x79   :  { %539 = vmatmul.mubr.bf16.gmra.mxu0 %v1248_v47  ;;  %643 = vmatmul.mubr.bf16.gmra.mxu1 %v1251_v48 }
  0x7a   :  { %546 = vmatprep.mubr.bf16.mxu0 %v1252_v49  ;;  %650 = vmatprep.mubr.bf16.mxu1 %v1255_v50 }
  0x81   :  { %547 = vmatmul.mubr.bf16.gmra.mxu0 %v1254_v51  ;;  %651 = vmatmul.mubr.bf16.gmra.mxu1 %v1257_v52 }
  0x82   :  { %554 = vmatprep.mubr.bf16.mxu0 %v1258_v53  ;;  %658 = vmatprep.mubr.bf16.mxu1 %v1261_v54 }
  0x89   :  { %555 = vmatmul.mubr.bf16.gmra.mxu0 %v1260_v55  ;;  %659 = vmatmul.mubr.bf16.gmra.mxu1 %v1263_v56 }
  0x8a   :  { %562 = vmatprep.mubr.bf16.mxu0 %v1264_v57  ;;  %666 = vmatprep.mubr.bf16.mxu1 %v1267_v58 }
  0x91   :  { %563 = vmatmul.mubr.bf16.gmra.mxu0 %v1266_v59  ;;  %667 = vmatmul.mubr.bf16.gmra.mxu1 %v1269_v60 }
  0x92   :  { %570 = vmatprep.mubr.bf16.mxu0 %v1270_v61  ;;  %674 = vmatprep.mubr.bf16.mxu1 %v1273_v62 }
  0x99   :  { %571 = vmatmul.mubr.bf16.gmra.mxu0 %v1272_v63  ;;  %675 = vmatmul.mubr.bf16.gmra.mxu1 %v1275_v0 }
  0x9a   :  { %578 = vmatprep.mubr.bf16.mxu0 %v1276_v1 }
  0xa1   :  { %579 = vmatmul.mubr.bf16.gmra.mxu0 %v1278_v2 }
 0x101   :  { %v484_v4 = vpop.f32.mrf.mxu0  ;;  %v588_v5 = vpop.f32.mrf.mxu1 }
 0x102   :  { %v485_v6 = vadd.f32 %v1533_v3, %v484_v4  ;;  %v589_v7 = vadd.f32 %v1533_v3, %v588_v5 }
 0x103   :  { %v486_v8 = vpop.f32.mrf.mxu0  ;;  %v590_v9 = vpop.f32.mrf.mxu1 }
 0x104   :  { %v683_v10 = vmax.f32 %v485_v6, 0.0  ;;  %v709_v11 = vmax.f32 %v589_v7, 0.0 }
 0x105   :  { %v487_v12 = vpop.f32.mrf.mxu0  ;;  %v591_v13 = vpop.f32.mrf.mxu1 }
 0x106   :  { %v1105_v14 = vpack.c.bf16 %v683_v10, %v683_v10  ;;  %v1131_v15 = vpack.c.bf16 %v709_v11, %v709_v11  ;;  %v488_v16 = vadd.f32 %v1533_v3, %v487_v12  ;;  %v592_v17 = vadd.f32 %v1533_v3, %v591_v13 }
 0x107   :  { %v489_v18 = vpop.f32.mrf.mxu0  ;;  %v593_v19 = vpop.f32.mrf.mxu1 }
 0x108   :  { %934 = vst.msk [vmem:[%s1788_s3] sm:$0xf] %vm933_vm0, %v1105_v14  ;;  %960 = vst.msk [vmem:[%s1788_s3 + $0x68] sm:$0xf] %vm933_vm0, %v1131_v15  ;;  %v684_v20 = vmax.f32 %v488_v16, 0.0  ;;  %v710_v21 = vmax.f32 %v592_v17, 0.0 }
 0x109   :  { %v492_v22 = vpop.f32.mrf.mxu0  ;;  %v596_v23 = vpop.f32.mrf.mxu1 }
 0x10a   :  { %v1106_v24 = vpack.c.bf16 %v684_v20, %v684_v20  ;;  %v1132_v25 = vpack.c.bf16 %v710_v21, %v710_v21  ;;  %v493_v26 = vadd.f32 %v1533_v3, %v492_v22  ;;  %v597_v27 = vadd.f32 %v1533_v3, %v596_v23 }
 0x10b   :  { %v494_v28 = vpop.f32.mrf.mxu0  ;;  %v598_v29 = vpop.f32.mrf.mxu1 }
 0x10c   :  { %935 = vst.msk [vmem:[%s1788_s3 + $0x4] sm:$0xf] %vm933_vm0, %v1106_v24  ;;  %961 = vst.msk [vmem:[%s1788_s3 + $0x6c] sm:$0xf] %vm933_vm0, %v1132_v25  ;;  %v685_v30 = vmax.f32 %v493_v26, 0.0  ;;  %v711_v31 = vmax.f32 %v597_v27, 0.0 }
 0x10d   :  { %v495_v32 = vpop.f32.mrf.mxu0  ;;  %v599_v33 = vpop.f32.mrf.mxu1 }
 0x10e   :  { %v1107_v34 = vpack.c.bf16 %v685_v30, %v685_v30  ;;  %v1133_v35 = vpack.c.bf16 %v711_v31, %v711_v31  ;;  %v496_v36 = vadd.f32 %v1533_v3, %v495_v32  ;;  %v600_v37 = vadd.f32 %v1533_v3, %v599_v33 }
 0x10f   :  { %v497_v38 = vpop.f32.mrf.mxu0  ;;  %v601_v39 = vpop.f32.mrf.mxu1 }
 0x110   :  { %936 = vst.msk [vmem:[%s1788_s3 + $0x8] sm:$0xf] %vm933_vm0, %v1107_v34  ;;  %962 = vst.msk [vmem:[%s1788_s3 + $0x70] sm:$0xf] %vm933_vm0, %v1133_v35  ;;  %v686_v40 = vmax.f32 %v496_v36, 0.0  ;;  %v712_v41 = vmax.f32 %v600_v37, 0.0 }
 0x111   :  { %v500_v42 = vpop.f32.mrf.mxu0  ;;  %v604_v43 = vpop.f32.mrf.mxu1 }
 0x112   :  { %v1108_v44 = vpack.c.bf16 %v686_v40, %v686_v40  ;;  %v1134_v45 = vpack.c.bf16 %v712_v41, %v712_v41  ;;  %v501_v46 = vadd.f32 %v1533_v3, %v500_v42  ;;  %v605_v47 = vadd.f32 %v1533_v3, %v604_v43 }
 0x113   :  { %v502_v48 = vpop.f32.mrf.mxu0  ;;  %v606_v49 = vpop.f32.mrf.mxu1 }
 0x114   :  { %937 = vst.msk [vmem:[%s1788_s3 + $0xc] sm:$0xf] %vm933_vm0, %v1108_v44  ;;  %963 = vst.msk [vmem:[%s1788_s3 + $0x74] sm:$0xf] %vm933_vm0, %v1134_v45  ;;  %v687_v50 = vmax.f32 %v501_v46, 0.0  ;;  %v713_v51 = vmax.f32 %v605_v47, 0.0 }
 0x115   :  { %v503_v52 = vpop.f32.mrf.mxu0  ;;  %v607_v53 = vpop.f32.mrf.mxu1 }
 0x116   :  { %v1109_v54 = vpack.c.bf16 %v687_v50, %v687_v50  ;;  %v1135_v55 = vpack.c.bf16 %v713_v51, %v713_v51  ;;  %v504_v56 = vadd.f32 %v1533_v3, %v503_v52  ;;  %v608_v57 = vadd.f32 %v1533_v3, %v607_v53 }
 0x117   :  { %v505_v58 = vpop.f32.mrf.mxu0  ;;  %v609_v59 = vpop.f32.mrf.mxu1 }
 0x118   :  { %938 = vst.msk [vmem:[%s1788_s3 + $0x10] sm:$0xf] %vm933_vm0, %v1109_v54  ;;  %964 = vst.msk [vmem:[%s1788_s3 + $0x78] sm:$0xf] %vm933_vm0, %v1135_v55  ;;  %v688_v60 = vmax.f32 %v504_v56, 0.0  ;;  %v714_v61 = vmax.f32 %v608_v57, 0.0 }
 0x119   :  { %v508_v62 = vpop.f32.mrf.mxu0  ;;  %v612_v63 = vpop.f32.mrf.mxu1 }
 0x11a   :  { %v1110_v0 = vpack.c.bf16 %v688_v60, %v688_v60  ;;  %v1136_v1 = vpack.c.bf16 %v714_v61, %v714_v61  ;;  %v509_v2 = vadd.f32 %v1533_v3, %v508_v62  ;;  %v613_v4 = vadd.f32 %v1533_v3, %v612_v63 }
 0x11b   :  { %v510_v5 = vpop.f32.mrf.mxu0  ;;  %v614_v6 = vpop.f32.mrf.mxu1 }
 0x11c   :  { %939 = vst.msk [vmem:[%s1788_s3 + $0x14] sm:$0xf] %vm933_vm0, %v1110_v0  ;;  %965 = vst.msk [vmem:[%s1788_s3 + $0x7c] sm:$0xf] %vm933_vm0, %v1136_v1  ;;  %v689_v7 = vmax.f32 %v509_v2, 0.0  ;;  %v715_v8 = vmax.f32 %v613_v4, 0.0 }
 0x11d   :  { %v511_v9 = vpop.f32.mrf.mxu0  ;;  %v615_v10 = vpop.f32.mrf.mxu1 }
 0x11e   :  { %v1111_v11 = vpack.c.bf16 %v689_v7, %v689_v7  ;;  %v1137_v12 = vpack.c.bf16 %v715_v8, %v715_v8  ;;  %v512_v13 = vadd.f32 %v1533_v3, %v511_v9  ;;  %v616_v14 = vadd.f32 %v1533_v3, %v615_v10 }
 0x11f   :  { %v513_v15 = vpop.f32.mrf.mxu0  ;;  %v617_v16 = vpop.f32.mrf.mxu1 }
 0x120   :  { %940 = vst.msk [vmem:[%s1788_s3 + $0x18] sm:$0xf] %vm933_vm0, %v1111_v11  ;;  %966 = vst.msk [vmem:[%s1788_s3 + $0x80] sm:$0xf] %vm933_vm0, %v1137_v12  ;;  %v690_v17 = vmax.f32 %v512_v13, 0.0  ;;  %v716_v18 = vmax.f32 %v616_v14, 0.0 }
 0x121   :  { %v516_v19 = vpop.f32.mrf.mxu0  ;;  %v620_v20 = vpop.f32.mrf.mxu1 }
 0x122   :  { %v1112_v21 = vpack.c.bf16 %v690_v17, %v690_v17  ;;  %v1138_v22 = vpack.c.bf16 %v716_v18, %v716_v18  ;;  %v517_v23 = vadd.f32 %v1533_v3, %v516_v19  ;;  %v621_v24 = vadd.f32 %v1533_v3, %v620_v20 }
 0x123   :  { %v518_v25 = vpop.f32.mrf.mxu0  ;;  %v622_v26 = vpop.f32.mrf.mxu1 }
 0x124   :  { %941 = vst.msk [vmem:[%s1788_s3 + $0x1c] sm:$0xf] %vm933_vm0, %v1112_v21  ;;  %967 = vst.msk [vmem:[%s1788_s3 + $0x84] sm:$0xf] %vm933_vm0, %v1138_v22  ;;  %v691_v27 = vmax.f32 %v517_v23, 0.0  ;;  %v717_v28 = vmax.f32 %v621_v24, 0.0 }
 0x125   :  { %v519_v29 = vpop.f32.mrf.mxu0  ;;  %v623_v30 = vpop.f32.mrf.mxu1 }
 0x126   :  { %v1113_v31 = vpack.c.bf16 %v691_v27, %v691_v27  ;;  %v1139_v32 = vpack.c.bf16 %v717_v28, %v717_v28  ;;  %v520_v33 = vadd.f32 %v1533_v3, %v519_v29  ;;  %v624_v34 = vadd.f32 %v1533_v3, %v623_v30 }
 0x127   :  { %v521_v35 = vpop.f32.mrf.mxu0  ;;  %v625_v36 = vpop.f32.mrf.mxu1 }
 0x128   :  { %942 = vst.msk [vmem:[%s1788_s3 + $0x20] sm:$0xf] %vm933_vm0, %v1113_v31  ;;  %968 = vst.msk [vmem:[%s1788_s3 + $0x88] sm:$0xf] %vm933_vm0, %v1139_v32  ;;  %v692_v37 = vmax.f32 %v520_v33, 0.0  ;;  %v718_v38 = vmax.f32 %v624_v34, 0.0 }
 0x129   :  { %v524_v39 = vpop.f32.mrf.mxu0  ;;  %v628_v40 = vpop.f32.mrf.mxu1 }
 0x12a   :  { %v1114_v41 = vpack.c.bf16 %v692_v37, %v692_v37  ;;  %v1140_v42 = vpack.c.bf16 %v718_v38, %v718_v38  ;;  %v525_v43 = vadd.f32 %v1533_v3, %v524_v39  ;;  %v629_v44 = vadd.f32 %v1533_v3, %v628_v40 }
 0x12b   :  { %v526_v45 = vpop.f32.mrf.mxu0  ;;  %v630_v46 = vpop.f32.mrf.mxu1 }
 0x12c   :  { %943 = vst.msk [vmem:[%s1788_s3 + $0x24] sm:$0xf] %vm933_vm0, %v1114_v41  ;;  %969 = vst.msk [vmem:[%s1788_s3 + $0x8c] sm:$0xf] %vm933_vm0, %v1140_v42  ;;  %v693_v47 = vmax.f32 %v525_v43, 0.0  ;;  %v719_v48 = vmax.f32 %v629_v44, 0.0 }
 0x12d   :  { %v527_v49 = vpop.f32.mrf.mxu0  ;;  %v631_v50 = vpop.f32.mrf.mxu1 }
 0x12e   :  { %v1115_v51 = vpack.c.bf16 %v693_v47, %v693_v47  ;;  %v1141_v52 = vpack.c.bf16 %v719_v48, %v719_v48  ;;  %v528_v53 = vadd.f32 %v1533_v3, %v527_v49  ;;  %v632_v54 = vadd.f32 %v1533_v3, %v631_v50 }
 0x12f   :  { %v529_v55 = vpop.f32.mrf.mxu0  ;;  %v633_v56 = vpop.f32.mrf.mxu1 }
 0x130   :  { %944 = vst.msk [vmem:[%s1788_s3 + $0x28] sm:$0xf] %vm933_vm0, %v1115_v51  ;;  %970 = vst.msk [vmem:[%s1788_s3 + $0x90] sm:$0xf] %vm933_vm0, %v1141_v52  ;;  %v694_v57 = vmax.f32 %v528_v53, 0.0  ;;  %v720_v58 = vmax.f32 %v632_v54, 0.0 }
 0x131   :  { %v532_v59 = vpop.f32.mrf.mxu0  ;;  %v636_v60 = vpop.f32.mrf.mxu1 }
 0x132   :  { %v1116_v61 = vpack.c.bf16 %v694_v57, %v694_v57  ;;  %v1142_v62 = vpack.c.bf16 %v720_v58, %v720_v58  ;;  %v533_v63 = vadd.f32 %v1533_v3, %v532_v59  ;;  %v637_v0 = vadd.f32 %v1533_v3, %v636_v60 }
 0x133   :  { %v534_v1 = vpop.f32.mrf.mxu0  ;;  %v638_v2 = vpop.f32.mrf.mxu1 }
 0x134   :  { %945 = vst.msk [vmem:[%s1788_s3 + $0x2c] sm:$0xf] %vm933_vm0, %v1116_v61  ;;  %971 = vst.msk [vmem:[%s1788_s3 + $0x94] sm:$0xf] %vm933_vm0, %v1142_v62  ;;  %v695_v4 = vmax.f32 %v533_v63, 0.0  ;;  %v721_v5 = vmax.f32 %v637_v0, 0.0 }
 0x135   :  { %v535_v6 = vpop.f32.mrf.mxu0  ;;  %v639_v7 = vpop.f32.mrf.mxu1 }
 0x136   :  { %v1117_v8 = vpack.c.bf16 %v695_v4, %v695_v4  ;;  %v1143_v9 = vpack.c.bf16 %v721_v5, %v721_v5  ;;  %v536_v10 = vadd.f32 %v1533_v3, %v535_v6  ;;  %v640_v11 = vadd.f32 %v1533_v3, %v639_v7 }
 0x137   :  { %v537_v12 = vpop.f32.mrf.mxu0  ;;  %v641_v13 = vpop.f32.mrf.mxu1 }
 0x138   :  { %946 = vst.msk [vmem:[%s1788_s3 + $0x30] sm:$0xf] %vm933_vm0, %v1117_v8  ;;  %972 = vst.msk [vmem:[%s1788_s3 + $0x98] sm:$0xf] %vm933_vm0, %v1143_v9  ;;  %v696_v14 = vmax.f32 %v536_v10, 0.0  ;;  %v722_v15 = vmax.f32 %v640_v11, 0.0 }
 0x139   :  { %v540_v16 = vpop.f32.mrf.mxu0  ;;  %v644_v17 = vpop.f32.mrf.mxu1 }
 0x13a   :  { %v1118_v18 = vpack.c.bf16 %v696_v14, %v696_v14  ;;  %v1144_v19 = vpack.c.bf16 %v722_v15, %v722_v15  ;;  %v541_v20 = vadd.f32 %v1533_v3, %v540_v16  ;;  %v645_v21 = vadd.f32 %v1533_v3, %v644_v17 }
 0x13b   :  { %v542_v22 = vpop.f32.mrf.mxu0  ;;  %v646_v23 = vpop.f32.mrf.mxu1 }
 0x13c   :  { %947 = vst.msk [vmem:[%s1788_s3 + $0x34] sm:$0xf] %vm933_vm0, %v1118_v18  ;;  %973 = vst.msk [vmem:[%s1788_s3 + $0x9c] sm:$0xf] %vm933_vm0, %v1144_v19  ;;  %v697_v24 = vmax.f32 %v541_v20, 0.0  ;;  %v723_v25 = vmax.f32 %v645_v21, 0.0 }
 0x13d   :  { %v543_v26 = vpop.f32.mrf.mxu0  ;;  %v647_v27 = vpop.f32.mrf.mxu1 }
 0x13e   :  { %v1119_v28 = vpack.c.bf16 %v697_v24, %v697_v24  ;;  %v1145_v29 = vpack.c.bf16 %v723_v25, %v723_v25  ;;  %v544_v30 = vadd.f32 %v1533_v3, %v543_v26  ;;  %v648_v31 = vadd.f32 %v1533_v3, %v647_v27 }
 0x13f   :  { %v545_v32 = vpop.f32.mrf.mxu0  ;;  %v649_v33 = vpop.f32.mrf.mxu1 }
 0x140   :  { %948 = vst.msk [vmem:[%s1788_s3 + $0x38] sm:$0xf] %vm933_vm0, %v1119_v28  ;;  %974 = vst.msk [vmem:[%s1788_s3 + $0xa0] sm:$0xf] %vm933_vm0, %v1145_v29  ;;  %v698_v34 = vmax.f32 %v544_v30, 0.0  ;;  %v724_v35 = vmax.f32 %v648_v31, 0.0 }
 0x141   :  { %v548_v36 = vpop.f32.mrf.mxu0  ;;  %v652_v37 = vpop.f32.mrf.mxu1 }
 0x142   :  { %v1120_v38 = vpack.c.bf16 %v698_v34, %v698_v34  ;;  %v1146_v39 = vpack.c.bf16 %v724_v35, %v724_v35  ;;  %v549_v40 = vadd.f32 %v1533_v3, %v548_v36  ;;  %v653_v41 = vadd.f32 %v1533_v3, %v652_v37 }
 0x143   :  { %v550_v42 = vpop.f32.mrf.mxu0  ;;  %v654_v43 = vpop.f32.mrf.mxu1 }
 0x144   :  { %949 = vst.msk [vmem:[%s1788_s3 + $0x3c] sm:$0xf] %vm933_vm0, %v1120_v38  ;;  %975 = vst.msk [vmem:[%s1788_s3 + $0xa4] sm:$0xf] %vm933_vm0, %v1146_v39  ;;  %v699_v44 = vmax.f32 %v549_v40, 0.0  ;;  %v725_v45 = vmax.f32 %v653_v41, 0.0 }
 0x145   :  { %v551_v46 = vpop.f32.mrf.mxu0  ;;  %v655_v47 = vpop.f32.mrf.mxu1 }
 0x146   :  { %v1121_v48 = vpack.c.bf16 %v699_v44, %v699_v44  ;;  %v1147_v49 = vpack.c.bf16 %v725_v45, %v725_v45  ;;  %v552_v50 = vadd.f32 %v1533_v3, %v551_v46  ;;  %v656_v51 = vadd.f32 %v1533_v3, %v655_v47 }
 0x147   :  { %v553_v52 = vpop.f32.mrf.mxu0  ;;  %v657_v53 = vpop.f32.mrf.mxu1 }
 0x148   :  { %950 = vst.msk [vmem:[%s1788_s3 + $0x40] sm:$0xf] %vm933_vm0, %v1121_v48  ;;  %976 = vst.msk [vmem:[%s1788_s3 + $0xa8] sm:$0xf] %vm933_vm0, %v1147_v49  ;;  %v700_v54 = vmax.f32 %v552_v50, 0.0  ;;  %v726_v55 = vmax.f32 %v656_v51, 0.0 }
 0x149   :  { %v556_v56 = vpop.f32.mrf.mxu0  ;;  %v660_v57 = vpop.f32.mrf.mxu1 }
 0x14a   :  { %v1122_v58 = vpack.c.bf16 %v700_v54, %v700_v54  ;;  %v1148_v59 = vpack.c.bf16 %v726_v55, %v726_v55  ;;  %v557_v60 = vadd.f32 %v1533_v3, %v556_v56  ;;  %v661_v61 = vadd.f32 %v1533_v3, %v660_v57 }
 0x14b   :  { %v558_v62 = vpop.f32.mrf.mxu0  ;;  %v662_v63 = vpop.f32.mrf.mxu1 }
 0x14c   :  { %951 = vst.msk [vmem:[%s1788_s3 + $0x44] sm:$0xf] %vm933_vm0, %v1122_v58  ;;  %977 = vst.msk [vmem:[%s1788_s3 + $0xac] sm:$0xf] %vm933_vm0, %v1148_v59  ;;  %v701_v0 = vmax.f32 %v557_v60, 0.0  ;;  %v727_v1 = vmax.f32 %v661_v61, 0.0 }
 0x14d   :  { %v559_v2 = vpop.f32.mrf.mxu0  ;;  %v663_v4 = vpop.f32.mrf.mxu1 }
 0x14e   :  { %v1123_v5 = vpack.c.bf16 %v701_v0, %v701_v0  ;;  %v1149_v6 = vpack.c.bf16 %v727_v1, %v727_v1  ;;  %v560_v7 = vadd.f32 %v1533_v3, %v559_v2  ;;  %v664_v8 = vadd.f32 %v1533_v3, %v663_v4 }
 0x14f   :  { %v561_v9 = vpop.f32.mrf.mxu0  ;;  %v665_v10 = vpop.f32.mrf.mxu1 }
 0x150   :  { %952 = vst.msk [vmem:[%s1788_s3 + $0x48] sm:$0xf] %vm933_vm0, %v1123_v5  ;;  %978 = vst.msk [vmem:[%s1788_s3 + $0xb0] sm:$0xf] %vm933_vm0, %v1149_v6  ;;  %v702_v11 = vmax.f32 %v560_v7, 0.0  ;;  %v728_v12 = vmax.f32 %v664_v8, 0.0 }
 0x151   :  { %v564_v13 = vpop.f32.mrf.mxu0  ;;  %v668_v14 = vpop.f32.mrf.mxu1 }
 0x152   :  { %v1124_v15 = vpack.c.bf16 %v702_v11, %v702_v11  ;;  %v1150_v16 = vpack.c.bf16 %v728_v12, %v728_v12  ;;  %v565_v17 = vadd.f32 %v1533_v3, %v564_v13  ;;  %v669_v18 = vadd.f32 %v1533_v3, %v668_v14 }
 0x153   :  { %v566_v19 = vpop.f32.mrf.mxu0  ;;  %v670_v20 = vpop.f32.mrf.mxu1 }
 0x154   :  { %953 = vst.msk [vmem:[%s1788_s3 + $0x4c] sm:$0xf] %vm933_vm0, %v1124_v15  ;;  %979 = vst.msk [vmem:[%s1788_s3 + $0xb4] sm:$0xf] %vm933_vm0, %v1150_v16  ;;  %v703_v21 = vmax.f32 %v565_v17, 0.0  ;;  %v729_v22 = vmax.f32 %v669_v18, 0.0 }
 0x155   :  { %v567_v23 = vpop.f32.mrf.mxu0  ;;  %v671_v24 = vpop.f32.mrf.mxu1 }
 0x156   :  { %v1125_v25 = vpack.c.bf16 %v703_v21, %v703_v21  ;;  %v1151_v26 = vpack.c.bf16 %v729_v22, %v729_v22  ;;  %v568_v27 = vadd.f32 %v1533_v3, %v567_v23  ;;  %v672_v28 = vadd.f32 %v1533_v3, %v671_v24 }
 0x157   :  { %v569_v29 = vpop.f32.mrf.mxu0  ;;  %v673_v30 = vpop.f32.mrf.mxu1 }
 0x158   :  { %954 = vst.msk [vmem:[%s1788_s3 + $0x50] sm:$0xf] %vm933_vm0, %v1125_v25  ;;  %980 = vst.msk [vmem:[%s1788_s3 + $0xb8] sm:$0xf] %vm933_vm0, %v1151_v26  ;;  %v704_v31 = vmax.f32 %v568_v27, 0.0  ;;  %v730_v32 = vmax.f32 %v672_v28, 0.0 }
 0x159   :  { %v572_v33 = vpop.f32.mrf.mxu0  ;;  %v676_v34 = vpop.f32.mrf.mxu1 }
 0x15a   :  { %v1126_v35 = vpack.c.bf16 %v704_v31, %v704_v31  ;;  %v1152_v36 = vpack.c.bf16 %v730_v32, %v730_v32  ;;  %v573_v37 = vadd.f32 %v1533_v3, %v572_v33  ;;  %v677_v38 = vadd.f32 %v1533_v3, %v676_v34 }
 0x15b   :  { %v574_v39 = vpop.f32.mrf.mxu0  ;;  %v678_v40 = vpop.f32.mrf.mxu1 }
 0x15c   :  { %955 = vst.msk [vmem:[%s1788_s3 + $0x54] sm:$0xf] %vm933_vm0, %v1126_v35  ;;  %981 = vst.msk [vmem:[%s1788_s3 + $0xbc] sm:$0xf] %vm933_vm0, %v1152_v36  ;;  %v705_v41 = vmax.f32 %v573_v37, 0.0  ;;  %v731_v42 = vmax.f32 %v677_v38, 0.0 }
 0x15d   :  { %v575_v43 = vpop.f32.mrf.mxu0  ;;  %v679_v44 = vpop.f32.mrf.mxu1 }
 0x15e   :  { %v1127_v45 = vpack.c.bf16 %v705_v41, %v705_v41  ;;  %v1153_v46 = vpack.c.bf16 %v731_v42, %v731_v42  ;;  %v576_v47 = vadd.f32 %v1533_v3, %v575_v43  ;;  %v680_v48 = vadd.f32 %v1533_v3, %v679_v44 }
 0x15f   :  { %v577_v49 = vpop.f32.mrf.mxu0  ;;  %v681_v50 = vpop.f32.mrf.mxu1 }
 0x160   :  { %956 = vst.msk [vmem:[%s1788_s3 + $0x58] sm:$0xf] %vm933_vm0, %v1127_v45  ;;  %982 = vst.msk [vmem:[%s1788_s3 + $0xc0] sm:$0xf] %vm933_vm0, %v1153_v46  ;;  %v706_v51 = vmax.f32 %v576_v47, 0.0  ;;  %v732_v52 = vmax.f32 %v680_v48, 0.0 }
 0x161   :  { %v580_v53 = vpop.f32.mrf.mxu0 }
 0x162   :  { %v1128_v54 = vpack.c.bf16 %v706_v51, %v706_v51  ;;  %v1154_v55 = vpack.c.bf16 %v732_v52, %v732_v52  ;;  %v581_v56 = vadd.f32 %v1533_v3, %v580_v53 }
 0x163   :  { %v582_v57 = vpop.f32.mrf.mxu0 }
 0x164   :  { %957 = vst.msk [vmem:[%s1788_s3 + $0x5c] sm:$0xf] %vm933_vm0, %v1128_v54  ;;  %983 = vst.msk [vmem:[%s1788_s3 + $0xc4] sm:$0xf] %vm933_vm0, %v1154_v55  ;;  %v707_v58 = vmax.f32 %v581_v56, 0.0 }
 0x165   :  { %v583_v59 = vpop.f32.mrf.mxu0 }
 0x166   :  { %v1129_v60 = vpack.c.bf16 %v707_v58, %v707_v58  ;;  %v584_v61 = vadd.f32 %v1533_v3, %v583_v59 }
 0x167   :  { %v585_v62 = vpop.f32.mrf.mxu0 }
 0x168   :  { %958 = vst.msk [vmem:[%s1788_s3 + $0x60] sm:$0xf] %vm933_vm0, %v1129_v60  ;;  %v708_v63 = vmax.f32 %v584_v61, 0.0 }
 0x16a   :  { %v1130_v0 = vpack.c.bf16 %v708_v63, %v708_v63 }
 0x16c   :  { %959 = vst.msk [vmem:[%s1788_s3 + $0x64] sm:$0xf] %vm933_vm0, %v1130_v0 }

// kernel: model2layer_forward.4
= control target key start
LH: loop header
LB: loop body
LE: loop exit
PB: predicated region body
PF: predicated region fallthrough
CT: control target
= control target key end

     0   :  { %vm354_vm0 = vcmask 257024   ;;  %vm365_vm1 = vcmask 253952   ;;  %vm366_vm2 = vsmask.f32 256  ;;  %s691_s1 = inlined_call_operand.vmem [shape: bf16[256,32], index: 1, kind: input, shape index: {}]   ;;  %s692_s0 = inlined_call_operand.vmem [shape: bf16[81,256], index: 0, kind: input, shape index: {}]   ;;  %s693_s2 = inlined_call_operand.vmem [shape: f32[1,32], index: 2, kind: input, shape index: {}]   ;;  %s694_s3 = inlined_call_operand.vmem [shape: bf16[81,32], index: 3, kind: output, shape index: {}]  }
   0x1   :  { %v494_v0 = vld [vmem:[%s691_s1 + $0x78] sm:$0xff]   ;;  %v496_v2 = vld [vmem:[%s691_s1 + $0x70] sm:$0xff]   ;;  %v498_v4 = vld [vmem:[%s691_s1 + $0x68] sm:$0xff]  }
   0x2   :  { %v495_v1 = vld [vmem:[%s691_s1 + $0x38] sm:$0xff]   ;;  %426 = vmatprep.subr.bf16.mxu0 %v494_v0  ;;  %478 = vmatprep.subr.bf16.mxu1 %v494_v0  ;;  %v497_v3 = vld [vmem:[%s691_s1 + $0x30] sm:$0xff]   ;;  %v499_v5 = vld [vmem:[%s691_s1 + $0x28] sm:$0xff]  }
   0x3   :  { %427 = vmatpush3.bf16.msra.mxu0 %v495_v1  ;;  %486 = vmatpush3.bf16.msra.mxu1 %v495_v1  ;;  %v500_v6 = vld [vmem:[%s691_s1 + $0x60] sm:$0xff]   ;;  %v502_v8 = vld [vmem:[%s691_s1 + $0x58] sm:$0xff]   ;;  %v504_v10 = vld [vmem:[%s691_s1 + $0x50] sm:$0xff]  }
   0x4   :  { %428 = vmatprep.subr.bf16.mxu0 %v496_v2  ;;  %479 = vmatprep.subr.bf16.mxu1 %v496_v2  ;;  %v501_v7 = vld [vmem:[%s691_s1 + $0x20] sm:$0xff]   ;;  %v503_v9 = vld [vmem:[%s691_s1 + $0x18] sm:$0xff]   ;;  %v505_v13 = vld [vmem:[%s691_s1 + $0x10] sm:$0xff]  }
   0x5   :  { %v512_v11 = vld [vmem:[%s692_s0 + $0x4] ss:$8 sps:$4 sm:$0xff]   ;;  %v515_v12 = vld [vmem:[%s692_s0 + $0x34] ss:$8 sps:$4 sm:$0xff]   ;;  %v510_v18 = vld [vmem:[%s692_s0] ss:$8 sps:$4 sm:$0xff]  }
   0x6   :  { %v506_v14 = vld [vmem:[%s691_s1 + $0x48] sm:$0xff]   ;;  %250 = vmatprep.mubr.bf16.mxu0 %v512_v11  ;;  %274 = vmatprep.mubr.bf16.mxu1 %v515_v12  ;;  %v508_v16 = vld [vmem:[%s691_s1 + $0x40] sm:$0xff]   ;;  %v513_v19 = vld [vmem:[%s692_s0 + $0x30] ss:$8 sps:$4 sm:$0xff]  }
   0x7   :  { %429 = vmatpush3.bf16.msra.mxu0 %v497_v3  ;;  %487 = vmatpush3.bf16.msra.mxu1 %v497_v3  ;;  %v507_v15 = vld [vmem:[%s691_s1 + $0x8] sm:$0xff]   ;;  %v509_v17 = vld [vmem:[%s691_s1] sm:$0xff]   ;;  %v516_v20 = vld [vmem:[%s692_s0 + $0x14] ss:$8 sps:$4 sm:$0xff]  }
   0x8   :  { %430 = vmatprep.subr.bf16.mxu0 %v498_v4  ;;  %480 = vmatprep.subr.bf16.mxu1 %v498_v4  ;;  %v518_v21 = vld [vmem:[%s692_s0 + $0x44] ss:$8 sps:$4 sm:$0xff]   ;;  %v25_v22 = vld [vmem:[%s692_s0 + $0x50] sm:$0x11]  ;;  %v521_v24 = vld [vmem:[%s692_s0 + $0x40] ss:$8 sps:$4 sm:$0xff]  }
   0x9   :  { %v520_v23 = vld [vmem:[%s692_s0 + $0x10] ss:$8 sps:$4 sm:$0xff]   ;;  %v522_v25 = vld [vmem:[%s692_s0 + $0x24] ss:$8 sps:$4 sm:$0xff]   ;;  %v387_v26 = vcombine.high %v25_v22, %v25_v22  ;;  %v525_v27 = vld [vmem:[%s692_s0 + $0x20] ss:$8 sps:$4 sm:$0xff]   ;;  %v386_v28 = vcombine.low %v25_v22, %v25_v22 }
   0xa   :  { %v631_v31 = vld [vmem:[%s693_s2] ss:$0 sm:$0xff]  ;;  %vm367_vm3 = vmand %vm365_vm1, %vm366_vm2 }
   0xb   :  { %431 = vmatpush3.bf16.msra.mxu0 %v499_v5  ;;  %488 = vmatpush3.bf16.msra.mxu1 %v499_v5 }
   0xc   :  { %432 = vmatprep.subr.bf16.mxu0 %v500_v6  ;;  %481 = vmatprep.subr.bf16.mxu1 %v500_v6 }
   0xf   :  { %433 = vmatpush3.bf16.msra.mxu0 %v501_v7  ;;  %489 = vmatpush3.bf16.msra.mxu1 %v501_v7 }
  0x10   :  { %434 = vmatprep.subr.bf16.mxu0 %v502_v8  ;;  %482 = vmatprep.subr.bf16.mxu1 %v502_v8 }
  0x13   :  { %435 = vmatpush3.bf16.msra.mxu0 %v503_v9  ;;  %490 = vmatpush3.bf16.msra.mxu1 %v503_v9 }
  0x14   :  { %436 = vmatprep.subr.bf16.mxu0 %v504_v10  ;;  %483 = vmatprep.subr.bf16.mxu1 %v504_v10 }
  0x17   :  { %437 = vmatpush3.bf16.msra.mxu0 %v505_v13  ;;  %491 = vmatpush3.bf16.msra.mxu1 %v505_v13 }
  0x18   :  { %438 = vmatprep.subr.bf16.mxu0 %v506_v14  ;;  %484 = vmatprep.subr.bf16.mxu1 %v506_v14 }
  0x1b   :  { %439 = vmatpush3.bf16.msra.mxu0 %v507_v15  ;;  %492 = vmatpush3.bf16.msra.mxu1 %v507_v15 }
  0x1c   :  { %440 = vmatprep.subr.bf16.mxu0 %v508_v16  ;;  %485 = vmatprep.subr.bf16.mxu1 %v508_v16 }
  0x1f   :  { %441 = vmatpush3.bf16.msra.mxu0 %v509_v17  ;;  %493 = vmatpush3.bf16.msra.mxu1 %v509_v17 }
  0x22   :  { %251 = vmatmul.mubr.bf16.vlgmr.msra.gmra.mxu0 %v510_v18  ;;  %275 = vmatmul.mubr.bf16.vlgmr.msra.gmra.mxu1 %v513_v19 }
  0x23   :  { %258 = vmatprep.mubr.bf16.mxu0 %v516_v20  ;;  %282 = vmatprep.mubr.bf16.mxu1 %v518_v21 }
  0x2a   :  { %259 = vmatmul.mubr.bf16.gmra.mxu0 %v520_v23  ;;  %283 = vmatmul.mubr.bf16.gmra.mxu1 %v521_v24 }
  0x2b   :  { %266 = vmatprep.mubr.bf16.mxu0 %v522_v25  ;;  %290 = vmatprep.mubr.bf16.mxu1 %v387_v26 }
  0x32   :  { %267 = vmatmul.mubr.bf16.gmra.mxu0 %v525_v27  ;;  %291 = vmatmul.mubr.bf16.gmra.mxu1 %v386_v28 }
  0xe2   :  { %v442_v29 = vpop.f32.mrf.mxu0  ;;  %v460_v30 = vpop.f32.mrf.mxu1 }
  0xe4   :  { %v443_v32 = vpop.f32.mrf.mxu0  ;;  %v461_v33 = vpop.f32.mrf.mxu1 }
  0xe5   :  { %v444_v34 = vadd.f32 %v443_v32, %v442_v29  ;;  %v462_v35 = vadd.f32 %v461_v33, %v460_v30  ;;  %v368_v29 = vld [vmem:[%s694_s3 + $0x28] sm:$0x1] }
  0xe6   :  { %v445_v36 = vpop.f32.mrf.mxu0  ;;  %v463_v37 = vpop.f32.mrf.mxu1 }
  0xe7   :  { %v253_v38 = vadd.f32 %v444_v34, %v631_v31  ;;  %v277_v39 = vadd.f32 %v462_v35, %v631_v31 }
  0xe8   :  { %v446_v40 = vpop.f32.mrf.mxu0  ;;  %v464_v41 = vpop.f32.mrf.mxu1 }
  0xe9   :  { %v298_v42 = vmax.f32 %v253_v38, 0.0  ;;  %v304_v43 = vmax.f32 %v277_v39, 0.0  ;;  %v447_v44 = vadd.f32 %v446_v40, %v445_v36  ;;  %v465_v45 = vadd.f32 %v464_v41, %v463_v37 }
  0xea   :  { %v448_v46 = vpop.f32.mrf.mxu0  ;;  %v466_v47 = vpop.f32.mrf.mxu1 }
  0xeb   :  { %v415_v48 = vpack.c.bf16 %v298_v42, %v298_v42  ;;  %v421_v49 = vpack.c.bf16 %v304_v43, %v304_v43  ;;  %v256_v50 = vadd.f32 %v447_v44, %v631_v31  ;;  %v280_v51 = vadd.f32 %v465_v45, %v631_v31 }
  0xec   :  { %v449_v52 = vpop.f32.mrf.mxu0  ;;  %v467_v53 = vpop.f32.mrf.mxu1 }
  0xed   :  { %355 = vst.msk [vmem:[%s694_s3] sm:$0xf] %vm354_vm0, %v415_v48  ;;  %361 = vst.msk [vmem:[%s694_s3 + $0x18] sm:$0xf] %vm354_vm0, %v421_v49  ;;  %v299_v54 = vmax.f32 %v256_v50, 0.0  ;;  %v305_v55 = vmax.f32 %v280_v51, 0.0  ;;  %v450_v56 = vadd.f32 %v449_v52, %v448_v46  ;;  %v468_v57 = vadd.f32 %v467_v53, %v466_v47 }
  0xee   :  { %v451_v58 = vpop.f32.mrf.mxu0  ;;  %v469_v59 = vpop.f32.mrf.mxu1 }
  0xef   :  { %v416_v60 = vpack.c.bf16 %v299_v54, %v299_v54  ;;  %v422_v61 = vpack.c.bf16 %v305_v55, %v305_v55  ;;  %v261_v62 = vadd.f32 %v450_v56, %v631_v31  ;;  %v285_v63 = vadd.f32 %v468_v57, %v631_v31 }
  0xf0   :  { %v452_v0 = vpop.f32.mrf.mxu0  ;;  %v470_v1 = vpop.f32.mrf.mxu1 }
  0xf1   :  { %356 = vst.msk [vmem:[%s694_s3 + $0x4] sm:$0xf] %vm354_vm0, %v416_v60  ;;  %362 = vst.msk [vmem:[%s694_s3 + $0x1c] sm:$0xf] %vm354_vm0, %v422_v61  ;;  %v300_v2 = vmax.f32 %v261_v62, 0.0  ;;  %v306_v3 = vmax.f32 %v285_v63, 0.0  ;;  %v453_v4 = vadd.f32 %v452_v0, %v451_v58  ;;  %v471_v5 = vadd.f32 %v470_v1, %v469_v59 }
  0xf2   :  { %v454_v6 = vpop.f32.mrf.mxu0  ;;  %v472_v7 = vpop.f32.mrf.mxu1 }
  0xf3   :  { %v417_v8 = vpack.c.bf16 %v300_v2, %v300_v2  ;;  %v423_v9 = vpack.c.bf16 %v306_v3, %v306_v3  ;;  %v264_v10 = vadd.f32 %v453_v4, %v631_v31  ;;  %v288_v11 = vadd.f32 %v471_v5, %v631_v31 }
  0xf4   :  { %v455_v12 = vpop.f32.mrf.mxu0  ;;  %v473_v13 = vpop.f32.mrf.mxu1 }
  0xf5   :  { %357 = vst.msk [vmem:[%s694_s3 + $0x8] sm:$0xf] %vm354_vm0, %v417_v8  ;;  %363 = vst.msk [vmem:[%s694_s3 + $0x20] sm:$0xf] %vm354_vm0, %v423_v9  ;;  %v301_v14 = vmax.f32 %v264_v10, 0.0  ;;  %v307_v15 = vmax.f32 %v288_v11, 0.0  ;;  %v456_v16 = vadd.f32 %v455_v12, %v454_v6  ;;  %v474_v17 = vadd.f32 %v473_v13, %v472_v7 }
  0xf6   :  { %v457_v18 = vpop.f32.mrf.mxu0  ;;  %v475_v19 = vpop.f32.mrf.mxu1 }
  0xf7   :  { %v418_v20 = vpack.c.bf16 %v301_v14, %v301_v14  ;;  %v424_v21 = vpack.c.bf16 %v307_v15, %v307_v15  ;;  %v269_v22 = vadd.f32 %v456_v16, %v631_v31  ;;  %v293_v23 = vadd.f32 %v474_v17, %v631_v31 }
  0xf8   :  { %v458_v24 = vpop.f32.mrf.mxu0  ;;  %v476_v25 = vpop.f32.mrf.mxu1 }
  0xf9   :  { %358 = vst.msk [vmem:[%s694_s3 + $0xc] sm:$0xf] %vm354_vm0, %v418_v20  ;;  %364 = vst.msk [vmem:[%s694_s3 + $0x24] sm:$0xf] %vm354_vm0, %v424_v21  ;;  %v302_v26 = vmax.f32 %v269_v22, 0.0  ;;  %v308_v27 = vmax.f32 %v293_v23, 0.0  ;;  %v459_v28 = vadd.f32 %v458_v24, %v457_v18 }
  0xfb   :  { %v419_v30 = vpack.c.bf16 %v302_v26, %v302_v26  ;;  %v425_v32 = vpack.c.bf16 %v308_v27, %v308_v27  ;;  %v272_v33 = vadd.f32 %v459_v28, %v631_v31 }
  0xfd   :  { %359 = vst.msk [vmem:[%s694_s3 + $0x10] sm:$0xf] %vm354_vm0, %v419_v30  ;;  %v369_v34 = vsel %vm367_vm3, %v425_v32, %v368_v29  ;;  %v303_v35 = vmax.f32 %v272_v33, 0.0 }
  0xfe   :  { %370 = vst [vmem:[%s694_s3 + $0x28] sm:$0x1] %v369_v34 }
  0xff   :  { %v420_v36 = vpack.c.bf16 %v303_v35, %v303_v35 }
 0x101   :  { %360 = vst.msk [vmem:[%s694_s3 + $0x14] sm:$0xf] %vm354_vm0, %v420_v36 }

// kernel: model2layer_forward.5
= control target key start
LH: loop header
LB: loop body
LE: loop exit
PB: predicated region body
PF: predicated region fallthrough
CT: control target
= control target key end

     0   :  { %v6980_v36 = vmov 1966171168   ;;  %v681_v38 = vlaneseq  ;;  %vm4095_vm0 = vcmask 261120   ;;  %s9381_s0 = inlined_call_operand.vmem [shape: bf16[1,2592], index: 0, kind: input, shape index: {}]   ;;  %s9382_s1 = inlined_call_operand.vmem [shape: bf16[2592,512], index: 1, kind: input, shape index: {}]   ;;  %s9383_s2 = inlined_call_operand.vmem [shape: f32[1,512], index: 2, kind: input, shape index: {}]   ;;  %s9384_s3 = inlined_call_operand.vmem [shape: f32[512,7], index: 3, kind: input, shape index: {}]   ;;  %s9385_s4 = inlined_call_operand.vmem [shape: f32[1,7], index: 4, kind: input, shape index: {}]   ;;  %s9386_s5 = inlined_call_operand.hbm [shape: f32[1,6], index: 5, kind: output, shape index: {}]  }
   0x1   :  { %v5982_v0 = vld [vmem:[%s9382_s1 + $0xe4] ss:$16 sps:$4 sm:$0xff]   ;;  %v5986_v2 = vld [vmem:[%s9382_s1 + $0xe0] ss:$16 sps:$4 sm:$0xff]   ;;  %v679_v37 = vunpack.c.l.s4 %v6980_v36 }
   0x2   :  { %v5984_v1 = vld [vmem:[%s9382_s1 + $0x2e4] ss:$16 sps:$4 sm:$0xff]   ;;  %4099 = vmatprep.subr.bf16.mxu0 %v5982_v0  ;;  %v5987_v3 = vld [vmem:[%s9382_s1 + $0x2e0] ss:$16 sps:$4 sm:$0xff]   ;;  %v7131_v43 = vshrl.u32 %v681_v38, 7 }
   0x3   :  { %4140 = vmatprep.subr.bf16.mxu1 %v5984_v1  ;;  %v5988_v4 = vld [vmem:[%s9382_s1 + $0xc4] ss:$16 sps:$4 sm:$0xff]   ;;  %4100 = vmatpush1.bf16.msra.mxu0 %v5986_v2  ;;  %v5992_v6 = vld [vmem:[%s9382_s1 + $0xc0] ss:$16 sps:$4 sm:$0xff]   ;;  %v680_v42 = vunpack.c.0.s8 %v679_v37 }
   0x4   :  { %4141 = vmatpush1.bf16.msra.mxu1 %v5987_v3  ;;  %v5990_v5 = vld [vmem:[%s9382_s1 + $0x2c4] ss:$16 sps:$4 sm:$0xff]   ;;  %4101 = vmatprep.subr.bf16.mxu0 %v5988_v4  ;;  %v5993_v7 = vld [vmem:[%s9382_s1 + $0x2c0] ss:$16 sps:$4 sm:$0xff]  }
   0x5   :  { %4142 = vmatprep.subr.bf16.mxu1 %v5990_v5  ;;  %v5994_v8 = vld [vmem:[%s9382_s1 + $0xa4] ss:$16 sps:$4 sm:$0xff]   ;;  %v5998_v10 = vld [vmem:[%s9382_s1 + $0xa0] ss:$16 sps:$4 sm:$0xff]   ;;  %v7149_v49 = vsub.s32 %v680_v42, %v7131_v43 }
   0x6   :  { %v5996_v9 = vld [vmem:[%s9382_s1 + $0x2a4] ss:$16 sps:$4 sm:$0xff]   ;;  %v5999_v11 = vld [vmem:[%s9382_s1 + $0x2a0] ss:$16 sps:$4 sm:$0xff]  }
   0x7   :  { %4102 = vmatpush1.bf16.msra.mxu0 %v5992_v6  ;;  %v6000_v12 = vld [vmem:[%s9382_s1 + $0x84] ss:$16 sps:$4 sm:$0xff]   ;;  %v6004_v14 = vld [vmem:[%s9382_s1 + $0x80] ss:$16 sps:$4 sm:$0xff]  }
   0x8   :  { %4143 = vmatpush1.bf16.msra.mxu1 %v5993_v7  ;;  %4103 = vmatprep.subr.bf16.mxu0 %v5994_v8  ;;  %v6002_v13 = vld [vmem:[%s9382_s1 + $0x284] ss:$16 sps:$4 sm:$0xff]   ;;  %v6005_v15 = vld [vmem:[%s9382_s1 + $0x280] ss:$16 sps:$4 sm:$0xff]  }
   0x9   :  { %4144 = vmatprep.subr.bf16.mxu1 %v5996_v9  ;;  %v6006_v16 = vld [vmem:[%s9382_s1 + $0x64] ss:$16 sps:$4 sm:$0xff]   ;;  %v6010_v18 = vld [vmem:[%s9382_s1 + $0x60] ss:$16 sps:$4 sm:$0xff]  }
   0xa   :  { %v6008_v17 = vld [vmem:[%s9382_s1 + $0x264] ss:$16 sps:$4 sm:$0xff]   ;;  %v6011_v19 = vld [vmem:[%s9382_s1 + $0x260] ss:$16 sps:$4 sm:$0xff]  }
   0xb   :  { %4104 = vmatpush1.bf16.msra.mxu0 %v5998_v10  ;;  %v6012_v20 = vld [vmem:[%s9382_s1 + $0x44] ss:$16 sps:$4 sm:$0xff]   ;;  %v6016_v22 = vld [vmem:[%s9382_s1 + $0x40] ss:$16 sps:$4 sm:$0xff]  }
   0xc   :  { %4145 = vmatpush1.bf16.msra.mxu1 %v5999_v11  ;;  %4105 = vmatprep.subr.bf16.mxu0 %v6000_v12  ;;  %v6014_v21 = vld [vmem:[%s9382_s1 + $0x244] ss:$16 sps:$4 sm:$0xff]   ;;  %v6017_v23 = vld [vmem:[%s9382_s1 + $0x240] ss:$16 sps:$4 sm:$0xff]  }
   0xd   :  { %4146 = vmatprep.subr.bf16.mxu1 %v6002_v13  ;;  %v6018_v24 = vld [vmem:[%s9382_s1 + $0x24] ss:$16 sps:$4 sm:$0xff]   ;;  %v6022_v26 = vld [vmem:[%s9382_s1 + $0x20] ss:$16 sps:$4 sm:$0xff]  }
   0xe   :  { %v6020_v25 = vld [vmem:[%s9382_s1 + $0x224] ss:$16 sps:$4 sm:$0xff]   ;;  %v6023_v27 = vld [vmem:[%s9382_s1 + $0x220] ss:$16 sps:$4 sm:$0xff]  }
   0xf   :  { %4106 = vmatpush1.bf16.msra.mxu0 %v6004_v14  ;;  %v6024_v28 = vld [vmem:[%s9382_s1 + $0x4] ss:$16 sps:$4 sm:$0xff]   ;;  %v6028_v30 = vld [vmem:[%s9382_s1] ss:$16 sps:$4 sm:$0xff]  }
  0x10   :  { %4147 = vmatpush1.bf16.msra.mxu1 %v6005_v15  ;;  %4107 = vmatprep.subr.bf16.mxu0 %v6006_v16  ;;  %v6026_v29 = vld [vmem:[%s9382_s1 + $0x204] ss:$16 sps:$4 sm:$0xff]   ;;  %v6029_v31 = vld [vmem:[%s9382_s1 + $0x200] ss:$16 sps:$4 sm:$0xff]  }
  0x11   :  { %4148 = vmatprep.subr.bf16.mxu1 %v6008_v17  ;;  %v6030_v32 = vld [vmem:[%s9382_s1 + $0x1e4] ss:$16 sps:$4 sm:$0xff]   ;;  %v6034_v34 = vld [vmem:[%s9382_s1 + $0x1e0] ss:$16 sps:$4 sm:$0xff]  }
  0x12   :  { %v6032_v33 = vld [vmem:[%s9382_s1 + $0x3e4] ss:$16 sps:$4 sm:$0xff]   ;;  %v6035_v35 = vld [vmem:[%s9382_s1 + $0x3e0] ss:$16 sps:$4 sm:$0xff]  }
  0x13   :  { %4108 = vmatpush1.bf16.msra.mxu0 %v6010_v18  ;;  %v6036_v39 = vld [vmem:[%s9382_s1 + $0x1c4] ss:$16 sps:$4 sm:$0xff]   ;;  %v6040_v41 = vld [vmem:[%s9382_s1 + $0x1c0] ss:$16 sps:$4 sm:$0xff]  }
  0x14   :  { %4149 = vmatpush1.bf16.msra.mxu1 %v6011_v19  ;;  %4109 = vmatprep.subr.bf16.mxu0 %v6012_v20  ;;  %v6038_v40 = vld [vmem:[%s9382_s1 + $0x3c4] ss:$16 sps:$4 sm:$0xff]   ;;  %v6041_v44 = vld [vmem:[%s9382_s1 + $0x3c0] ss:$16 sps:$4 sm:$0xff]  }
  0x15   :  { %4150 = vmatprep.subr.bf16.mxu1 %v6014_v21  ;;  %v6042_v45 = vld [vmem:[%s9382_s1 + $0x1a4] ss:$16 sps:$4 sm:$0xff]   ;;  %v6046_v47 = vld [vmem:[%s9382_s1 + $0x1a0] ss:$16 sps:$4 sm:$0xff]  }
  0x16   :  { %v6044_v46 = vld [vmem:[%s9382_s1 + $0x3a4] ss:$16 sps:$4 sm:$0xff]   ;;  %v6047_v48 = vld [vmem:[%s9382_s1 + $0x3a0] ss:$16 sps:$4 sm:$0xff]  }
  0x17   :  { %4110 = vmatpush1.bf16.msra.mxu0 %v6016_v22  ;;  %v6048_v50 = vld [vmem:[%s9382_s1 + $0x184] ss:$16 sps:$4 sm:$0xff]   ;;  %v6052_v53 = vld [vmem:[%s9382_s1 + $0x180] ss:$16 sps:$4 sm:$0xff]  }
  0x18   :  { %4151 = vmatpush1.bf16.msra.mxu1 %v6017_v23  ;;  %4111 = vmatprep.subr.bf16.mxu0 %v6018_v24  ;;  %v6050_v51 = vld [vmem:[%s9382_s1 + $0x384] ss:$16 sps:$4 sm:$0xff]   ;;  %v6053_v55 = vld [vmem:[%s9382_s1 + $0x380] ss:$16 sps:$4 sm:$0xff]  }
  0x19   :  { %4152 = vmatprep.subr.bf16.mxu1 %v6020_v25  ;;  %v22_v52 = vld [vmem:[%s9381_s0] sm:$0xff] }
  0x1a   :  { %v684_v54 = vrot.slane %v22_v52, %v7149_v49  ;;  %v6054_v56 = vld [vmem:[%s9382_s1 + $0x164] ss:$16 sps:$4 sm:$0xff]   ;;  %v6058_v59 = vld [vmem:[%s9382_s1 + $0x160] ss:$16 sps:$4 sm:$0xff]   ;;  %v677_v1 = vcombine.high %v22_v52, %v22_v52 }
  0x1b   :  { %4112 = vmatpush1.bf16.msra.mxu0 %v6022_v26  ;;  %v6056_v57 = vld [vmem:[%s9382_s1 + $0x364] ss:$16 sps:$4 sm:$0xff]   ;;  %v6059_v61 = vld [vmem:[%s9382_s1 + $0x360] ss:$16 sps:$4 sm:$0xff]  }
  0x1c   :  { %4153 = vmatpush1.bf16.msra.mxu1 %v6023_v27  ;;  %4113 = vmatprep.subr.bf16.mxu0 %v6024_v28  ;;  %v692_v58 = vcombine.high %v684_v54, %v684_v54  ;;  %v6060_v62 = vld [vmem:[%s9382_s1 + $0x144] ss:$16 sps:$4 sm:$0xff]   ;;  %v6064_v2 = vld [vmem:[%s9382_s1 + $0x140] ss:$16 sps:$4 sm:$0xff]   ;;  %v7207_v6 = vrot.slane %v677_v1, %v7149_v49  ;;  %v7227_v13 = vrot.slane %v684_v54, %v7149_v49 }
  0x1d   :  { %4154 = vmatprep.subr.bf16.mxu1 %v6026_v29  ;;  %v6062_v63 = vld [vmem:[%s9382_s1 + $0x344] ss:$16 sps:$4 sm:$0xff]   ;;  %v6065_v3 = vld [vmem:[%s9382_s1 + $0x340] ss:$16 sps:$4 sm:$0xff]  }
  0x1e   :  { %v7177_v60 = vrot.slane %v692_v58, %v7149_v49  ;;  %v6066_v4 = vld [vmem:[%s9382_s1 + $0x124] ss:$16 sps:$4 sm:$0xff]   ;;  %v6070_v7 = vld [vmem:[%s9382_s1 + $0x120] ss:$16 sps:$4 sm:$0xff]   ;;  %v693_v11 = vcombine.high %v7207_v6, %v7207_v6  ;;  %v7243_v18 = vcombine.high %v7227_v13, %v7227_v13 }
  0x1f   :  { %4114 = vmatpush1.bf16.msra.mxu0 %v6028_v30  ;;  %v6068_v5 = vld [vmem:[%s9382_s1 + $0x324] ss:$16 sps:$4 sm:$0xff]   ;;  %v6071_v8 = vld [vmem:[%s9382_s1 + $0x320] ss:$16 sps:$4 sm:$0xff]  }
  0x20   :  { %4155 = vmatpush1.bf16.msra.mxu1 %v6029_v31  ;;  %4115 = vmatprep.subr.bf16.mxu0 %v6030_v32  ;;  %v7190_v0 = vcombine.high %v7177_v60, %v7177_v60  ;;  %v6072_v9 = vld [vmem:[%s9382_s1 + $0x104] ss:$16 sps:$4 sm:$0xff]   ;;  %v6076_v12 = vld [vmem:[%s9382_s1 + $0x100] ss:$16 sps:$4 sm:$0xff]   ;;  %v7239_v17 = vrot.slane %v693_v11, %v7149_v49 }
  0x21   :  { %4156 = vmatprep.subr.bf16.mxu1 %v6032_v33  ;;  %4131 = vmatprep.mubr.bf16.mxu0 %v7177_v60  ;;  %v6074_v10 = vld [vmem:[%s9382_s1 + $0x304] ss:$16 sps:$4 sm:$0xff]   ;;  %v6077_v14 = vld [vmem:[%s9382_s1 + $0x300] ss:$16 sps:$4 sm:$0xff]  }
  0x22   :  { %4172 = vmatprep.mubr.bf16.mxu1 %v7190_v0  ;;  %v6080_v15 = vld [vmem:[%s9382_s1 + $0x4e4] ss:$16 sps:$4 sm:$0xff]   ;;  %v6078_v19 = vld [vmem:[%s9382_s1 + $0x4e0] ss:$16 sps:$4 sm:$0xff]   ;;  %v7259_v23 = vcombine.high %v7239_v17, %v7239_v17 }
  0x23   :  { %4116 = vmatpush2.bf16.msra.mxu0 %v6034_v34  ;;  %v6083_v16 = vld [vmem:[%s9382_s1 + $0x6e4] ss:$16 sps:$4 sm:$0xff]   ;;  %v6081_v20 = vld [vmem:[%s9382_s1 + $0x6e0] ss:$16 sps:$4 sm:$0xff]  }
  0x24   :  { %4157 = vmatpush2.bf16.msra.mxu1 %v6035_v35  ;;  %4117 = vmatprep.subr.bf16.mxu0 %v6036_v39  ;;  %v6086_v21 = vld [vmem:[%s9382_s1 + $0x4c4] ss:$16 sps:$4 sm:$0xff]   ;;  %v6084_v24 = vld [vmem:[%s9382_s1 + $0x4c0] ss:$16 sps:$4 sm:$0xff]  }
  0x25   :  { %4158 = vmatprep.subr.bf16.mxu1 %v6038_v40  ;;  %v6089_v22 = vld [vmem:[%s9382_s1 + $0x6c4] ss:$16 sps:$4 sm:$0xff]   ;;  %v6087_v25 = vld [vmem:[%s9382_s1 + $0x6c0] ss:$16 sps:$4 sm:$0xff]  }
  0x26   :  { %v6092_v26 = vld [vmem:[%s9382_s1 + $0x4a4] ss:$16 sps:$4 sm:$0xff]   ;;  %v6090_v28 = vld [vmem:[%s9382_s1 + $0x4a0] ss:$16 sps:$4 sm:$0xff]  }
  0x27   :  { %4118 = vmatpush2.bf16.msra.mxu0 %v6040_v41  ;;  %v6095_v27 = vld [vmem:[%s9382_s1 + $0x6a4] ss:$16 sps:$4 sm:$0xff]   ;;  %v6093_v29 = vld [vmem:[%s9382_s1 + $0x6a0] ss:$16 sps:$4 sm:$0xff]  }
  0x28   :  { %4159 = vmatpush2.bf16.msra.mxu1 %v6041_v44  ;;  %4119 = vmatprep.subr.bf16.mxu0 %v6042_v45  ;;  %v6098_v30 = vld [vmem:[%s9382_s1 + $0x484] ss:$16 sps:$4 sm:$0xff]   ;;  %v6096_v32 = vld [vmem:[%s9382_s1 + $0x480] ss:$16 sps:$4 sm:$0xff]  }
  0x29   :  { %4160 = vmatprep.subr.bf16.mxu1 %v6044_v46  ;;  %v6101_v31 = vld [vmem:[%s9382_s1 + $0x684] ss:$16 sps:$4 sm:$0xff]   ;;  %v6099_v33 = vld [vmem:[%s9382_s1 + $0x680] ss:$16 sps:$4 sm:$0xff]  }
  0x2a   :  { %v6104_v34 = vld [vmem:[%s9382_s1 + $0x464] ss:$16 sps:$4 sm:$0xff]   ;;  %v6102_v36 = vld [vmem:[%s9382_s1 + $0x460] ss:$16 sps:$4 sm:$0xff]  }
  0x2b   :  { %4120 = vmatpush2.bf16.msra.mxu0 %v6046_v47  ;;  %v6107_v35 = vld [vmem:[%s9382_s1 + $0x664] ss:$16 sps:$4 sm:$0xff]   ;;  %v6105_v37 = vld [vmem:[%s9382_s1 + $0x660] ss:$16 sps:$4 sm:$0xff]  }
  0x2c   :  { %4161 = vmatpush2.bf16.msra.mxu1 %v6047_v48  ;;  %4121 = vmatprep.subr.bf16.mxu0 %v6048_v50  ;;  %v6110_v38 = vld [vmem:[%s9382_s1 + $0x444] ss:$16 sps:$4 sm:$0xff]   ;;  %v6108_v40 = vld [vmem:[%s9382_s1 + $0x440] ss:$16 sps:$4 sm:$0xff]  }
  0x2d   :  { %4162 = vmatprep.subr.bf16.mxu1 %v6050_v51  ;;  %v6113_v39 = vld [vmem:[%s9382_s1 + $0x644] ss:$16 sps:$4 sm:$0xff]   ;;  %v6111_v41 = vld [vmem:[%s9382_s1 + $0x640] ss:$16 sps:$4 sm:$0xff]  }
  0x2e   :  { %v6116_v42 = vld [vmem:[%s9382_s1 + $0x424] ss:$16 sps:$4 sm:$0xff]   ;;  %v6114_v45 = vld [vmem:[%s9382_s1 + $0x420] ss:$16 sps:$4 sm:$0xff]  }
  0x2f   :  { %4122 = vmatpush2.bf16.msra.mxu0 %v6052_v53  ;;  %v6119_v44 = vld [vmem:[%s9382_s1 + $0x624] ss:$16 sps:$4 sm:$0xff]   ;;  %v6117_v46 = vld [vmem:[%s9382_s1 + $0x620] ss:$16 sps:$4 sm:$0xff]  }
  0x30   :  { %4163 = vmatpush2.bf16.msra.mxu1 %v6053_v55  ;;  %4123 = vmatprep.subr.bf16.mxu0 %v6054_v56  ;;  %v6122_v47 = vld [vmem:[%s9382_s1 + $0x404] ss:$16 sps:$4 sm:$0xff]   ;;  %v6120_v50 = vld [vmem:[%s9382_s1 + $0x400] ss:$16 sps:$4 sm:$0xff]  }
  0x31   :  { %4164 = vmatprep.subr.bf16.mxu1 %v6056_v57  ;;  %v6125_v48 = vld [vmem:[%s9382_s1 + $0x604] ss:$16 sps:$4 sm:$0xff]   ;;  %v6123_v51 = vld [vmem:[%s9382_s1 + $0x600] ss:$16 sps:$4 sm:$0xff]  }
  0x32   :  { %v6128_v52 = vld [vmem:[%s9382_s1 + $0x5e4] ss:$16 sps:$4 sm:$0xff]   ;;  %v6126_v54 = vld [vmem:[%s9382_s1 + $0x5e0] ss:$16 sps:$4 sm:$0xff]  }
  0x33   :  { %4124 = vmatpush2.bf16.msra.mxu0 %v6058_v59  ;;  %v6131_v53 = vld [vmem:[%s9382_s1 + $0x7e4] ss:$16 sps:$4 sm:$0xff]   ;;  %v6129_v55 = vld [vmem:[%s9382_s1 + $0x7e0] ss:$16 sps:$4 sm:$0xff]  }
  0x34   :  { %4165 = vmatpush2.bf16.msra.mxu1 %v6059_v61  ;;  %4125 = vmatprep.subr.bf16.mxu0 %v6060_v62  ;;  %v6134_v56 = vld [vmem:[%s9382_s1 + $0x5c4] ss:$16 sps:$4 sm:$0xff]   ;;  %v6132_v58 = vld [vmem:[%s9382_s1 + $0x5c0] ss:$16 sps:$4 sm:$0xff]  }
  0x35   :  { %4166 = vmatprep.subr.bf16.mxu1 %v6062_v63  ;;  %v6137_v57 = vld [vmem:[%s9382_s1 + $0x7c4] ss:$16 sps:$4 sm:$0xff]   ;;  %v6135_v59 = vld [vmem:[%s9382_s1 + $0x7c0] ss:$16 sps:$4 sm:$0xff]  }
  0x36   :  { %v6140_v61 = vld [vmem:[%s9382_s1 + $0x5a4] ss:$16 sps:$4 sm:$0xff]   ;;  %v6138_v63 = vld [vmem:[%s9382_s1 + $0x5a0] ss:$16 sps:$4 sm:$0xff]  }
  0x37   :  { %4126 = vmatpush2.bf16.msra.mxu0 %v6064_v2  ;;  %v6143_v62 = vld [vmem:[%s9382_s1 + $0x7a4] ss:$16 sps:$4 sm:$0xff]   ;;  %v6141_v1 = vld [vmem:[%s9382_s1 + $0x7a0] ss:$16 sps:$4 sm:$0xff]  }
  0x38   :  { %4167 = vmatpush2.bf16.msra.mxu1 %v6065_v3  ;;  %4127 = vmatprep.subr.bf16.mxu0 %v6066_v4  ;;  %v6146_v2 = vld [vmem:[%s9382_s1 + $0x584] ss:$16 sps:$4 sm:$0xff]   ;;  %v6144_v4 = vld [vmem:[%s9382_s1 + $0x580] ss:$16 sps:$4 sm:$0xff]  }
  0x39   :  { %4168 = vmatprep.subr.bf16.mxu1 %v6068_v5  ;;  %v6149_v3 = vld [vmem:[%s9382_s1 + $0x784] ss:$16 sps:$4 sm:$0xff]   ;;  %v6147_v5 = vld [vmem:[%s9382_s1 + $0x780] ss:$16 sps:$4 sm:$0xff]  }
  0x3a   :  { %v6158_v11 = vld [vmem:[%s9382_s1 + $0x544] ss:$16 sps:$4 sm:$0xff]  }
  0x3b   :  { %4128 = vmatpush2.bf16.msra.mxu0 %v6070_v7  ;;  %v6152_v7 = vld [vmem:[%s9382_s1 + $0x564] ss:$16 sps:$4 sm:$0xff]  }
  0x3c   :  { %4169 = vmatpush2.bf16.msra.mxu1 %v6071_v8  ;;  %4129 = vmatprep.subr.bf16.mxu0 %v6072_v9  ;;  %v6155_v8 = vld [vmem:[%s9382_s1 + $0x764] ss:$16 sps:$4 sm:$0xff]   ;;  %v6150_v9 = vld [vmem:[%s9382_s1 + $0x560] ss:$16 sps:$4 sm:$0xff]  }
  0x3d   :  { %4170 = vmatprep.subr.bf16.mxu1 %v6074_v10  ;;  %v6153_v10 = vld [vmem:[%s9382_s1 + $0x760] ss:$16 sps:$4 sm:$0xff]  }
  0x3f   :  { %4130 = vmatpush2.bf16.msra.mxu0 %v6076_v12  ;;  %v6161_v12 = vld [vmem:[%s9382_s1 + $0x744] ss:$16 sps:$4 sm:$0xff]  }
  0x40   :  { %4171 = vmatpush2.bf16.msra.mxu1 %v6077_v14  ;;  %4181 = vmatprep.subr.bf16.mxu0 %v6080_v15  ;;  %v6156_v14 = vld [vmem:[%s9382_s1 + $0x540] ss:$16 sps:$4 sm:$0xff]  }
  0x41   :  { %4222 = vmatprep.subr.bf16.mxu1 %v6083_v16  ;;  %v6159_v15 = vld [vmem:[%s9382_s1 + $0x740] ss:$16 sps:$4 sm:$0xff]   ;;  %v6164_v16 = vld [vmem:[%s9382_s1 + $0x524] ss:$16 sps:$4 sm:$0xff]  }
  0x42   :  { %4132 = vmatmul.mubr.bf16.vlgmr.msra.gmra.mxu0 %v7227_v13 }
  0x43   :  { %4173 = vmatmul.mubr.bf16.vlgmr.msra.gmra.mxu1 %v7243_v18  ;;  %4182 = vmatpush1.bf16.msra.mxu0 %v6078_v19  ;;  %v6167_v19 = vld [vmem:[%s9382_s1 + $0x724] ss:$16 sps:$4 sm:$0xff]  }
  0x44   :  { %4223 = vmatpush1.bf16.msra.mxu1 %v6081_v20  ;;  %4183 = vmatprep.subr.bf16.mxu0 %v6086_v21  ;;  %v6162_v20 = vld [vmem:[%s9382_s1 + $0x520] ss:$16 sps:$4 sm:$0xff]  }
  0x45   :  { %4224 = vmatprep.subr.bf16.mxu1 %v6089_v22  ;;  %4213 = vmatprep.mubr.bf16.mxu0 %v7239_v17  ;;  %v6165_v21 = vld [vmem:[%s9382_s1 + $0x720] ss:$16 sps:$4 sm:$0xff]   ;;  %v6170_v22 = vld [vmem:[%s9382_s1 + $0x504] ss:$16 sps:$4 sm:$0xff]  }
  0x46   :  { %4254 = vmatprep.mubr.bf16.mxu1 %v7259_v23 }
  0x47   :  { %4184 = vmatpush1.bf16.msra.mxu0 %v6084_v24  ;;  %v6173_v24 = vld [vmem:[%s9382_s1 + $0x704] ss:$16 sps:$4 sm:$0xff]  }
  0x48   :  { %4225 = vmatpush1.bf16.msra.mxu1 %v6087_v25  ;;  %4185 = vmatprep.subr.bf16.mxu0 %v6092_v26  ;;  %v6168_v25 = vld [vmem:[%s9382_s1 + $0x500] ss:$16 sps:$4 sm:$0xff]   ;;  %v7438_v26 = vrot.slane %v7207_v6, %v7149_v49 }
  0x49   :  { %4226 = vmatprep.subr.bf16.mxu1 %v6095_v27  ;;  %v6171_v27 = vld [vmem:[%s9382_s1 + $0x700] ss:$16 sps:$4 sm:$0xff]  }
  0x4a   :  { %v7451_v6 = vcombine.high %v7438_v26, %v7438_v26 }
  0x4b   :  { %4186 = vmatpush1.bf16.msra.mxu0 %v6090_v28  ;;  %v6177_v28 = vld [vmem:[%s9382_s1 + $0x8e4] ss:$16 sps:$4 sm:$0xff]  }
  0x4c   :  { %4227 = vmatpush1.bf16.msra.mxu1 %v6093_v29  ;;  %4187 = vmatprep.subr.bf16.mxu0 %v6098_v30  ;;  %v6180_v29 = vld [vmem:[%s9382_s1 + $0xae4] ss:$16 sps:$4 sm:$0xff]   ;;  %v6175_v30 = vld [vmem:[%s9382_s1 + $0x8e0] ss:$16 sps:$4 sm:$0xff]  }
  0x4d   :  { %4228 = vmatprep.subr.bf16.mxu1 %v6101_v31  ;;  %v6178_v31 = vld [vmem:[%s9382_s1 + $0xae0] ss:$16 sps:$4 sm:$0xff]  }
  0x4f   :  { %4188 = vmatpush1.bf16.msra.mxu0 %v6096_v32  ;;  %v7462_v32 = vld [vmem:[%s9381_s0 + $0x8] sm:$0xff] }
  0x50   :  { %4229 = vmatpush1.bf16.msra.mxu1 %v6099_v33  ;;  %4189 = vmatprep.subr.bf16.mxu0 %v6104_v34  ;;  %v6183_v33 = vld [vmem:[%s9382_s1 + $0x8c4] ss:$16 sps:$4 sm:$0xff]  }
  0x51   :  { %4230 = vmatprep.subr.bf16.mxu1 %v6107_v35  ;;  %v6186_v34 = vld [vmem:[%s9382_s1 + $0xac4] ss:$16 sps:$4 sm:$0xff]   ;;  %v7472_v35 = vrot.slane %v7462_v32, %v7149_v49 }
  0x53   :  { %4190 = vmatpush1.bf16.msra.mxu0 %v6102_v36  ;;  %v741_v36 = vcombine.high %v7472_v35, %v7472_v35 }
  0x54   :  { %4231 = vmatpush1.bf16.msra.mxu1 %v6105_v37  ;;  %4191 = vmatprep.subr.bf16.mxu0 %v6110_v38  ;;  %v6181_v37 = vld [vmem:[%s9382_s1 + $0x8c0] ss:$16 sps:$4 sm:$0xff]  }
  0x55   :  { %4232 = vmatprep.subr.bf16.mxu1 %v6113_v39  ;;  %v6184_v38 = vld [vmem:[%s9382_s1 + $0xac0] ss:$16 sps:$4 sm:$0xff]   ;;  %v6189_v39 = vld [vmem:[%s9382_s1 + $0x8a4] ss:$16 sps:$4 sm:$0xff]  }
  0x57   :  { %4192 = vmatpush1.bf16.msra.mxu0 %v6108_v40  ;;  %v6192_v40 = vld [vmem:[%s9382_s1 + $0xaa4] ss:$16 sps:$4 sm:$0xff]  }
  0x58   :  { %4233 = vmatpush1.bf16.msra.mxu1 %v6111_v41  ;;  %4193 = vmatprep.subr.bf16.mxu0 %v6116_v42  ;;  %v7491_v41 = vrot.slane %v741_v36, %v7149_v49  ;;  %v6253_v36 = vld [vmem:[%s9382_s1 + $0x940] ss:$16 sps:$4 sm:$0xff]  }
  0x59   :  { %4234 = vmatprep.subr.bf16.mxu1 %v6119_v44  ;;  %v6187_v44 = vld [vmem:[%s9382_s1 + $0x8a0] ss:$16 sps:$4 sm:$0xff]  }
  0x5a   :  { %v7496_v42 = vcombine.high %v7491_v41, %v7491_v41 }
  0x5b   :  { %4194 = vmatpush1.bf16.msra.mxu0 %v6114_v45  ;;  %v6190_v45 = vld [vmem:[%s9382_s1 + $0xaa0] ss:$16 sps:$4 sm:$0xff]  }
  0x5c   :  { %4235 = vmatpush1.bf16.msra.mxu1 %v6117_v46  ;;  %4195 = vmatprep.subr.bf16.mxu0 %v6122_v47  ;;  %v6195_v46 = vld [vmem:[%s9382_s1 + $0x884] ss:$16 sps:$4 sm:$0xff]  }
  0x5d   :  { %4236 = vmatprep.subr.bf16.mxu1 %v6125_v48  ;;  %v6198_v47 = vld [vmem:[%s9382_s1 + $0xa84] ss:$16 sps:$4 sm:$0xff]   ;;  %v6193_v48 = vld [vmem:[%s9382_s1 + $0x880] ss:$16 sps:$4 sm:$0xff]  }
  0x5f   :  { %4196 = vmatpush1.bf16.msra.mxu0 %v6120_v50  ;;  %v6196_v50 = vld [vmem:[%s9382_s1 + $0xa80] ss:$16 sps:$4 sm:$0xff]  }
  0x60   :  { %4237 = vmatpush1.bf16.msra.mxu1 %v6123_v51  ;;  %4197 = vmatprep.subr.bf16.mxu0 %v6128_v52  ;;  %v6201_v51 = vld [vmem:[%s9382_s1 + $0x864] ss:$16 sps:$4 sm:$0xff]  }
  0x61   :  { %4238 = vmatprep.subr.bf16.mxu1 %v6131_v53  ;;  %v6204_v52 = vld [vmem:[%s9382_s1 + $0xa64] ss:$16 sps:$4 sm:$0xff]   ;;  %v6199_v53 = vld [vmem:[%s9382_s1 + $0x860] ss:$16 sps:$4 sm:$0xff]  }
  0x63   :  { %4198 = vmatpush2.bf16.msra.mxu0 %v6126_v54  ;;  %v6202_v54 = vld [vmem:[%s9382_s1 + $0xa60] ss:$16 sps:$4 sm:$0xff]  }
  0x64   :  { %4239 = vmatpush2.bf16.msra.mxu1 %v6129_v55  ;;  %4199 = vmatprep.subr.bf16.mxu0 %v6134_v56  ;;  %v6207_v55 = vld [vmem:[%s9382_s1 + $0x844] ss:$16 sps:$4 sm:$0xff]  }
  0x65   :  { %4240 = vmatprep.subr.bf16.mxu1 %v6137_v57  ;;  %v6210_v56 = vld [vmem:[%s9382_s1 + $0xa44] ss:$16 sps:$4 sm:$0xff]   ;;  %v6205_v57 = vld [vmem:[%s9382_s1 + $0x840] ss:$16 sps:$4 sm:$0xff]  }
  0x67   :  { %4200 = vmatpush2.bf16.msra.mxu0 %v6132_v58  ;;  %v6208_v58 = vld [vmem:[%s9382_s1 + $0xa40] ss:$16 sps:$4 sm:$0xff]  }
  0x68   :  { %4241 = vmatpush2.bf16.msra.mxu1 %v6135_v59  ;;  %4201 = vmatprep.subr.bf16.mxu0 %v6140_v61  ;;  %v6213_v59 = vld [vmem:[%s9382_s1 + $0x824] ss:$16 sps:$4 sm:$0xff]  }
  0x69   :  { %4242 = vmatprep.subr.bf16.mxu1 %v6143_v62  ;;  %v6216_v61 = vld [vmem:[%s9382_s1 + $0xa24] ss:$16 sps:$4 sm:$0xff]   ;;  %v6211_v62 = vld [vmem:[%s9382_s1 + $0x820] ss:$16 sps:$4 sm:$0xff]  }
  0x6b   :  { %4202 = vmatpush2.bf16.msra.mxu0 %v6138_v63  ;;  %v6214_v63 = vld [vmem:[%s9382_s1 + $0xa20] ss:$16 sps:$4 sm:$0xff]  }
  0x6c   :  { %4243 = vmatpush2.bf16.msra.mxu1 %v6141_v1  ;;  %4203 = vmatprep.subr.bf16.mxu0 %v6146_v2  ;;  %v6219_v1 = vld [vmem:[%s9382_s1 + $0x804] ss:$16 sps:$4 sm:$0xff]  }
  0x6d   :  { %4244 = vmatprep.subr.bf16.mxu1 %v6149_v3  ;;  %v6222_v2 = vld [vmem:[%s9382_s1 + $0xa04] ss:$16 sps:$4 sm:$0xff]   ;;  %v6217_v3 = vld [vmem:[%s9382_s1 + $0x800] ss:$16 sps:$4 sm:$0xff]  }
  0x6f   :  { %4204 = vmatpush2.bf16.msra.mxu0 %v6144_v4  ;;  %v6220_v4 = vld [vmem:[%s9382_s1 + $0xa00] ss:$16 sps:$4 sm:$0xff]  }
  0x70   :  { %4245 = vmatpush2.bf16.msra.mxu1 %v6147_v5  ;;  %4205 = vmatprep.subr.bf16.mxu0 %v6152_v7  ;;  %v6225_v5 = vld [vmem:[%s9382_s1 + $0x9e4] ss:$16 sps:$4 sm:$0xff]  }
  0x71   :  { %4246 = vmatprep.subr.bf16.mxu1 %v6155_v8  ;;  %v6228_v7 = vld [vmem:[%s9382_s1 + $0xbe4] ss:$16 sps:$4 sm:$0xff]   ;;  %v6223_v8 = vld [vmem:[%s9382_s1 + $0x9e0] ss:$16 sps:$4 sm:$0xff]  }
  0x73   :  { %4206 = vmatpush2.bf16.msra.mxu0 %v6150_v9  ;;  %v6226_v9 = vld [vmem:[%s9382_s1 + $0xbe0] ss:$16 sps:$4 sm:$0xff]  }
  0x74   :  { %4247 = vmatpush2.bf16.msra.mxu1 %v6153_v10  ;;  %4207 = vmatprep.subr.bf16.mxu0 %v6158_v11  ;;  %v6231_v10 = vld [vmem:[%s9382_s1 + $0x9c4] ss:$16 sps:$4 sm:$0xff]  }
  0x75   :  { %4248 = vmatprep.subr.bf16.mxu1 %v6161_v12  ;;  %v6234_v11 = vld [vmem:[%s9382_s1 + $0xbc4] ss:$16 sps:$4 sm:$0xff]   ;;  %v6229_v12 = vld [vmem:[%s9382_s1 + $0x9c0] ss:$16 sps:$4 sm:$0xff]  }
  0x77   :  { %4208 = vmatpush2.bf16.msra.mxu0 %v6156_v14  ;;  %v6232_v14 = vld [vmem:[%s9382_s1 + $0xbc0] ss:$16 sps:$4 sm:$0xff]  }
  0x78   :  { %4249 = vmatpush2.bf16.msra.mxu1 %v6159_v15  ;;  %4209 = vmatprep.subr.bf16.mxu0 %v6164_v16  ;;  %v6237_v15 = vld [vmem:[%s9382_s1 + $0x9a4] ss:$16 sps:$4 sm:$0xff]  }
  0x79   :  { %4250 = vmatprep.subr.bf16.mxu1 %v6167_v19  ;;  %v6240_v16 = vld [vmem:[%s9382_s1 + $0xba4] ss:$16 sps:$4 sm:$0xff]   ;;  %v6235_v19 = vld [vmem:[%s9382_s1 + $0x9a0] ss:$16 sps:$4 sm:$0xff]  }
  0x7b   :  { %4210 = vmatpush2.bf16.msra.mxu0 %v6162_v20  ;;  %v6238_v20 = vld [vmem:[%s9382_s1 + $0xba0] ss:$16 sps:$4 sm:$0xff]  }
  0x7c   :  { %4251 = vmatpush2.bf16.msra.mxu1 %v6165_v21  ;;  %4211 = vmatprep.subr.bf16.mxu0 %v6170_v22  ;;  %v6243_v21 = vld [vmem:[%s9382_s1 + $0x984] ss:$16 sps:$4 sm:$0xff]  }
  0x7d   :  { %4252 = vmatprep.subr.bf16.mxu1 %v6173_v24  ;;  %v6246_v22 = vld [vmem:[%s9382_s1 + $0xb84] ss:$16 sps:$4 sm:$0xff]   ;;  %v6241_v24 = vld [vmem:[%s9382_s1 + $0x980] ss:$16 sps:$4 sm:$0xff]  }
  0x7f   :  { %4212 = vmatpush2.bf16.msra.mxu0 %v6168_v25  ;;  %v6244_v25 = vld [vmem:[%s9382_s1 + $0xb80] ss:$16 sps:$4 sm:$0xff]  }
  0x80   :  { %4253 = vmatpush2.bf16.msra.mxu1 %v6171_v27  ;;  %4263 = vmatprep.subr.bf16.mxu0 %v6177_v28  ;;  %v6249_v27 = vld [vmem:[%s9382_s1 + $0x964] ss:$16 sps:$4 sm:$0xff]  }
  0x81   :  { %4304 = vmatprep.subr.bf16.mxu1 %v6180_v29  ;;  %v6252_v28 = vld [vmem:[%s9382_s1 + $0xb64] ss:$16 sps:$4 sm:$0xff]   ;;  %v6247_v29 = vld [vmem:[%s9382_s1 + $0x960] ss:$16 sps:$4 sm:$0xff]  }
  0x82   :  { %4214 = vmatmul.mubr.bf16.vlgmr.msra.gmra.mxu0 %v7438_v26 }
  0x83   :  { %4255 = vmatmul.mubr.bf16.vlgmr.msra.gmra.mxu1 %v7451_v6  ;;  %4264 = vmatpush1.bf16.msra.mxu0 %v6175_v30  ;;  %v6250_v30 = vld [vmem:[%s9382_s1 + $0xb60] ss:$16 sps:$4 sm:$0xff]  }
  0x84   :  { %4305 = vmatpush1.bf16.msra.mxu1 %v6178_v31  ;;  %4265 = vmatprep.subr.bf16.mxu0 %v6183_v33  ;;  %v6255_v31 = vld [vmem:[%s9382_s1 + $0x944] ss:$16 sps:$4 sm:$0xff]  }
  0x85   :  { %4306 = vmatprep.subr.bf16.mxu1 %v6186_v34  ;;  %4295 = vmatprep.mubr.bf16.mxu0 %v7491_v41  ;;  %v6258_v33 = vld [vmem:[%s9382_s1 + $0xb44] ss:$16 sps:$4 sm:$0xff]   ;;  %v726_v34 = vcombine.high %v7462_v32, %v7462_v32 }
  0x86   :  { %4336 = vmatprep.mubr.bf16.mxu1 %v7496_v42  ;;  %v6264_v32 = vld [vmem:[%s9382_s1 + $0xb24] ss:$16 sps:$4 sm:$0xff]  }
  0x87   :  { %4266 = vmatpush1.bf16.msra.mxu0 %v6181_v37  ;;  %v6256_v37 = vld [vmem:[%s9382_s1 + $0xb40] ss:$16 sps:$4 sm:$0xff]  }
  0x88   :  { %4307 = vmatpush1.bf16.msra.mxu1 %v6184_v38  ;;  %4267 = vmatprep.subr.bf16.mxu0 %v6189_v39  ;;  %v6261_v38 = vld [vmem:[%s9382_s1 + $0x924] ss:$16 sps:$4 sm:$0xff]   ;;  %v7646_v39 = vrot.slane %v726_v34, %v7149_v49  ;;  %v6319_v34 = vld [vmem:[%s9382_s1 + $0xde0] ss:$16 sps:$4 sm:$0xff]  }
  0x89   :  { %4308 = vmatprep.subr.bf16.mxu1 %v6192_v40  ;;  %v6259_v40 = vld [vmem:[%s9382_s1 + $0x920] ss:$16 sps:$4 sm:$0xff]  }
  0x8b   :  { %4268 = vmatpush1.bf16.msra.mxu0 %v6187_v44  ;;  %v6262_v44 = vld [vmem:[%s9382_s1 + $0xb20] ss:$16 sps:$4 sm:$0xff]  }
  0x8c   :  { %4309 = vmatpush1.bf16.msra.mxu1 %v6190_v45  ;;  %4269 = vmatprep.subr.bf16.mxu0 %v6195_v46  ;;  %v6267_v45 = vld [vmem:[%s9382_s1 + $0x904] ss:$16 sps:$4 sm:$0xff]  }
  0x8d   :  { %4310 = vmatprep.subr.bf16.mxu1 %v6198_v47  ;;  %v6270_v46 = vld [vmem:[%s9382_s1 + $0xb04] ss:$16 sps:$4 sm:$0xff]   ;;  %v742_v47 = vcombine.high %v7646_v39, %v7646_v39 }
  0x8f   :  { %4270 = vmatpush1.bf16.msra.mxu0 %v6193_v48  ;;  %v6265_v48 = vld [vmem:[%s9382_s1 + $0x900] ss:$16 sps:$4 sm:$0xff]  }
  0x90   :  { %4311 = vmatpush1.bf16.msra.mxu1 %v6196_v50  ;;  %4271 = vmatprep.subr.bf16.mxu0 %v6201_v51  ;;  %v7667_v50 = vrot.slane %v7472_v35, %v7149_v49  ;;  %v6268_v51 = vld [vmem:[%s9382_s1 + $0xb00] ss:$16 sps:$4 sm:$0xff]  }
  0x91   :  { %4312 = vmatprep.subr.bf16.mxu1 %v6204_v52  ;;  %v6273_v52 = vld [vmem:[%s9382_s1 + $0xce4] ss:$16 sps:$4 sm:$0xff]  }
  0x92   :  { %v7683_v35 = vcombine.high %v7667_v50, %v7667_v50 }
  0x93   :  { %4272 = vmatpush1.bf16.msra.mxu0 %v6199_v53  ;;  %v6276_v53 = vld [vmem:[%s9382_s1 + $0xee4] ss:$16 sps:$4 sm:$0xff]  }
  0x94   :  { %4313 = vmatpush1.bf16.msra.mxu1 %v6202_v54  ;;  %4273 = vmatprep.subr.bf16.mxu0 %v6207_v55  ;;  %v7679_v54 = vrot.slane %v742_v47, %v7149_v49  ;;  %v6271_v55 = vld [vmem:[%s9382_s1 + $0xce0] ss:$16 sps:$4 sm:$0xff]  }
  0x95   :  { %4314 = vmatprep.subr.bf16.mxu1 %v6210_v56  ;;  %v6274_v56 = vld [vmem:[%s9382_s1 + $0xee0] ss:$16 sps:$4 sm:$0xff]  }
  0x96   :  { %v6334_v47 = vld [vmem:[%s9382_s1 + $0xfa0] ss:$16 sps:$4 sm:$0xff]  }
  0x97   :  { %4274 = vmatpush1.bf16.msra.mxu0 %v6205_v57  ;;  %v6279_v57 = vld [vmem:[%s9382_s1 + $0xcc4] ss:$16 sps:$4 sm:$0xff]  }
  0x98   :  { %4315 = vmatpush1.bf16.msra.mxu1 %v6208_v58  ;;  %4275 = vmatprep.subr.bf16.mxu0 %v6213_v59  ;;  %v6282_v58 = vld [vmem:[%s9382_s1 + $0xec4] ss:$16 sps:$4 sm:$0xff]   ;;  %v7699_v59 = vcombine.high %v7679_v54, %v7679_v54 }
  0x99   :  { %4316 = vmatprep.subr.bf16.mxu1 %v6216_v61  ;;  %v6277_v61 = vld [vmem:[%s9382_s1 + $0xcc0] ss:$16 sps:$4 sm:$0xff]  }
  0x9b   :  { %4276 = vmatpush1.bf16.msra.mxu0 %v6211_v62  ;;  %v6280_v62 = vld [vmem:[%s9382_s1 + $0xec0] ss:$16 sps:$4 sm:$0xff]  }
  0x9c   :  { %4317 = vmatpush1.bf16.msra.mxu1 %v6214_v63  ;;  %4277 = vmatprep.subr.bf16.mxu0 %v6219_v1  ;;  %v6285_v63 = vld [vmem:[%s9382_s1 + $0xca4] ss:$16 sps:$4 sm:$0xff]  }
  0x9d   :  { %4318 = vmatprep.subr.bf16.mxu1 %v6222_v2  ;;  %v6288_v1 = vld [vmem:[%s9382_s1 + $0xea4] ss:$16 sps:$4 sm:$0xff]   ;;  %v6283_v2 = vld [vmem:[%s9382_s1 + $0xca0] ss:$16 sps:$4 sm:$0xff]  }
  0x9f   :  { %4278 = vmatpush1.bf16.msra.mxu0 %v6217_v3  ;;  %v6286_v3 = vld [vmem:[%s9382_s1 + $0xea0] ss:$16 sps:$4 sm:$0xff]  }
  0xa0   :  { %4319 = vmatpush1.bf16.msra.mxu1 %v6220_v4  ;;  %4279 = vmatprep.subr.bf16.mxu0 %v6225_v5  ;;  %v6291_v4 = vld [vmem:[%s9382_s1 + $0xc84] ss:$16 sps:$4 sm:$0xff]  }
  0xa1   :  { %4320 = vmatprep.subr.bf16.mxu1 %v6228_v7  ;;  %v6294_v5 = vld [vmem:[%s9382_s1 + $0xe84] ss:$16 sps:$4 sm:$0xff]   ;;  %v6981_v7 = vmov 0  }
  0xa2   :  { %5980 = vset.pattern.permute.xlu1 %v6981_v7  ;;  %5981 = vset.pattern.permute.xlu0 %v6981_v7 }
  0xa3   :  { %4280 = vmatpush2.bf16.msra.mxu0 %v6223_v8  ;;  %v6289_v8 = vld [vmem:[%s9382_s1 + $0xc80] ss:$16 sps:$4 sm:$0xff]  }
  0xa4   :  { %4321 = vmatpush2.bf16.msra.mxu1 %v6226_v9  ;;  %4281 = vmatprep.subr.bf16.mxu0 %v6231_v10  ;;  %v6292_v9 = vld [vmem:[%s9382_s1 + $0xe80] ss:$16 sps:$4 sm:$0xff]   ;;  %v6297_v10 = vld [vmem:[%s9382_s1 + $0xc64] ss:$16 sps:$4 sm:$0xff]  }
  0xa5   :  { %4322 = vmatprep.subr.bf16.mxu1 %v6234_v11  ;;  %v6300_v11 = vld [vmem:[%s9382_s1 + $0xe64] ss:$16 sps:$4 sm:$0xff]  }
  0xa7   :  { %4282 = vmatpush2.bf16.msra.mxu0 %v6229_v12  ;;  %v6295_v12 = vld [vmem:[%s9382_s1 + $0xc60] ss:$16 sps:$4 sm:$0xff]  }
  0xa8   :  { %4323 = vmatpush2.bf16.msra.mxu1 %v6232_v14  ;;  %4283 = vmatprep.subr.bf16.mxu0 %v6237_v15  ;;  %v6298_v14 = vld [vmem:[%s9382_s1 + $0xe60] ss:$16 sps:$4 sm:$0xff]   ;;  %v6303_v15 = vld [vmem:[%s9382_s1 + $0xc44] ss:$16 sps:$4 sm:$0xff]  }
  0xa9   :  { %4324 = vmatprep.subr.bf16.mxu1 %v6240_v16  ;;  %v6306_v16 = vld [vmem:[%s9382_s1 + $0xe44] ss:$16 sps:$4 sm:$0xff]  }
  0xab   :  { %4284 = vmatpush2.bf16.msra.mxu0 %v6235_v19  ;;  %v6301_v19 = vld [vmem:[%s9382_s1 + $0xc40] ss:$16 sps:$4 sm:$0xff]  }
  0xac   :  { %4325 = vmatpush2.bf16.msra.mxu1 %v6238_v20  ;;  %4285 = vmatprep.subr.bf16.mxu0 %v6243_v21  ;;  %v6304_v20 = vld [vmem:[%s9382_s1 + $0xe40] ss:$16 sps:$4 sm:$0xff]   ;;  %v6309_v21 = vld [vmem:[%s9382_s1 + $0xc24] ss:$16 sps:$4 sm:$0xff]  }
  0xad   :  { %4326 = vmatprep.subr.bf16.mxu1 %v6246_v22  ;;  %v6312_v22 = vld [vmem:[%s9382_s1 + $0xe24] ss:$16 sps:$4 sm:$0xff]  }
  0xaf   :  { %4286 = vmatpush2.bf16.msra.mxu0 %v6241_v24  ;;  %v6307_v24 = vld [vmem:[%s9382_s1 + $0xc20] ss:$16 sps:$4 sm:$0xff]  }
  0xb0   :  { %4327 = vmatpush2.bf16.msra.mxu1 %v6244_v25  ;;  %4287 = vmatprep.subr.bf16.mxu0 %v6249_v27  ;;  %v6310_v25 = vld [vmem:[%s9382_s1 + $0xe20] ss:$16 sps:$4 sm:$0xff]   ;;  %v6315_v27 = vld [vmem:[%s9382_s1 + $0xc04] ss:$16 sps:$4 sm:$0xff]  }
  0xb1   :  { %4328 = vmatprep.subr.bf16.mxu1 %v6252_v28  ;;  %v6318_v28 = vld [vmem:[%s9382_s1 + $0xe04] ss:$16 sps:$4 sm:$0xff]  }
  0xb3   :  { %4288 = vmatpush2.bf16.msra.mxu0 %v6247_v29  ;;  %v6313_v29 = vld [vmem:[%s9382_s1 + $0xc00] ss:$16 sps:$4 sm:$0xff]  }
  0xb4   :  { %4329 = vmatpush2.bf16.msra.mxu1 %v6250_v30  ;;  %4289 = vmatprep.subr.bf16.mxu0 %v6255_v31  ;;  %v6316_v30 = vld [vmem:[%s9382_s1 + $0xe00] ss:$16 sps:$4 sm:$0xff]   ;;  %v6321_v31 = vld [vmem:[%s9382_s1 + $0xde4] ss:$16 sps:$4 sm:$0xff]  }
  0xb5   :  { %4330 = vmatprep.subr.bf16.mxu1 %v6258_v33  ;;  %v6324_v33 = vld [vmem:[%s9382_s1 + $0xfe4] ss:$16 sps:$4 sm:$0xff]  }
  0xb7   :  { %4290 = vmatpush2.bf16.msra.mxu0 %v6253_v36  ;;  %v6322_v36 = vld [vmem:[%s9382_s1 + $0xfe0] ss:$16 sps:$4 sm:$0xff]  }
  0xb8   :  { %4331 = vmatpush2.bf16.msra.mxu1 %v6256_v37  ;;  %4291 = vmatprep.subr.bf16.mxu0 %v6261_v38  ;;  %v6327_v37 = vld [vmem:[%s9382_s1 + $0xdc4] ss:$16 sps:$4 sm:$0xff]  }
  0xb9   :  { %4332 = vmatprep.subr.bf16.mxu1 %v6264_v32  ;;  %v6330_v38 = vld [vmem:[%s9382_s1 + $0xfc4] ss:$16 sps:$4 sm:$0xff]   ;;  %v6325_v32 = vld [vmem:[%s9382_s1 + $0xdc0] ss:$16 sps:$4 sm:$0xff]  }
  0xbb   :  { %4292 = vmatpush2.bf16.msra.mxu0 %v6259_v40  ;;  %v6328_v40 = vld [vmem:[%s9382_s1 + $0xfc0] ss:$16 sps:$4 sm:$0xff]  }
  0xbc   :  { %4333 = vmatpush2.bf16.msra.mxu1 %v6262_v44  ;;  %4293 = vmatprep.subr.bf16.mxu0 %v6267_v45  ;;  %v6333_v44 = vld [vmem:[%s9382_s1 + $0xda4] ss:$16 sps:$4 sm:$0xff]  }
  0xbd   :  { %4334 = vmatprep.subr.bf16.mxu1 %v6270_v46  ;;  %v6336_v45 = vld [vmem:[%s9382_s1 + $0xfa4] ss:$16 sps:$4 sm:$0xff]   ;;  %v6331_v46 = vld [vmem:[%s9382_s1 + $0xda0] ss:$16 sps:$4 sm:$0xff]  }
  0xbf   :  { %4294 = vmatpush2.bf16.msra.mxu0 %v6265_v48  ;;  %v6339_v48 = vld [vmem:[%s9382_s1 + $0xd84] ss:$16 sps:$4 sm:$0xff]  }
  0xc0   :  { %4335 = vmatpush2.bf16.msra.mxu1 %v6268_v51  ;;  %4345 = vmatprep.subr.bf16.mxu0 %v6273_v52  ;;  %v6342_v51 = vld [vmem:[%s9382_s1 + $0xf84] ss:$16 sps:$4 sm:$0xff]   ;;  %v6337_v52 = vld [vmem:[%s9382_s1 + $0xd80] ss:$16 sps:$4 sm:$0xff]  }
  0xc1   :  { %4386 = vmatprep.subr.bf16.mxu1 %v6276_v53  ;;  %v6340_v53 = vld [vmem:[%s9382_s1 + $0xf80] ss:$16 sps:$4 sm:$0xff]  }
  0xc2   :  { %4296 = vmatmul.mubr.bf16.vlgmr.msra.gmra.mxu0 %v7667_v50 }
  0xc3   :  { %4337 = vmatmul.mubr.bf16.vlgmr.msra.gmra.mxu1 %v7683_v35  ;;  %4346 = vmatpush1.bf16.msra.mxu0 %v6271_v55  ;;  %v6345_v55 = vld [vmem:[%s9382_s1 + $0xd64] ss:$16 sps:$4 sm:$0xff]  }
  0xc4   :  { %4387 = vmatpush1.bf16.msra.mxu1 %v6274_v56  ;;  %4347 = vmatprep.subr.bf16.mxu0 %v6279_v57  ;;  %v6348_v56 = vld [vmem:[%s9382_s1 + $0xf64] ss:$16 sps:$4 sm:$0xff]   ;;  %v6343_v57 = vld [vmem:[%s9382_s1 + $0xd60] ss:$16 sps:$4 sm:$0xff]  }
  0xc5   :  { %4388 = vmatprep.subr.bf16.mxu1 %v6282_v58  ;;  %4377 = vmatprep.mubr.bf16.mxu0 %v7679_v54  ;;  %v6346_v58 = vld [vmem:[%s9382_s1 + $0xf60] ss:$16 sps:$4 sm:$0xff]  }
  0xc6   :  { %4418 = vmatprep.mubr.bf16.mxu1 %v7699_v59 }
  0xc7   :  { %4348 = vmatpush1.bf16.msra.mxu0 %v6277_v61  ;;  %v6351_v61 = vld [vmem:[%s9382_s1 + $0xd44] ss:$16 sps:$4 sm:$0xff]  }
  0xc8   :  { %4389 = vmatpush1.bf16.msra.mxu1 %v6280_v62  ;;  %4349 = vmatprep.subr.bf16.mxu0 %v6285_v63  ;;  %v6354_v62 = vld [vmem:[%s9382_s1 + $0xf44] ss:$16 sps:$4 sm:$0xff]   ;;  %v6349_v63 = vld [vmem:[%s9382_s1 + $0xd40] ss:$16 sps:$4 sm:$0xff]  }
  0xc9   :  { %4390 = vmatprep.subr.bf16.mxu1 %v6288_v1  ;;  %v6352_v1 = vld [vmem:[%s9382_s1 + $0xf40] ss:$16 sps:$4 sm:$0xff]  }
  0xcb   :  { %4350 = vmatpush1.bf16.msra.mxu0 %v6283_v2  ;;  %v7860_v2 = vld [vmem:[%s9381_s0 + $0x10] sm:$0x1f] }
  0xcc   :  { %4391 = vmatpush1.bf16.msra.mxu1 %v6286_v3  ;;  %4351 = vmatprep.subr.bf16.mxu0 %v6291_v4  ;;  %v6357_v3 = vld [vmem:[%s9382_s1 + $0xd24] ss:$16 sps:$4 sm:$0xff]  }
  0xcd   :  { %4392 = vmatprep.subr.bf16.mxu1 %v6294_v5  ;;  %v6360_v4 = vld [vmem:[%s9382_s1 + $0xf24] ss:$16 sps:$4 sm:$0xff]   ;;  %v7870_v5 = vrot.slane %v7860_v2, %v7149_v49 }
  0xcf   :  { %4352 = vmatpush1.bf16.msra.mxu0 %v6289_v8  ;;  %v6355_v8 = vld [vmem:[%s9382_s1 + $0xd20] ss:$16 sps:$4 sm:$0xff]  }
  0xd0   :  { %4393 = vmatpush1.bf16.msra.mxu1 %v6292_v9  ;;  %4353 = vmatprep.subr.bf16.mxu0 %v6297_v10  ;;  %v6358_v9 = vld [vmem:[%s9382_s1 + $0xf20] ss:$16 sps:$4 sm:$0xff]   ;;  %v6363_v10 = vld [vmem:[%s9382_s1 + $0xd04] ss:$16 sps:$4 sm:$0xff]  }
  0xd1   :  { %4394 = vmatprep.subr.bf16.mxu1 %v6300_v11  ;;  %v6366_v11 = vld [vmem:[%s9382_s1 + $0xf04] ss:$16 sps:$4 sm:$0xff]  }
  0xd3   :  { %4354 = vmatpush1.bf16.msra.mxu0 %v6295_v12  ;;  %v6361_v12 = vld [vmem:[%s9382_s1 + $0xd00] ss:$16 sps:$4 sm:$0xff]  }
  0xd4   :  { %4395 = vmatpush1.bf16.msra.mxu1 %v6298_v14  ;;  %4355 = vmatprep.subr.bf16.mxu0 %v6303_v15  ;;  %v790_v14 = vcombine.high %v7870_v5, %v7870_v5  ;;  %v6364_v15 = vld [vmem:[%s9382_s1 + $0xf00] ss:$16 sps:$4 sm:$0xff]  }
  0xd5   :  { %4396 = vmatprep.subr.bf16.mxu1 %v6306_v16  ;;  %v673_v16 = vld [vmem:[%s9383_s2] sm:$0xf] }
  0xd7   :  { %4356 = vmatpush1.bf16.msra.mxu0 %v6301_v19  ;;  %v7897_v19 = vrot.slane %v7646_v39, %v7149_v49 }
  0xd8   :  { %4397 = vmatpush1.bf16.msra.mxu1 %v6304_v20  ;;  %4357 = vmatprep.subr.bf16.mxu0 %v6309_v21  ;;  %v4077_v20 = vsub.s32 0, %v7131_v43  ;;  %v6370_v21 = vld [vmem:[%s9382_s1 + $0x10e4] ss:$16 sps:$4 sm:$0xff]  }
  0xd9   :  { %4398 = vmatprep.subr.bf16.mxu1 %v6312_v22  ;;  %v6373_v22 = vld [vmem:[%s9382_s1 + $0x12e4] ss:$16 sps:$4 sm:$0xff]   ;;  %v7912_v39 = vcombine.high %v7897_v19, %v7897_v19 }
  0xdb   :  { %4358 = vmatpush1.bf16.msra.mxu0 %v6307_v24  ;;  %v4081_v24 = vsub.s32 1, %v7131_v43 }
  0xdc   :  { %4399 = vmatpush1.bf16.msra.mxu1 %v6310_v25  ;;  %4359 = vmatprep.subr.bf16.mxu0 %v6315_v27  ;;  %v7908_v25 = vrot.slane %v790_v14, %v7149_v49  ;;  %v6368_v27 = vld [vmem:[%s9382_s1 + $0x10e0] ss:$16 sps:$4 sm:$0xff]  }
  0xdd   :  { %4400 = vmatprep.subr.bf16.mxu1 %v6318_v28  ;;  %v6371_v28 = vld [vmem:[%s9382_s1 + $0x12e0] ss:$16 sps:$4 sm:$0xff]  }
  0xde   :  { %v6398_v14 = vld [vmem:[%s9382_s1 + $0x1040] ss:$16 sps:$4 sm:$0xff]  }
  0xdf   :  { %4360 = vmatpush1.bf16.msra.mxu0 %v6313_v29  ;;  %v4078_v29 = vrot.slane %v673_v16, %v4077_v20  ;;  %v6409_v20 = vld [vmem:[%s9382_s1 + $0x1224] ss:$16 sps:$4 sm:$0xff]  }
  0xe0   :  { %4401 = vmatpush1.bf16.msra.mxu1 %v6316_v30  ;;  %4361 = vmatprep.subr.bf16.mxu0 %v6321_v31  ;;  %v6376_v30 = vld [vmem:[%s9382_s1 + $0x10c4] ss:$16 sps:$4 sm:$0xff]  }
  0xe1   :  { %4402 = vmatprep.subr.bf16.mxu1 %v6324_v33  ;;  %v6379_v31 = vld [vmem:[%s9382_s1 + $0x12c4] ss:$16 sps:$4 sm:$0xff]   ;;  %v4082_v33 = vrot.slane %v673_v16, %v4081_v24 }
  0xe2   :  { %v6406_v16 = vld [vmem:[%s9382_s1 + $0x1024] ss:$16 sps:$4 sm:$0xff]  }
  0xe3   :  { %4362 = vmatpush2.bf16.msra.mxu0 %v6319_v34  ;;  %v7928_v34 = vcombine.high %v7908_v25, %v7908_v25  ;;  %v6412_v24 = vld [vmem:[%s9382_s1 + $0x1004] ss:$16 sps:$4 sm:$0xff]  }
  0xe4   :  { %4403 = vmatpush2.bf16.msra.mxu1 %v6322_v36  ;;  %4363 = vmatprep.subr.bf16.mxu0 %v6327_v37 }
  0xe5   :  { %4404 = vmatprep.subr.bf16.mxu1 %v6330_v38  ;;  %v6374_v38 = vld [vmem:[%s9382_s1 + $0x10c0] ss:$16 sps:$4 sm:$0xff]  }
  0xe7   :  { %4364 = vmatpush2.bf16.msra.mxu0 %v6325_v32  ;;  %v6377_v32 = vld [vmem:[%s9382_s1 + $0x12c0] ss:$16 sps:$4 sm:$0xff]  }
  0xe8   :  { %4405 = vmatpush2.bf16.msra.mxu1 %v6328_v40  ;;  %4365 = vmatprep.subr.bf16.mxu0 %v6333_v44 }
  0xe9   :  { %4406 = vmatprep.subr.bf16.mxu1 %v6336_v45 }
  0xeb   :  { %4366 = vmatpush2.bf16.msra.mxu0 %v6331_v46  ;;  %v6382_v46 = vld [vmem:[%s9382_s1 + $0x10a4] ss:$16 sps:$4 sm:$0xff]  }
  0xec   :  { %4407 = vmatpush2.bf16.msra.mxu1 %v6334_v47  ;;  %4367 = vmatprep.subr.bf16.mxu0 %v6339_v48  ;;  %v6385_v47 = vld [vmem:[%s9382_s1 + $0x12a4] ss:$16 sps:$4 sm:$0xff]  }
  0xed   :  { %4408 = vmatprep.subr.bf16.mxu1 %v6342_v51 }
  0xef   :  { %4368 = vmatpush2.bf16.msra.mxu0 %v6337_v52  ;;  %v6380_v52 = vld [vmem:[%s9382_s1 + $0x10a0] ss:$16 sps:$4 sm:$0xff]  }
  0xf0   :  { %4409 = vmatpush2.bf16.msra.mxu1 %v6340_v53  ;;  %4369 = vmatprep.subr.bf16.mxu0 %v6345_v55  ;;  %v6383_v53 = vld [vmem:[%s9382_s1 + $0x12a0] ss:$16 sps:$4 sm:$0xff]  }
  0xf1   :  { %4410 = vmatprep.subr.bf16.mxu1 %v6348_v56 }
  0xf3   :  { %4370 = vmatpush2.bf16.msra.mxu0 %v6343_v57 }
  0xf4   :  { %4411 = vmatpush2.bf16.msra.mxu1 %v6346_v58  ;;  %4371 = vmatprep.subr.bf16.mxu0 %v6351_v61 }
  0xf5   :  { %4412 = vmatprep.subr.bf16.mxu1 %v6354_v62  ;;  %v6388_v62 = vld [vmem:[%s9382_s1 + $0x1084] ss:$16 sps:$4 sm:$0xff]  }
  0xf7   :  { %4372 = vmatpush2.bf16.msra.mxu0 %v6349_v63  ;;  %v6391_v63 = vld [vmem:[%s9382_s1 + $0x1284] ss:$16 sps:$4 sm:$0xff]  }
  0xf8   :  { %4413 = vmatpush2.bf16.msra.mxu1 %v6352_v1  ;;  %4373 = vmatprep.subr.bf16.mxu0 %v6357_v3  ;;  %v6386_v1 = vld [vmem:[%s9382_s1 + $0x1080] ss:$16 sps:$4 sm:$0xff]  }
  0xf9   :  { %4414 = vmatprep.subr.bf16.mxu1 %v6360_v4  ;;  %v6389_v3 = vld [vmem:[%s9382_s1 + $0x1280] ss:$16 sps:$4 sm:$0xff]   ;;  %v6394_v4 = vld [vmem:[%s9382_s1 + $0x1064] ss:$16 sps:$4 sm:$0xff]  }
  0xfb   :  { %4374 = vmatpush2.bf16.msra.mxu0 %v6355_v8  ;;  %v6397_v8 = vld [vmem:[%s9382_s1 + $0x1264] ss:$16 sps:$4 sm:$0xff]  }
  0xfc   :  { %4415 = vmatpush2.bf16.msra.mxu1 %v6358_v9  ;;  %4375 = vmatprep.subr.bf16.mxu0 %v6363_v10  ;;  %v6392_v9 = vld [vmem:[%s9382_s1 + $0x1060] ss:$16 sps:$4 sm:$0xff]  }
  0xfd   :  { %4416 = vmatprep.subr.bf16.mxu1 %v6366_v11  ;;  %v6395_v10 = vld [vmem:[%s9382_s1 + $0x1260] ss:$16 sps:$4 sm:$0xff]   ;;  %v6400_v11 = vld [vmem:[%s9382_s1 + $0x1044] ss:$16 sps:$4 sm:$0xff]  }
  0xff   :  { %4376 = vmatpush2.bf16.msra.mxu0 %v6361_v12  ;;  %v6403_v12 = vld [vmem:[%s9382_s1 + $0x1244] ss:$16 sps:$4 sm:$0xff]  }
 0x100   :  { %4417 = vmatpush2.bf16.msra.mxu1 %v6364_v15  ;;  %4427 = vmatprep.subr.bf16.mxu0 %v6370_v21  ;;  %v6401_v15 = vld [vmem:[%s9382_s1 + $0x1240] ss:$16 sps:$4 sm:$0xff]  }
 0x101   :  { %4468 = vmatprep.subr.bf16.mxu1 %v6373_v22  ;;  %v6404_v21 = vld [vmem:[%s9382_s1 + $0x1020] ss:$16 sps:$4 sm:$0xff]  }
 0x102   :  { %v4133_v36 = vpop.f32.mrf.mxu0  ;;  %4378 = vmatmul.mubr.bf16.vlgmr.msra.gmra.mxu0 %v7897_v19  ;;  %v6407_v22 = vld [vmem:[%s9382_s1 + $0x1220] ss:$16 sps:$4 sm:$0xff]  }
 0x103   :  { %v4174_v37 = vpop.f32.mrf.mxu1  ;;  %4419 = vmatmul.mubr.bf16.vlgmr.msra.gmra.mxu1 %v7912_v39  ;;  %v4134_v40 = vadd.f32 %v4133_v36, %v4078_v29  ;;  %4428 = vmatpush1.bf16.msra.mxu0 %v6368_v27  ;;  %v6415_v27 = vld [vmem:[%s9382_s1 + $0x1204] ss:$16 sps:$4 sm:$0xff]   ;;  %v6413_v29 = vld [vmem:[%s9382_s1 + $0x1200] ss:$16 sps:$4 sm:$0xff]  }
 0x104   :  { %4469 = vmatpush1.bf16.msra.mxu1 %v6371_v28  ;;  %v4135_v44 = vpop.f32.mrf.mxu0  ;;  %4429 = vmatprep.subr.bf16.mxu0 %v6376_v30  ;;  %v6410_v28 = vld [vmem:[%s9382_s1 + $0x1000] ss:$16 sps:$4 sm:$0xff]   ;;  %v6418_v30 = vld [vmem:[%s9382_s1 + $0x11e4] ss:$16 sps:$4 sm:$0xff]  }
 0x105   :  { %v4176_v45 = vpop.f32.mrf.mxu1  ;;  %4470 = vmatprep.subr.bf16.mxu1 %v6379_v31  ;;  %v7944_v48 = vadd.f32 %v4174_v37, %v4134_v40  ;;  %v4136_v51 = vadd.f32 %v4135_v44, %v4082_v33  ;;  %4459 = vmatprep.mubr.bf16.mxu0 %v7908_v25  ;;  %v6421_v31 = vld [vmem:[%s9382_s1 + $0x13e4] ss:$16 sps:$4 sm:$0xff]   ;;  %v6416_v33 = vld [vmem:[%s9382_s1 + $0x11e0] ss:$16 sps:$4 sm:$0xff]  }
 0x106   :  { %4500 = vmatprep.mubr.bf16.mxu1 %v7928_v34  ;;  %v4137_v55 = vpop.f32.mrf.mxu0  ;;  %v6419_v36 = vld [vmem:[%s9382_s1 + $0x13e0] ss:$16 sps:$4 sm:$0xff]   ;;  %v6424_v37 = vld [vmem:[%s9382_s1 + $0x11c4] ss:$16 sps:$4 sm:$0xff]  }
 0x107   :  { %v4178_v56 = vpop.f32.mrf.mxu1  ;;  %v7954_v57 = vadd.f32 %v4176_v45, %v4136_v51  ;;  %4430 = vmatpush1.bf16.msra.mxu0 %v6374_v38  ;;  %v6427_v38 = vld [vmem:[%s9382_s1 + $0x13c4] ss:$16 sps:$4 sm:$0xff]   ;;  %v6425_v40 = vld [vmem:[%s9382_s1 + $0x13c0] ss:$16 sps:$4 sm:$0xff]  }
 0x108   :  { %4471 = vmatpush1.bf16.msra.mxu1 %v6377_v32  ;;  %v4138_v58 = vpop.f32.mrf.mxu0  ;;  %4431 = vmatprep.subr.bf16.mxu0 %v6382_v46  ;;  %v6422_v32 = vld [vmem:[%s9382_s1 + $0x11c0] ss:$16 sps:$4 sm:$0xff]   ;;  %v6430_v44 = vld [vmem:[%s9382_s1 + $0x11a4] ss:$16 sps:$4 sm:$0xff]  }
 0x109   :  { %v4179_v61 = vpop.f32.mrf.mxu1  ;;  %4472 = vmatprep.subr.bf16.mxu1 %v6385_v47  ;;  %v6433_v45 = vld [vmem:[%s9382_s1 + $0x13a4] ss:$16 sps:$4 sm:$0xff]   ;;  %v6428_v46 = vld [vmem:[%s9382_s1 + $0x11a0] ss:$16 sps:$4 sm:$0xff]  }
 0x10a   :  { %v6431_v47 = vld [vmem:[%s9382_s1 + $0x13a0] ss:$16 sps:$4 sm:$0xff]   ;;  %v6436_v51 = vld [vmem:[%s9382_s1 + $0x1184] ss:$16 sps:$4 sm:$0xff]  }
 0x10b   :  { %4432 = vmatpush1.bf16.msra.mxu0 %v6380_v52  ;;  %v6439_v52 = vld [vmem:[%s9382_s1 + $0x1384] ss:$16 sps:$4 sm:$0xff]   ;;  %v6437_v55 = vld [vmem:[%s9382_s1 + $0x1380] ss:$16 sps:$4 sm:$0xff]  }
 0x10c   :  { %4473 = vmatpush1.bf16.msra.mxu1 %v6383_v53  ;;  %4433 = vmatprep.subr.bf16.mxu0 %v6388_v62  ;;  %v6434_v53 = vld [vmem:[%s9382_s1 + $0x1180] ss:$16 sps:$4 sm:$0xff]   ;;  %v6442_v56 = vld [vmem:[%s9382_s1 + $0x1164] ss:$16 sps:$4 sm:$0xff]  }
 0x10d   :  { %4474 = vmatprep.subr.bf16.mxu1 %v6391_v63  ;;  %v6445_v58 = vld [vmem:[%s9382_s1 + $0x1364] ss:$16 sps:$4 sm:$0xff]   ;;  %v6440_v61 = vld [vmem:[%s9382_s1 + $0x1160] ss:$16 sps:$4 sm:$0xff]  }
 0x10e   :  { %v6443_v62 = vld [vmem:[%s9382_s1 + $0x1360] ss:$16 sps:$4 sm:$0xff]   ;;  %v6448_v63 = vld [vmem:[%s9382_s1 + $0x1144] ss:$16 sps:$4 sm:$0xff]  }
 0x10f   :  { %4434 = vmatpush1.bf16.msra.mxu0 %v6386_v1  ;;  %v6451_v1 = vld [vmem:[%s9382_s1 + $0x1344] ss:$16 sps:$4 sm:$0xff]  }
 0x110   :  { %4475 = vmatpush1.bf16.msra.mxu1 %v6389_v3  ;;  %4435 = vmatprep.subr.bf16.mxu0 %v6394_v4  ;;  %v6446_v3 = vld [vmem:[%s9382_s1 + $0x1140] ss:$16 sps:$4 sm:$0xff]  }
 0x111   :  { %4476 = vmatprep.subr.bf16.mxu1 %v6397_v8  ;;  %v6449_v4 = vld [vmem:[%s9382_s1 + $0x1340] ss:$16 sps:$4 sm:$0xff]   ;;  %v6454_v8 = vld [vmem:[%s9382_s1 + $0x1124] ss:$16 sps:$4 sm:$0xff]  }
 0x113   :  { %4436 = vmatpush1.bf16.msra.mxu0 %v6392_v9  ;;  %v6457_v9 = vld [vmem:[%s9382_s1 + $0x1324] ss:$16 sps:$4 sm:$0xff]  }
 0x114   :  { %4477 = vmatpush1.bf16.msra.mxu1 %v6395_v10  ;;  %4437 = vmatprep.subr.bf16.mxu0 %v6400_v11  ;;  %v6452_v10 = vld [vmem:[%s9382_s1 + $0x1120] ss:$16 sps:$4 sm:$0xff]  }
 0x115   :  { %4478 = vmatprep.subr.bf16.mxu1 %v6403_v12  ;;  %v6455_v11 = vld [vmem:[%s9382_s1 + $0x1320] ss:$16 sps:$4 sm:$0xff]   ;;  %v6460_v12 = vld [vmem:[%s9382_s1 + $0x1104] ss:$16 sps:$4 sm:$0xff]  }
 0x117   :  { %4438 = vmatpush1.bf16.msra.mxu0 %v6398_v14  ;;  %v6463_v14 = vld [vmem:[%s9382_s1 + $0x1304] ss:$16 sps:$4 sm:$0xff]  }
 0x118   :  { %4479 = vmatpush1.bf16.msra.mxu1 %v6401_v15  ;;  %4439 = vmatprep.subr.bf16.mxu0 %v6406_v16  ;;  %v8108_v15 = vrot.slane %v7870_v5, %v7149_v49  ;;  %v6458_v16 = vld [vmem:[%s9382_s1 + $0x1100] ss:$16 sps:$4 sm:$0xff]   ;;  %v6470_v5 = vld [vmem:[%s9382_s1 + $0xec] ss:$16 sps:$4 sm:$0xff]  }
 0x119   :  { %4480 = vmatprep.subr.bf16.mxu1 %v6409_v20  ;;  %v6461_v20 = vld [vmem:[%s9382_s1 + $0x1300] ss:$16 sps:$4 sm:$0xff]  }
 0x11b   :  { %4440 = vmatpush1.bf16.msra.mxu0 %v6404_v21  ;;  %v6467_v21 = vld [vmem:[%s9382_s1 + $0x1424] ss:$16 sps:$4 sm:$0xff]  }
 0x11c   :  { %4481 = vmatpush1.bf16.msra.mxu1 %v6407_v22  ;;  %4441 = vmatprep.subr.bf16.mxu0 %v6412_v24  ;;  %v6465_v22 = vld [vmem:[%s9382_s1 + $0x1420] ss:$16 sps:$4 sm:$0xff]   ;;  %v6468_v24 = vld [vmem:[%s9382_s1 + $0xe8] ss:$16 sps:$4 sm:$0xff]  }
 0x11d   :  { %4482 = vmatprep.subr.bf16.mxu1 %v6415_v27  ;;  %v775_v27 = vcombine.high %v7860_v2, %v7860_v2  ;;  %v6471_v2 = vld [vmem:[%s9382_s1 + $0x1400] ss:$16 sps:$4 sm:$0xff]  }
 0x11f   :  { %4442 = vmatpush1.bf16.msra.mxu0 %v6410_v28  ;;  %v8132_v28 = vcombine.high %v8108_v15, %v8108_v15 }
 0x120   :  { %4483 = vmatpush1.bf16.msra.mxu1 %v6413_v29  ;;  %4443 = vmatprep.subr.bf16.mxu0 %v6418_v30  ;;  %v6473_v29 = vld [vmem:[%s9382_s1 + $0x1404] ss:$16 sps:$4 sm:$0xff]   ;;  %v6476_v30 = vld [vmem:[%s9382_s1 + $0xcc] ss:$16 sps:$4 sm:$0xff]  }
 0x121   :  { %4484 = vmatprep.subr.bf16.mxu1 %v6421_v31  ;;  %v6474_v31 = vld [vmem:[%s9382_s1 + $0xc8] ss:$16 sps:$4 sm:$0xff]  }
 0x123   :  { %4444 = vmatpush2.bf16.msra.mxu0 %v6416_v33  ;;  %v789_v33 = vrot.slane %v775_v27, %v7149_v49  ;;  %v6518_v27 = vld [vmem:[%s9382_s1 + $0x22c] ss:$16 sps:$4 sm:$0xff]  }
 0x124   :  { %4485 = vmatpush2.bf16.msra.mxu1 %v6419_v36  ;;  %4445 = vmatprep.subr.bf16.mxu0 %v6424_v37 }
 0x125   :  { %4486 = vmatprep.subr.bf16.mxu1 %v6427_v38 }
 0x127   :  { %4446 = vmatpush2.bf16.msra.mxu0 %v6422_v32 }
 0x128   :  { %4487 = vmatpush2.bf16.msra.mxu1 %v6425_v40  ;;  %4447 = vmatprep.subr.bf16.mxu0 %v6430_v44  ;;  %v6479_v44 = vld [vmem:[%s9382_s1 + $0xac] ss:$16 sps:$4 sm:$0xff]  }
 0x129   :  { %4488 = vmatprep.subr.bf16.mxu1 %v6433_v45  ;;  %v6482_v45 = vld [vmem:[%s9382_s1 + $0x2ec] ss:$16 sps:$4 sm:$0xff]  }
 0x12b   :  { %4448 = vmatpush2.bf16.msra.mxu0 %v6428_v46 }
 0x12c   :  { %4489 = vmatpush2.bf16.msra.mxu1 %v6431_v47  ;;  %4449 = vmatprep.subr.bf16.mxu0 %v6436_v51  ;;  %v6480_v51 = vld [vmem:[%s9382_s1 + $0x2e8] ss:$16 sps:$4 sm:$0xff]  }
 0x12d   :  { %4490 = vmatprep.subr.bf16.mxu1 %v6439_v52 }
 0x12f   :  { %4450 = vmatpush2.bf16.msra.mxu0 %v6434_v53 }
 0x130   :  { %4491 = vmatpush2.bf16.msra.mxu1 %v6437_v55  ;;  %4451 = vmatprep.subr.bf16.mxu0 %v6442_v56  ;;  %v8168_v55 = vrot.slane %v789_v33, %v7149_v49  ;;  %v6483_v49 = vld [vmem:[%s9382_s1 + $0x88] ss:$16 sps:$4 sm:$0xff]  }
 0x131   :  { %4492 = vmatprep.subr.bf16.mxu1 %v6445_v58  ;;  %v6519_v33 = vld [vmem:[%s9382_s1 + $0x1c8] ss:$16 sps:$4 sm:$0xff]  }
 0x133   :  { %4452 = vmatpush2.bf16.msra.mxu0 %v6440_v61  ;;  %v6485_v61 = vld [vmem:[%s9382_s1 + $0x8c] ss:$16 sps:$4 sm:$0xff]  }
 0x134   :  { %4493 = vmatpush2.bf16.msra.mxu1 %v6443_v62  ;;  %4453 = vmatprep.subr.bf16.mxu0 %v6448_v63  ;;  %v6486_v62 = vld [vmem:[%s9382_s1 + $0x2c8] ss:$16 sps:$4 sm:$0xff]   ;;  %v6491_v63 = vld [vmem:[%s9382_s1 + $0x6c] ss:$16 sps:$4 sm:$0xff]  }
 0x135   :  { %4494 = vmatprep.subr.bf16.mxu1 %v6451_v1  ;;  %v6494_v1 = vld [vmem:[%s9382_s1 + $0x2ac] ss:$16 sps:$4 sm:$0xff]  }
 0x137   :  { %4454 = vmatpush2.bf16.msra.mxu0 %v6446_v3  ;;  %v6489_v3 = vld [vmem:[%s9382_s1 + $0x68] ss:$16 sps:$4 sm:$0xff]  }
 0x138   :  { %4495 = vmatpush2.bf16.msra.mxu1 %v6449_v4  ;;  %4455 = vmatprep.subr.bf16.mxu0 %v6454_v8  ;;  %v6492_v4 = vld [vmem:[%s9382_s1 + $0x2a8] ss:$16 sps:$4 sm:$0xff]   ;;  %v6497_v8 = vld [vmem:[%s9382_s1 + $0x4c] ss:$16 sps:$4 sm:$0xff]  }
 0x139   :  { %4496 = vmatprep.subr.bf16.mxu1 %v6457_v9  ;;  %v6495_v9 = vld [vmem:[%s9382_s1 + $0x48] ss:$16 sps:$4 sm:$0xff]  }
 0x13b   :  { %4456 = vmatpush2.bf16.msra.mxu0 %v6452_v10  ;;  %v6498_v10 = vld [vmem:[%s9382_s1 + $0x288] ss:$16 sps:$4 sm:$0xff]  }
 0x13c   :  { %4497 = vmatpush2.bf16.msra.mxu1 %v6455_v11  ;;  %4457 = vmatprep.subr.bf16.mxu0 %v6460_v12  ;;  %v6503_v11 = vld [vmem:[%s9382_s1 + $0x2c] ss:$16 sps:$4 sm:$0xff]  }
 0x13d   :  { %4498 = vmatprep.subr.bf16.mxu1 %v6463_v14  ;;  %v6506_v12 = vld [vmem:[%s9382_s1 + $0x26c] ss:$16 sps:$4 sm:$0xff]   ;;  %v6501_v14 = vld [vmem:[%s9382_s1 + $0x28] ss:$16 sps:$4 sm:$0xff]  }
 0x13f   :  { %4458 = vmatpush2.bf16.msra.mxu0 %v6458_v16  ;;  %v6504_v16 = vld [vmem:[%s9382_s1 + $0x268] ss:$16 sps:$4 sm:$0xff]  }
 0x140   :  { %4499 = vmatpush2.bf16.msra.mxu1 %v6461_v20  ;;  %4521 = vmatprep.subr.bf16.mxu0 %v6467_v21  ;;  %v6509_v20 = vld [vmem:[%s9382_s1 + $0xc] ss:$16 sps:$4 sm:$0xff]  }
 0x141   :  { %4550 = vmatprep.subr.bf16.mxu1 %v6470_v5  ;;  %v6512_v21 = vld [vmem:[%s9382_s1 + $0x24c] ss:$16 sps:$4 sm:$0xff]   ;;  %v6507_v5 = vld [vmem:[%s9382_s1 + $0x8] ss:$16 sps:$4 sm:$0xff]  }
 0x142   :  { %v4215_v36 = vpop.f32.mrf.mxu0  ;;  %4460 = vmatmul.mubr.bf16.vlgmr.msra.gmra.mxu0 %v8108_v15 }
 0x143   :  { %v4256_v37 = vpop.f32.mrf.mxu1  ;;  %4501 = vmatmul.mubr.bf16.vlgmr.msra.gmra.mxu1 %v8132_v28  ;;  %v4216_v38 = vadd.f32 %v4215_v36, %v7944_v48  ;;  %4522 = vmatpush1.bf16.msra.mxu0 %v6465_v22  ;;  %v6477_v48 = vld [vmem:[%s9382_s1 + $0xa8] ss:$16 sps:$4 sm:$0xff]  }
 0x144   :  { %4551 = vmatpush1.bf16.msra.mxu1 %v6468_v24  ;;  %v4217_v32 = vpop.f32.mrf.mxu0  ;;  %4523 = vmatprep.subr.bf16.mxu0 %v6473_v29  ;;  %v6510_v22 = vld [vmem:[%s9382_s1 + $0x248] ss:$16 sps:$4 sm:$0xff]   ;;  %v6515_v24 = vld [vmem:[%s9382_s1 + $0x1ec] ss:$16 sps:$4 sm:$0xff]  }
 0x145   :  { %v4258_v40 = vpop.f32.mrf.mxu1  ;;  %4552 = vmatprep.subr.bf16.mxu1 %v6476_v30  ;;  %v8156_v46 = vadd.f32 %v4256_v37, %v4216_v38  ;;  %v4218_v47 = vadd.f32 %v4217_v32, %v7954_v57  ;;  %4541 = vmatprep.mubr.bf16.mxu0 %v6981_v7  ;;  %v6513_v29 = vld [vmem:[%s9382_s1 + $0x1e8] ss:$16 sps:$4 sm:$0xff]   ;;  %v6527_v37 = vld [vmem:[%s9382_s1 + $0x1ac] ss:$16 sps:$4 sm:$0xff]  }
 0x146   :  { %4582 = vmatprep.mubr.bf16.mxu1 %v7177_v60  ;;  %v4219_v52 = vpop.f32.mrf.mxu0  ;;  %v6488_v60 = vld [vmem:[%s9382_s1 + $0x2cc] ss:$16 sps:$4 sm:$0xff]   ;;  %v6516_v30 = vld [vmem:[%s9382_s1 + $0x228] ss:$16 sps:$4 sm:$0xff]  }
 0x147   :  { %v4260_v53 = vpop.f32.mrf.mxu1  ;;  %v8170_v56 = vadd.f32 %v4258_v40, %v4218_v47  ;;  %4524 = vmatpush1.bf16.msra.mxu0 %v6471_v2  ;;  %v6521_v2 = vld [vmem:[%s9382_s1 + $0x1cc] ss:$16 sps:$4 sm:$0xff]   ;;  %v6522_v36 = vld [vmem:[%s9382_s1 + $0x208] ss:$16 sps:$4 sm:$0xff]  }
 0x148   :  { %4553 = vmatpush1.bf16.msra.mxu1 %v6474_v31  ;;  %v4220_v57 = vpop.f32.mrf.mxu0  ;;  %4591 = vmatprep.subr.bf16.mxu0 %v6482_v45  ;;  %v6524_v31 = vld [vmem:[%s9382_s1 + $0x20c] ss:$16 sps:$4 sm:$0xff]   ;;  %v6525_v32 = vld [vmem:[%s9382_s1 + $0x1a8] ss:$16 sps:$4 sm:$0xff]  }
 0x149   :  { %v4261_v58 = vpop.f32.mrf.mxu1  ;;  %4554 = vmatprep.subr.bf16.mxu1 %v6479_v44  ;;  %v6530_v38 = vld [vmem:[%s9382_s1 + $0x3ec] ss:$16 sps:$4 sm:$0xff]   ;;  %v6528_v40 = vld [vmem:[%s9382_s1 + $0x3e8] ss:$16 sps:$4 sm:$0xff]  }
 0x14a   :  { %5902 = vmatmul.mubr.msk.bf16.vlgmr.msra.gmra.mxu0 %vm4095_vm0, %v8168_v55  ;;  %v6533_v44 = vld [vmem:[%s9382_s1 + $0x18c] ss:$16 sps:$4 sm:$0xff]   ;;  %v6531_v47 = vld [vmem:[%s9382_s1 + $0x188] ss:$16 sps:$4 sm:$0xff]  }
 0x14b   :  { %4592 = vmatpush1.bf16.msra.mxu0 %v6480_v51  ;;  %4623 = vmatprep.mubr.bf16.mxu0 %v7190_v0  ;;  %v6500_v0 = vld [vmem:[%s9382_s1 + $0x28c] ss:$16 sps:$4 sm:$0xff]   ;;  %v6537_v53 = vld [vmem:[%s9382_s1 + $0x168] ss:$16 sps:$4 sm:$0xff]  }
 0x14c   :  { %4555 = vmatpush1.bf16.msra.mxu1 %v6477_v48  ;;  %4593 = vmatprep.subr.bf16.mxu0 %v6488_v60  ;;  %v6536_v45 = vld [vmem:[%s9382_s1 + $0x3cc] ss:$16 sps:$4 sm:$0xff]   ;;  %v6534_v48 = vld [vmem:[%s9382_s1 + $0x3c8] ss:$16 sps:$4 sm:$0xff]  }
 0x14d   :  { %4556 = vmatprep.subr.bf16.mxu1 %v6485_v61  ;;  %v6539_v51 = vld [vmem:[%s9382_s1 + $0x16c] ss:$16 sps:$4 sm:$0xff]   ;;  %v6540_v57 = vld [vmem:[%s9382_s1 + $0x3a8] ss:$16 sps:$4 sm:$0xff]  }
 0x14e   :  { %v6542_v52 = vld [vmem:[%s9382_s1 + $0x3ac] ss:$16 sps:$4 sm:$0xff]   ;;  %v6543_v60 = vld [vmem:[%s9382_s1 + $0x148] ss:$16 sps:$4 sm:$0xff]  }
 0x14f   :  { %4594 = vmatpush1.bf16.msra.mxu0 %v6486_v62  ;;  %v6545_v58 = vld [vmem:[%s9382_s1 + $0x14c] ss:$16 sps:$4 sm:$0xff]  }
 0x150   :  { %4557 = vmatpush1.bf16.msra.mxu1 %v6483_v49  ;;  %4595 = vmatprep.subr.bf16.mxu0 %v6494_v1  ;;  %v6548_v61 = vld [vmem:[%s9382_s1 + $0x38c] ss:$16 sps:$4 sm:$0xff]   ;;  %v6546_v49 = vld [vmem:[%s9382_s1 + $0x388] ss:$16 sps:$4 sm:$0xff]  }
 0x151   :  { %4558 = vmatprep.subr.bf16.mxu1 %v6491_v63  ;;  %v6551_v62 = vld [vmem:[%s9382_s1 + $0x12c] ss:$16 sps:$4 sm:$0xff]   ;;  %v6549_v1 = vld [vmem:[%s9382_s1 + $0x128] ss:$16 sps:$4 sm:$0xff]  }
 0x152   :  { %v6554_v63 = vld [vmem:[%s9382_s1 + $0x36c] ss:$16 sps:$4 sm:$0xff]  }
 0x153   :  { %4596 = vmatpush1.bf16.msra.mxu0 %v6492_v4  ;;  %v6557_v4 = vld [vmem:[%s9382_s1 + $0x10c] ss:$16 sps:$4 sm:$0xff]  }
 0x154   :  { %4559 = vmatpush1.bf16.msra.mxu1 %v6489_v3  ;;  %4597 = vmatprep.subr.bf16.mxu0 %v6500_v0  ;;  %v6552_v3 = vld [vmem:[%s9382_s1 + $0x368] ss:$16 sps:$4 sm:$0xff]  }
 0x155   :  { %4560 = vmatprep.subr.bf16.mxu1 %v6497_v8  ;;  %v6560_v8 = vld [vmem:[%s9382_s1 + $0x34c] ss:$16 sps:$4 sm:$0xff]   ;;  %v6555_v0 = vld [vmem:[%s9382_s1 + $0x108] ss:$16 sps:$4 sm:$0xff]  }
 0x157   :  { %4598 = vmatpush1.bf16.msra.mxu0 %v6498_v10  ;;  %v6563_v10 = vld [vmem:[%s9382_s1 + $0x32c] ss:$16 sps:$4 sm:$0xff]  }
 0x158   :  { %4561 = vmatpush1.bf16.msra.mxu1 %v6495_v9  ;;  %4599 = vmatprep.subr.bf16.mxu0 %v6506_v12  ;;  %v6558_v9 = vld [vmem:[%s9382_s1 + $0x348] ss:$16 sps:$4 sm:$0xff]  }
 0x159   :  { %4562 = vmatprep.subr.bf16.mxu1 %v6503_v11  ;;  %v6566_v11 = vld [vmem:[%s9382_s1 + $0x4ec] ss:$16 sps:$4 sm:$0xff]   ;;  %v6561_v12 = vld [vmem:[%s9382_s1 + $0x328] ss:$16 sps:$4 sm:$0xff]  }
 0x15b   :  { %4600 = vmatpush1.bf16.msra.mxu0 %v6504_v16  ;;  %v6569_v16 = vld [vmem:[%s9382_s1 + $0x30c] ss:$16 sps:$4 sm:$0xff]  }
 0x15c   :  { %4563 = vmatpush1.bf16.msra.mxu1 %v6501_v14  ;;  %4601 = vmatprep.subr.bf16.mxu0 %v6512_v21  ;;  %v6564_v14 = vld [vmem:[%s9382_s1 + $0x4e8] ss:$16 sps:$4 sm:$0xff]  }
 0x15d   :  { %4564 = vmatprep.subr.bf16.mxu1 %v6509_v20  ;;  %v6572_v20 = vld [vmem:[%s9382_s1 + $0x4cc] ss:$16 sps:$4 sm:$0xff]   ;;  %v6567_v21 = vld [vmem:[%s9382_s1 + $0x308] ss:$16 sps:$4 sm:$0xff]  }
 0x15f   :  { %4602 = vmatpush1.bf16.msra.mxu0 %v6510_v22 }
 0x160   :  { %4565 = vmatpush1.bf16.msra.mxu1 %v6507_v5  ;;  %4603 = vmatprep.subr.bf16.mxu0 %v6518_v27  ;;  %v6570_v5 = vld [vmem:[%s9382_s1 + $0x4c8] ss:$16 sps:$4 sm:$0xff]  }
 0x161   :  { %4566 = vmatprep.subr.bf16.mxu1 %v6515_v24 }
 0x163   :  { %4604 = vmatpush1.bf16.msra.mxu0 %v6516_v30 }
 0x164   :  { %4567 = vmatpush2.bf16.msra.mxu1 %v6513_v29  ;;  %4605 = vmatprep.subr.bf16.mxu0 %v6524_v31  ;;  %v6578_v31 = vld [vmem:[%s9382_s1 + $0x6ec] ss:$16 sps:$4 sm:$0xff]  }
 0x165   :  { %4568 = vmatprep.subr.bf16.mxu1 %v6521_v2  ;;  %v6575_v2 = vld [vmem:[%s9382_s1 + $0x4ac] ss:$16 sps:$4 sm:$0xff]  }
 0x167   :  { %4606 = vmatpush1.bf16.msra.mxu0 %v6522_v36 }
 0x168   :  { %4569 = vmatpush2.bf16.msra.mxu1 %v6519_v33  ;;  %4607 = vmatprep.subr.bf16.mxu0 %v6530_v38 }
 0x169   :  { %4570 = vmatprep.subr.bf16.mxu1 %v6527_v37 }
 0x16b   :  { %4608 = vmatpush2.bf16.msra.mxu0 %v6528_v40 }
 0x16c   :  { %4571 = vmatpush2.bf16.msra.mxu1 %v6525_v32  ;;  %4609 = vmatprep.subr.bf16.mxu0 %v6536_v45 }
 0x16d   :  { %4572 = vmatprep.subr.bf16.mxu1 %v6533_v44 }
 0x16f   :  { %4610 = vmatpush2.bf16.msra.mxu0 %v6534_v48 }
 0x170   :  { %4573 = vmatpush2.bf16.msra.mxu1 %v6531_v47  ;;  %4611 = vmatprep.subr.bf16.mxu0 %v6542_v52 }
 0x171   :  { %4574 = vmatprep.subr.bf16.mxu1 %v6539_v51 }
 0x173   :  { %4612 = vmatpush2.bf16.msra.mxu0 %v6540_v57 }
 0x174   :  { %4575 = vmatpush2.bf16.msra.mxu1 %v6537_v53  ;;  %4613 = vmatprep.subr.bf16.mxu0 %v6548_v61 }
 0x175   :  { %4576 = vmatprep.subr.bf16.mxu1 %v6545_v58 }
 0x177   :  { %4614 = vmatpush2.bf16.msra.mxu0 %v6546_v49 }
 0x178   :  { %4577 = vmatpush2.bf16.msra.mxu1 %v6543_v60  ;;  %4615 = vmatprep.subr.bf16.mxu0 %v6554_v63 }
 0x179   :  { %4578 = vmatprep.subr.bf16.mxu1 %v6551_v62 }
 0x17b   :  { %4616 = vmatpush2.bf16.msra.mxu0 %v6552_v3 }
 0x17c   :  { %4579 = vmatpush2.bf16.msra.mxu1 %v6549_v1  ;;  %4617 = vmatprep.subr.bf16.mxu0 %v6560_v8 }
 0x17d   :  { %4580 = vmatprep.subr.bf16.mxu1 %v6557_v4 }
 0x17f   :  { %4618 = vmatpush2.bf16.msra.mxu0 %v6558_v9 }
 0x180   :  { %4581 = vmatpush2.bf16.msra.mxu1 %v6555_v0  ;;  %4619 = vmatprep.subr.bf16.mxu0 %v6563_v10 }
 0x181   :  { %4632 = vmatprep.subr.bf16.mxu1 %v6566_v11 }
 0x182   :  { %v4297_v22 = vpop.f32.mrf.mxu0 }
 0x183   :  { %v4338_v24 = vpop.f32.mrf.mxu1  ;;  %4583 = vmatmul.mubr.bf16.vlgmr.msra.gmra.mxu1 %v7227_v13  ;;  %v4298_v27 = vadd.f32 %v4297_v22, %v8156_v46  ;;  %4620 = vmatpush2.bf16.msra.mxu0 %v6561_v12 }
 0x184   :  { %4633 = vmatpush1.bf16.msra.mxu1 %v6564_v14  ;;  %v4299_v29 = vpop.f32.mrf.mxu0  ;;  %4621 = vmatprep.subr.bf16.mxu0 %v6569_v16 }
 0x185   :  { %v4340_v30 = vpop.f32.mrf.mxu1  ;;  %4634 = vmatprep.subr.bf16.mxu1 %v6572_v20  ;;  %v8363_v33 = vadd.f32 %v4338_v24, %v4298_v27  ;;  %v4300_v13 = vadd.f32 %v4299_v29, %v8170_v56  ;;  %4664 = vmatprep.mubr.bf16.mxu1 %v7239_v17 }
 0x186   :  { %10 = vsyncpa [#allocation3], 0  ;;  %v4301_v46 = vpop.f32.mrf.mxu0  ;;  %v6573_v38 = vld [vmem:[%s9382_s1 + $0x4a8] ss:$16 sps:$4 sm:$0xff]   ;;  %v6581_v17 = vld [vmem:[%s9382_s1 + $0x48c] ss:$16 sps:$4 sm:$0xff]  }
 0x187   :  { %v4342_v36 = vpop.f32.mrf.mxu1  ;;  %v8367_v37 = vadd.f32 %v4340_v30, %v4300_v13  ;;  %4622 = vmatpush2.bf16.msra.mxu0 %v6567_v21  ;;  %v6576_v32 = vld [vmem:[%s9382_s1 + $0x6e8] ss:$16 sps:$4 sm:$0xff]   ;;  %v6584_v56 = vld [vmem:[%s9382_s1 + $0x6cc] ss:$16 sps:$4 sm:$0xff]   ;;  %vm5214_vm1 = vcmask 40960   ;;  %s6983_s29 = smov [#allocation2]  }
 0x188   :  { %4635 = vmatpush1.bf16.msra.mxu1 %v6570_v5  ;;  %v4302_v40 = vpop.f32.mrf.mxu0  ;;  %4673 = vmatprep.subr.bf16.mxu0 %v6578_v31  ;;  %v6579_v45 = vld [vmem:[%s9382_s1 + $0x488] ss:$16 sps:$4 sm:$0xff]   ;;  %v6587_v48 = vld [vmem:[%s9382_s1 + $0x46c] ss:$16 sps:$4 sm:$0xff]   ;;  %s5246_s30 = sshll.u32 %s6983_s29, 4  ;;  %s5247_s30 = int_to_ptr.vmem [resolvable:$true] %s5246_s30 }
 0x189   :  { %v4343_v44 = vpop.f32.mrf.mxu1  ;;  %4636 = vmatprep.subr.bf16.mxu1 %v6575_v2  ;;  %v6582_v47 = vld [vmem:[%s9382_s1 + $0x6c8] ss:$16 sps:$4 sm:$0xff]   ;;  %v6593_v53 = vld [vmem:[%s9382_s1 + $0x44c] ss:$16 sps:$4 sm:$0xff]   ;;  %s6958_s6 = scalar_lea.vmem %s5247_s30, 16  ;;  %s6962_s7 = scalar_lea.vmem %s5247_s30, 32 }
 0x18a   :  { %4624 = vmatmul.mubr.bf16.vlgmr.msra.gmra.mxu0 %v7243_v18  ;;  %v6590_v18 = vld [vmem:[%s9382_s1 + $0x6ac] ss:$16 sps:$4 sm:$0xff]   ;;  %v6585_v51 = vld [vmem:[%s9382_s1 + $0x468] ss:$16 sps:$4 sm:$0xff]   ;;  %p6959_p0 = scmp.ne.s32.totalorder %s5247_s30, %s6958_s6  ;;  %p6963_p1 = scmp.lt.s32.totalorder %s5247_s30, %s5247_s30 }
 0x18b   :  { %4674 = vmatpush1.bf16.msra.mxu0 %v6576_v32  ;;  %4705 = vmatprep.mubr.bf16.mxu0 %v7259_v23  ;;  %v6588_v52 = vld [vmem:[%s9382_s1 + $0x6a8] ss:$16 sps:$4 sm:$0xff]   ;;  %v6596_v23 = vld [vmem:[%s9382_s1 + $0x68c] ss:$16 sps:$4 sm:$0xff]   ;;  %p6964_p2 = scmp.lt.s32.totalorder %s6962_s7, %s6958_s6 }
 0x18c   :  { %4637 = vmatpush1.bf16.msra.mxu1 %v6573_v38  ;;  %4675 = vmatprep.subr.bf16.mxu0 %v6584_v56  ;;  %v6591_v57 = vld [vmem:[%s9382_s1 + $0x448] ss:$16 sps:$4 sm:$0xff]   ;;  %v6599_v61 = vld [vmem:[%s9382_s1 + $0x42c] ss:$16 sps:$4 sm:$0xff]  }
 0x18d   :  { %4638 = vmatprep.subr.bf16.mxu1 %v6581_v17  ;;  %v6594_v58 = vld [vmem:[%s9382_s1 + $0x688] ss:$16 sps:$4 sm:$0xff]   ;;  %v6602_v60 = vld [vmem:[%s9382_s1 + $0x66c] ss:$16 sps:$4 sm:$0xff]   ;;  %p6965_p3 = por %p6964_p2, %p6963_p1 }
 0x18e   :  { %v6597_v49 = vld [vmem:[%s9382_s1 + $0x428] ss:$16 sps:$4 sm:$0xff]   ;;  %v6605_v63 = vld [vmem:[%s9382_s1 + $0x40c] ss:$16 sps:$4 sm:$0xff]  }
 0x18f   :  { %4676 = vmatpush1.bf16.msra.mxu0 %v6582_v47  ;;  %v6600_v62 = vld [vmem:[%s9382_s1 + $0x668] ss:$16 sps:$4 sm:$0xff]   ;;  %v6608_v1 = vld [vmem:[%s9382_s1 + $0x64c] ss:$16 sps:$4 sm:$0xff]   ;;  %p6966_p4 = pnand %p6965_p3, %p6959_p0 }
 0x190   :  { %4639 = vmatpush1.bf16.msra.mxu1 %v6579_v45  ;;  %4677 = vmatprep.subr.bf16.mxu0 %v6590_v18  ;;  %v6603_v3 = vld [vmem:[%s9382_s1 + $0x408] ss:$16 sps:$4 sm:$0xff]   ;;  %v6611_v8 = vld [vmem:[%s9382_s1 + $0x5ec] ss:$16 sps:$4 sm:$0xff]  }
 0x191   :  { %4640 = vmatprep.subr.bf16.mxu1 %v6587_v48  ;;  %v6606_v4 = vld [vmem:[%s9382_s1 + $0x648] ss:$16 sps:$4 sm:$0xff]   ;;  %v6614_v0 = vld [vmem:[%s9382_s1 + $0x62c] ss:$16 sps:$4 sm:$0xff]  }
 0x192   :  { %v6609_v9 = vld [vmem:[%s9382_s1 + $0x5e8] ss:$16 sps:$4 sm:$0xff]   ;;  %v6617_v11 = vld [vmem:[%s9382_s1 + $0x5cc] ss:$16 sps:$4 sm:$0xff]  }
 0x193   :  { %4678 = vmatpush1.bf16.msra.mxu0 %v6588_v52  ;;  %v6612_v10 = vld [vmem:[%s9382_s1 + $0x628] ss:$16 sps:$4 sm:$0xff]   ;;  %v6620_v12 = vld [vmem:[%s9382_s1 + $0x60c] ss:$16 sps:$4 sm:$0xff]  }
 0x194   :  { %4641 = vmatpush1.bf16.msra.mxu1 %v6585_v51  ;;  %4679 = vmatprep.subr.bf16.mxu0 %v6596_v23  ;;  %v6615_v14 = vld [vmem:[%s9382_s1 + $0x5c8] ss:$16 sps:$4 sm:$0xff]   ;;  %v6623_v20 = vld [vmem:[%s9382_s1 + $0x5ac] ss:$16 sps:$4 sm:$0xff]  }
 0x195   :  { %4642 = vmatprep.subr.bf16.mxu1 %v6593_v53  ;;  %v6618_v16 = vld [vmem:[%s9382_s1 + $0x608] ss:$16 sps:$4 sm:$0xff]   ;;  %v6626_v21 = vld [vmem:[%s9382_s1 + $0x7ec] ss:$16 sps:$4 sm:$0xff]  }
 0x196   :  { %v6621_v5 = vld [vmem:[%s9382_s1 + $0x5a8] ss:$16 sps:$4 sm:$0xff]   ;;  %v6629_v24 = vld [vmem:[%s9382_s1 + $0x58c] ss:$16 sps:$4 sm:$0xff]  }
 0x197   :  { %4680 = vmatpush1.bf16.msra.mxu0 %v6594_v58  ;;  %v6624_v22 = vld [vmem:[%s9382_s1 + $0x7e8] ss:$16 sps:$4 sm:$0xff]   ;;  %v6632_v27 = vld [vmem:[%s9382_s1 + $0x7cc] ss:$16 sps:$4 sm:$0xff]  }
 0x198   :  { %4643 = vmatpush1.bf16.msra.mxu1 %v6591_v57  ;;  %4681 = vmatprep.subr.bf16.mxu0 %v6602_v60  ;;  %v6627_v29 = vld [vmem:[%s9382_s1 + $0x588] ss:$16 sps:$4 sm:$0xff]   ;;  %v6635_v2 = vld [vmem:[%s9382_s1 + $0x56c] ss:$16 sps:$4 sm:$0xff]  }
 0x199   :  { %4644 = vmatprep.subr.bf16.mxu1 %v6599_v61  ;;  %v6630_v30 = vld [vmem:[%s9382_s1 + $0x7c8] ss:$16 sps:$4 sm:$0xff]   ;;  %v6638_v31 = vld [vmem:[%s9382_s1 + $0x7ac] ss:$16 sps:$4 sm:$0xff]  }
 0x19a   :  { %v6633_v13 = vld [vmem:[%s9382_s1 + $0x568] ss:$16 sps:$4 sm:$0xff]   ;;  %v6641_v36 = vld [vmem:[%s9382_s1 + $0x54c] ss:$16 sps:$4 sm:$0xff]  }
 0x19b   :  { %4682 = vmatpush1.bf16.msra.mxu0 %v6600_v62  ;;  %v6636_v46 = vld [vmem:[%s9382_s1 + $0x7a8] ss:$16 sps:$4 sm:$0xff]   ;;  %v6644_v38 = vld [vmem:[%s9382_s1 + $0x78c] ss:$16 sps:$4 sm:$0xff]  }
 0x19c   :  { %4645 = vmatpush1.bf16.msra.mxu1 %v6597_v49  ;;  %4683 = vmatprep.subr.bf16.mxu0 %v6608_v1  ;;  %v6639_v32 = vld [vmem:[%s9382_s1 + $0x548] ss:$16 sps:$4 sm:$0xff]   ;;  %v6647_v44 = vld [vmem:[%s9382_s1 + $0x52c] ss:$16 sps:$4 sm:$0xff]  }
 0x19d   :  { %4646 = vmatprep.subr.bf16.mxu1 %v6605_v63  ;;  %v6642_v40 = vld [vmem:[%s9382_s1 + $0x788] ss:$16 sps:$4 sm:$0xff]   ;;  %v6650_v17 = vld [vmem:[%s9382_s1 + $0x76c] ss:$16 sps:$4 sm:$0xff]  }
 0x19e   :  { %v6645_v56 = vld [vmem:[%s9382_s1 + $0x528] ss:$16 sps:$4 sm:$0xff]   ;;  %v6653_v47 = vld [vmem:[%s9382_s1 + $0x50c] ss:$16 sps:$4 sm:$0xff]  }
 0x19f   :  { %4684 = vmatpush1.bf16.msra.mxu0 %v6606_v4  ;;  %v6648_v45 = vld [vmem:[%s9382_s1 + $0x768] ss:$16 sps:$4 sm:$0xff]   ;;  %v6656_v48 = vld [vmem:[%s9382_s1 + $0x74c] ss:$16 sps:$4 sm:$0xff]  }
 0x1a0   :  { %4647 = vmatpush1.bf16.msra.mxu1 %v6603_v3  ;;  %4685 = vmatprep.subr.bf16.mxu0 %v6614_v0  ;;  %v6651_v18 = vld [vmem:[%s9382_s1 + $0x508] ss:$16 sps:$4 sm:$0xff]   ;;  %v6659_v52 = vld [vmem:[%s9382_s1 + $0x72c] ss:$16 sps:$4 sm:$0xff]  }
 0x1a1   :  { %4648 = vmatprep.subr.bf16.mxu1 %v6611_v8  ;;  %v6654_v51 = vld [vmem:[%s9382_s1 + $0x748] ss:$16 sps:$4 sm:$0xff]   ;;  %v6662_v53 = vld [vmem:[%s9382_s1 + $0x8ec] ss:$16 sps:$4 sm:$0xff]  }
 0x1a2   :  { %v6657_v23 = vld [vmem:[%s9382_s1 + $0x728] ss:$16 sps:$4 sm:$0xff]   ;;  %v6665_v58 = vld [vmem:[%s9382_s1 + $0x70c] ss:$16 sps:$4 sm:$0xff]  }
 0x1a3   :  { %4686 = vmatpush1.bf16.msra.mxu0 %v6612_v10  ;;  %v6660_v57 = vld [vmem:[%s9382_s1 + $0x8e8] ss:$16 sps:$4 sm:$0xff]   ;;  %v6668_v61 = vld [vmem:[%s9382_s1 + $0x8cc] ss:$16 sps:$4 sm:$0xff]  }
 0x1a4   :  { %4649 = vmatpush2.bf16.msra.mxu1 %v6609_v9  ;;  %4687 = vmatprep.subr.bf16.mxu0 %v6620_v12  ;;  %v6663_v63 = vld [vmem:[%s9382_s1 + $0x708] ss:$16 sps:$4 sm:$0xff]  }
 0x1a5   :  { %4650 = vmatprep.subr.bf16.mxu1 %v6617_v11  ;;  %v6666_v1 = vld [vmem:[%s9382_s1 + $0x8c8] ss:$16 sps:$4 sm:$0xff]  }
 0x1a6   :  { %v6669_v12 = vld [vmem:[%s9382_s1 + $0x8a8] ss:$16 sps:$4 sm:$0xff]  }
 0x1a7   :  { %4688 = vmatpush1.bf16.msra.mxu0 %v6618_v16 }
 0x1a8   :  { %4651 = vmatpush2.bf16.msra.mxu1 %v6615_v14  ;;  %4689 = vmatprep.subr.bf16.mxu0 %v6626_v21  ;;  %v6672_v14 = vld [vmem:[%s9382_s1 + $0xae8] ss:$16 sps:$4 sm:$0xff]  }
 0x1a9   :  { %4652 = vmatprep.subr.bf16.mxu1 %v6623_v20  ;;  %v6675_v21 = vld [vmem:[%s9382_s1 + $0x888] ss:$16 sps:$4 sm:$0xff]  }
 0x1ab   :  { %4690 = vmatpush2.bf16.msra.mxu0 %v6624_v22  ;;  %v6683_v22 = vld [vmem:[%s9382_s1 + $0x86c] ss:$16 sps:$4 sm:$0xff]  }
 0x1ac   :  { %4653 = vmatpush2.bf16.msra.mxu1 %v6621_v5  ;;  %4691 = vmatprep.subr.bf16.mxu0 %v6632_v27  ;;  %v6678_v5 = vld [vmem:[%s9382_s1 + $0xac8] ss:$16 sps:$4 sm:$0xff]  }
 0x1ad   :  { %4654 = vmatprep.subr.bf16.mxu1 %v6629_v24  ;;  %v6681_v24 = vld [vmem:[%s9382_s1 + $0x868] ss:$16 sps:$4 sm:$0xff]  }
 0x1ae   :  { %v6684_v27 = vld [vmem:[%s9382_s1 + $0xaa8] ss:$16 sps:$4 sm:$0xff]  }
 0x1af   :  { %4692 = vmatpush2.bf16.msra.mxu0 %v6630_v30  ;;  %v6687_v30 = vld [vmem:[%s9382_s1 + $0x848] ss:$16 sps:$4 sm:$0xff]  }
 0x1b0   :  { %4655 = vmatpush2.bf16.msra.mxu1 %v6627_v29  ;;  %4693 = vmatprep.subr.bf16.mxu0 %v6638_v31  ;;  %v6689_v29 = vld [vmem:[%s9382_s1 + $0x84c] ss:$16 sps:$4 sm:$0xff]  }
 0x1b1   :  { %4656 = vmatprep.subr.bf16.mxu1 %v6635_v2  ;;  %v6690_v2 = vld [vmem:[%s9382_s1 + $0xa88] ss:$16 sps:$4 sm:$0xff]   ;;  %v6695_v31 = vld [vmem:[%s9382_s1 + $0x82c] ss:$16 sps:$4 sm:$0xff]  }
 0x1b3   :  { %4694 = vmatpush2.bf16.msra.mxu0 %v6636_v46  ;;  %v6693_v46 = vld [vmem:[%s9382_s1 + $0x828] ss:$16 sps:$4 sm:$0xff]  }
 0x1b4   :  { %4657 = vmatpush2.bf16.msra.mxu1 %v6633_v13  ;;  %4695 = vmatprep.subr.bf16.mxu0 %v6644_v38  ;;  %v6698_v13 = vld [vmem:[%s9382_s1 + $0xa6c] ss:$16 sps:$4 sm:$0xff]  }
 0x1b5   :  { %4658 = vmatprep.subr.bf16.mxu1 %v6641_v36  ;;  %v6696_v36 = vld [vmem:[%s9382_s1 + $0xa68] ss:$16 sps:$4 sm:$0xff]   ;;  %v6701_v38 = vld [vmem:[%s9382_s1 + $0x80c] ss:$16 sps:$4 sm:$0xff]  }
 0x1b7   :  { %4696 = vmatpush2.bf16.msra.mxu0 %v6642_v40  ;;  %v6699_v40 = vld [vmem:[%s9382_s1 + $0x808] ss:$16 sps:$4 sm:$0xff]  }
 0x1b8   :  { %4659 = vmatpush2.bf16.msra.mxu1 %v6639_v32  ;;  %4697 = vmatprep.subr.bf16.mxu0 %v6650_v17  ;;  %v6704_v32 = vld [vmem:[%s9382_s1 + $0xa4c] ss:$16 sps:$4 sm:$0xff]  }
 0x1b9   :  { %4660 = vmatprep.subr.bf16.mxu1 %v6647_v44  ;;  %v6702_v44 = vld [vmem:[%s9382_s1 + $0xa48] ss:$16 sps:$4 sm:$0xff]   ;;  %v6707_v17 = vld [vmem:[%s9382_s1 + $0x9ec] ss:$16 sps:$4 sm:$0xff]  }
 0x1bb   :  { %4698 = vmatpush2.bf16.msra.mxu0 %v6648_v45  ;;  %v6705_v45 = vld [vmem:[%s9382_s1 + $0x9e8] ss:$16 sps:$4 sm:$0xff]  }
 0x1bc   :  { %4661 = vmatpush2.bf16.msra.mxu1 %v6645_v56  ;;  %4699 = vmatprep.subr.bf16.mxu0 %v6656_v48  ;;  %v6710_v56 = vld [vmem:[%s9382_s1 + $0xa2c] ss:$16 sps:$4 sm:$0xff]  }
 0x1bd   :  { %4662 = vmatprep.subr.bf16.mxu1 %v6653_v47  ;;  %v6708_v47 = vld [vmem:[%s9382_s1 + $0xa28] ss:$16 sps:$4 sm:$0xff]   ;;  %v6713_v48 = vld [vmem:[%s9382_s1 + $0x9cc] ss:$16 sps:$4 sm:$0xff]  }
 0x1bf   :  { %4700 = vmatpush2.bf16.msra.mxu0 %v6654_v51  ;;  %v6711_v51 = vld [vmem:[%s9382_s1 + $0x9c8] ss:$16 sps:$4 sm:$0xff]  }
 0x1c0   :  { %4663 = vmatpush2.bf16.msra.mxu1 %v6651_v18  ;;  %4701 = vmatprep.subr.bf16.mxu0 %v6659_v52  ;;  %v6716_v18 = vld [vmem:[%s9382_s1 + $0xa0c] ss:$16 sps:$4 sm:$0xff]   ;;  %v6714_v52 = vld [vmem:[%s9382_s1 + $0xa08] ss:$16 sps:$4 sm:$0xff]  }
 0x1c1   :  { %4714 = vmatprep.subr.bf16.mxu1 %v6662_v53  ;;  %v6719_v53 = vld [vmem:[%s9382_s1 + $0x9ac] ss:$16 sps:$4 sm:$0xff]  }
 0x1c2   :  { %v4379_v60 = vpop.f32.mrf.mxu0 }
 0x1c3   :  { %v4420_v49 = vpop.f32.mrf.mxu1  ;;  %4665 = vmatmul.mubr.bf16.vlgmr.msra.gmra.mxu1 %v7438_v26  ;;  %v4380_v62 = vadd.f32 %v4379_v60, %v8363_v33  ;;  %4702 = vmatpush2.bf16.msra.mxu0 %v6657_v23  ;;  %v6671_v26 = vld [vmem:[%s9382_s1 + $0x8ac] ss:$16 sps:$4 sm:$0xff]  }
 0x1c4   :  { %4715 = vmatpush1.bf16.msra.mxu1 %v6660_v57  ;;  %v4381_v3 = vpop.f32.mrf.mxu0  ;;  %4703 = vmatprep.subr.bf16.mxu0 %v6665_v58  ;;  %v6674_v33 = vld [vmem:[%s9382_s1 + $0xaec] ss:$16 sps:$4 sm:$0xff]   ;;  %v6717_v57 = vld [vmem:[%s9382_s1 + $0x9a8] ss:$16 sps:$4 sm:$0xff]  }
 0x1c5   :  { %v4422_v4 = vpop.f32.mrf.mxu1  ;;  %4716 = vmatprep.subr.bf16.mxu1 %v6668_v61  ;;  %v8565_v8 = vadd.f32 %v4420_v49, %v4380_v62  ;;  %v4382_v0 = vadd.f32 %v4381_v3, %v8367_v37  ;;  %4746 = vmatprep.mubr.bf16.mxu1 %v7491_v41  ;;  %v6677_v41 = vld [vmem:[%s9382_s1 + $0x88c] ss:$16 sps:$4 sm:$0xff]   ;;  %v6720_v58 = vld [vmem:[%s9382_s1 + $0xbe8] ss:$16 sps:$4 sm:$0xff]  }
 0x1c6   :  { %v4383_v9 = vpop.f32.mrf.mxu0  ;;  %v6680_v37 = vld [vmem:[%s9382_s1 + $0xacc] ss:$16 sps:$4 sm:$0xff]   ;;  %v6723_v49 = vld [vmem:[%s9382_s1 + $0x988] ss:$16 sps:$4 sm:$0xff]  }
 0x1c7   :  { %v4424_v10 = vpop.f32.mrf.mxu1  ;;  %v8569_v11 = vadd.f32 %v4422_v4, %v4382_v0  ;;  %4704 = vmatpush2.bf16.msra.mxu0 %v6663_v63  ;;  %v6722_v23 = vld [vmem:[%s9382_s1 + $0xbec] ss:$16 sps:$4 sm:$0xff]   ;;  %v6726_v62 = vld [vmem:[%s9382_s1 + $0xbc8] ss:$16 sps:$4 sm:$0xff]  }
 0x1c8   :  { %4717 = vmatpush1.bf16.msra.mxu1 %v6666_v1  ;;  %v4384_v16 = vpop.f32.mrf.mxu0  ;;  %4755 = vmatprep.subr.bf16.mxu0 %v6674_v33  ;;  %v6725_v61 = vld [vmem:[%s9382_s1 + $0x98c] ss:$16 sps:$4 sm:$0xff]   ;;  %v6729_v3 = vld [vmem:[%s9382_s1 + $0x968] ss:$16 sps:$4 sm:$0xff]  }
 0x1c9   :  { %v4425_v20 = vpop.f32.mrf.mxu1  ;;  %4718 = vmatprep.subr.bf16.mxu1 %v6671_v26  ;;  %v6728_v60 = vld [vmem:[%s9382_s1 + $0xbcc] ss:$16 sps:$4 sm:$0xff]   ;;  %v6732_v4 = vld [vmem:[%s9382_s1 + $0xba8] ss:$16 sps:$4 sm:$0xff]  }
 0x1ca   :  { %4706 = vmatmul.mubr.bf16.vlgmr.msra.gmra.mxu0 %v7451_v6  ;;  %v6686_v6 = vld [vmem:[%s9382_s1 + $0xaac] ss:$16 sps:$4 sm:$0xff]   ;;  %v6735_v0 = vld [vmem:[%s9382_s1 + $0x948] ss:$16 sps:$4 sm:$0xff]  }
 0x1cb   :  { %4756 = vmatpush1.bf16.msra.mxu0 %v6672_v14  ;;  %4787 = vmatprep.mubr.bf16.mxu0 %v7496_v42  ;;  %v6692_v42 = vld [vmem:[%s9382_s1 + $0xa8c] ss:$16 sps:$4 sm:$0xff]   ;;  %v6738_v9 = vld [vmem:[%s9382_s1 + $0xb88] ss:$16 sps:$4 sm:$0xff]  }
 0x1cc   :  { %4719 = vmatpush1.bf16.msra.mxu1 %v6669_v12  ;;  %4757 = vmatprep.subr.bf16.mxu0 %v6680_v37  ;;  %v6731_v63 = vld [vmem:[%s9382_s1 + $0x96c] ss:$16 sps:$4 sm:$0xff]   ;;  %v6741_v14 = vld [vmem:[%s9382_s1 + $0x928] ss:$16 sps:$4 sm:$0xff]  }
 0x1cd   :  { %4720 = vmatprep.subr.bf16.mxu1 %v6677_v41  ;;  %v6734_v1 = vld [vmem:[%s9382_s1 + $0xbac] ss:$16 sps:$4 sm:$0xff]   ;;  %v6744_v16 = vld [vmem:[%s9382_s1 + $0xb68] ss:$16 sps:$4 sm:$0xff]  }
 0x1ce   :  { %v6737_v26 = vld [vmem:[%s9382_s1 + $0x94c] ss:$16 sps:$4 sm:$0xff]   ;;  %v6747_v37 = vld [vmem:[%s9382_s1 + $0x908] ss:$16 sps:$4 sm:$0xff]  }
 0x1cf   :  { %4758 = vmatpush1.bf16.msra.mxu0 %v6678_v5  ;;  %v6740_v33 = vld [vmem:[%s9382_s1 + $0xb8c] ss:$16 sps:$4 sm:$0xff]  }
 0x1d0   :  { %4721 = vmatpush1.bf16.msra.mxu1 %v6675_v21  ;;  %4759 = vmatprep.subr.bf16.mxu0 %v6686_v6  ;;  %v6743_v10 = vld [vmem:[%s9382_s1 + $0x92c] ss:$16 sps:$4 sm:$0xff]   ;;  %v6750_v21 = vld [vmem:[%s9382_s1 + $0xb48] ss:$16 sps:$4 sm:$0xff]  }
 0x1d1   :  { %4722 = vmatprep.subr.bf16.mxu1 %v6683_v22  ;;  %v6746_v12 = vld [vmem:[%s9382_s1 + $0xb6c] ss:$16 sps:$4 sm:$0xff]   ;;  %v6753_v6 = vld [vmem:[%s9382_s1 + $0xb28] ss:$16 sps:$4 sm:$0xff]  }
 0x1d2   :  { %v6749_v20 = vld [vmem:[%s9382_s1 + $0x90c] ss:$16 sps:$4 sm:$0xff]  }
 0x1d3   :  { %4760 = vmatpush1.bf16.msra.mxu0 %v6684_v27  ;;  %v6752_v41 = vld [vmem:[%s9382_s1 + $0xb4c] ss:$16 sps:$4 sm:$0xff]  }
 0x1d4   :  { %4723 = vmatpush1.bf16.msra.mxu1 %v6681_v24  ;;  %4761 = vmatprep.subr.bf16.mxu0 %v6692_v42  ;;  %v6755_v5 = vld [vmem:[%s9382_s1 + $0xb2c] ss:$16 sps:$4 sm:$0xff]   ;;  %v6756_v24 = vld [vmem:[%s9382_s1 + $0xce8] ss:$16 sps:$4 sm:$0xff]  }
 0x1d5   :  { %4724 = vmatprep.subr.bf16.mxu1 %v6689_v29  ;;  %v6758_v22 = vld [vmem:[%s9382_s1 + $0xcec] ss:$16 sps:$4 sm:$0xff]  }
 0x1d6   :  { %v6761_v27 = vld [vmem:[%s9382_s1 + $0xb0c] ss:$16 sps:$4 sm:$0xff]  }
 0x1d7   :  { %4762 = vmatpush1.bf16.msra.mxu0 %v6690_v2  ;;  %v6764_v29 = vld [vmem:[%s9382_s1 + $0xccc] ss:$16 sps:$4 sm:$0xff]  }
 0x1d8   :  { %4725 = vmatpush1.bf16.msra.mxu1 %v6687_v30  ;;  %4763 = vmatprep.subr.bf16.mxu0 %v6698_v13  ;;  %v6762_v13 = vld [vmem:[%s9382_s1 + $0xcc8] ss:$16 sps:$4 sm:$0xff]  }
 0x1d9   :  { %4726 = vmatprep.subr.bf16.mxu1 %v6695_v31  ;;  %v6759_v31 = vld [vmem:[%s9382_s1 + $0xb08] ss:$16 sps:$4 sm:$0xff]  }
 0x1db   :  { %4764 = vmatpush1.bf16.msra.mxu0 %v6696_v36 }
 0x1dc   :  { %4727 = vmatpush1.bf16.msra.mxu1 %v6693_v46  ;;  %4765 = vmatprep.subr.bf16.mxu0 %v6704_v32 }
 0x1dd   :  { %4728 = vmatprep.subr.bf16.mxu1 %v6701_v38 }
 0x1df   :  { %4766 = vmatpush1.bf16.msra.mxu0 %v6702_v44 }
 0x1e0   :  { %4729 = vmatpush1.bf16.msra.mxu1 %v6699_v40  ;;  %4767 = vmatprep.subr.bf16.mxu0 %v6710_v56  ;;  %v6765_v56 = vld [vmem:[%s9382_s1 + $0xca8] ss:$16 sps:$4 sm:$0xff]  }
 0x1e1   :  { %4730 = vmatprep.subr.bf16.mxu1 %v6707_v17 }
 0x1e3   :  { %4768 = vmatpush1.bf16.msra.mxu0 %v6708_v47 }
 0x1e4   :  { %4731 = vmatpush2.bf16.msra.mxu1 %v6705_v45  ;;  %4769 = vmatprep.subr.bf16.mxu0 %v6716_v18  ;;  %v6768_v45 = vld [vmem:[%s9382_s1 + $0xee8] ss:$16 sps:$4 sm:$0xff]  }
 0x1e5   :  { %4732 = vmatprep.subr.bf16.mxu1 %v6713_v48 }
 0x1e7   :  { %4770 = vmatpush1.bf16.msra.mxu0 %v6714_v52  ;;  %v6771_v52 = vld [vmem:[%s9382_s1 + $0xc88] ss:$16 sps:$4 sm:$0xff]  }
 0x1e8   :  { %4733 = vmatpush2.bf16.msra.mxu1 %v6711_v51  ;;  %4771 = vmatprep.subr.bf16.mxu0 %v6722_v23 }
 0x1e9   :  { %4734 = vmatprep.subr.bf16.mxu1 %v6719_v53  ;;  %v6774_v53 = vld [vmem:[%s9382_s1 + $0xec8] ss:$16 sps:$4 sm:$0xff]  }
 0x1eb   :  { %4772 = vmatpush2.bf16.msra.mxu0 %v6720_v58 }
 0x1ec   :  { %4735 = vmatpush2.bf16.msra.mxu1 %v6717_v57  ;;  %4773 = vmatprep.subr.bf16.mxu0 %v6728_v60  ;;  %v6779_v57 = vld [vmem:[%s9382_s1 + $0xc6c] ss:$16 sps:$4 sm:$0xff]   ;;  %v6777_v60 = vld [vmem:[%s9382_s1 + $0xc68] ss:$16 sps:$4 sm:$0xff]  }
 0x1ed   :  { %4736 = vmatprep.subr.bf16.mxu1 %v6725_v61 }
 0x1ef   :  { %4774 = vmatpush2.bf16.msra.mxu0 %v6726_v62 }
 0x1f0   :  { %4737 = vmatpush2.bf16.msra.mxu1 %v6723_v49  ;;  %4775 = vmatprep.subr.bf16.mxu0 %v6734_v1  ;;  %v6780_v49 = vld [vmem:[%s9382_s1 + $0xea8] ss:$16 sps:$4 sm:$0xff]  }
 0x1f1   :  { %4738 = vmatprep.subr.bf16.mxu1 %v6731_v63  ;;  %v6785_v63 = vld [vmem:[%s9382_s1 + $0xc4c] ss:$16 sps:$4 sm:$0xff]   ;;  %v6783_v1 = vld [vmem:[%s9382_s1 + $0xc48] ss:$16 sps:$4 sm:$0xff]  }
 0x1f3   :  { %4776 = vmatpush2.bf16.msra.mxu0 %v6732_v4  ;;  %v6791_v4 = vld [vmem:[%s9382_s1 + $0xc2c] ss:$16 sps:$4 sm:$0xff]  }
 0x1f4   :  { %4739 = vmatpush2.bf16.msra.mxu1 %v6729_v3  ;;  %4777 = vmatprep.subr.bf16.mxu0 %v6740_v33  ;;  %v6786_v3 = vld [vmem:[%s9382_s1 + $0xe88] ss:$16 sps:$4 sm:$0xff]  }
 0x1f5   :  { %4740 = vmatprep.subr.bf16.mxu1 %v6737_v26  ;;  %v6794_v26 = vld [vmem:[%s9382_s1 + $0xe6c] ss:$16 sps:$4 sm:$0xff]   ;;  %v6789_v33 = vld [vmem:[%s9382_s1 + $0xc28] ss:$16 sps:$4 sm:$0xff]  }
 0x1f7   :  { %4778 = vmatpush2.bf16.msra.mxu0 %v6738_v9  ;;  %v6797_v9 = vld [vmem:[%s9382_s1 + $0xc0c] ss:$16 sps:$4 sm:$0xff]  }
 0x1f8   :  { %4741 = vmatpush2.bf16.msra.mxu1 %v6735_v0  ;;  %4779 = vmatprep.subr.bf16.mxu0 %v6746_v12  ;;  %v6792_v0 = vld [vmem:[%s9382_s1 + $0xe68] ss:$16 sps:$4 sm:$0xff]  }
 0x1f9   :  { %4742 = vmatprep.subr.bf16.mxu1 %v6743_v10  ;;  %v6800_v10 = vld [vmem:[%s9382_s1 + $0xe4c] ss:$16 sps:$4 sm:$0xff]   ;;  %v6795_v12 = vld [vmem:[%s9382_s1 + $0xc08] ss:$16 sps:$4 sm:$0xff]  }
 0x1fb   :  { %4780 = vmatpush2.bf16.msra.mxu0 %v6744_v16  ;;  %v6803_v16 = vld [vmem:[%s9382_s1 + $0xdec] ss:$16 sps:$4 sm:$0xff]  }
 0x1fc   :  { %4743 = vmatpush2.bf16.msra.mxu1 %v6741_v14  ;;  %4781 = vmatprep.subr.bf16.mxu0 %v6752_v41  ;;  %v6798_v14 = vld [vmem:[%s9382_s1 + $0xe48] ss:$16 sps:$4 sm:$0xff]  }
 0x1fd   :  { %4744 = vmatprep.subr.bf16.mxu1 %v6749_v20  ;;  %v6806_v20 = vld [vmem:[%s9382_s1 + $0xe2c] ss:$16 sps:$4 sm:$0xff]   ;;  %v6801_v41 = vld [vmem:[%s9382_s1 + $0xde8] ss:$16 sps:$4 sm:$0xff]  }
 0x1ff   :  { %4782 = vmatpush2.bf16.msra.mxu0 %v6750_v21  ;;  %v6809_v21 = vld [vmem:[%s9382_s1 + $0xdcc] ss:$16 sps:$4 sm:$0xff]  }
 0x200   :  { %4745 = vmatpush2.bf16.msra.mxu1 %v6747_v37  ;;  %4783 = vmatprep.subr.bf16.mxu0 %v6755_v5  ;;  %v6804_v37 = vld [vmem:[%s9382_s1 + $0xe28] ss:$16 sps:$4 sm:$0xff]   ;;  %v6812_v5 = vld [vmem:[%s9382_s1 + $0xe0c] ss:$16 sps:$4 sm:$0xff]  }
 0x201   :  { %4796 = vmatprep.subr.bf16.mxu1 %v6758_v22  ;;  %v6807_v22 = vld [vmem:[%s9382_s1 + $0xdc8] ss:$16 sps:$4 sm:$0xff]  }
 0x202   :  { %v4461_v42 = vpop.f32.mrf.mxu0 }
 0x203   :  { %v4502_v30 = vpop.f32.mrf.mxu1  ;;  %4747 = vmatmul.mubr.bf16.vlgmr.msra.gmra.mxu1 %v7667_v50  ;;  %v4462_v2 = vadd.f32 %v4461_v42, %v8565_v8  ;;  %4784 = vmatpush2.bf16.msra.mxu0 %v6753_v6  ;;  %v6767_v50 = vld [vmem:[%s9382_s1 + $0xcac] ss:$16 sps:$4 sm:$0xff]   ;;  %v6810_v6 = vld [vmem:[%s9382_s1 + $0xe08] ss:$16 sps:$4 sm:$0xff]  }
 0x204   :  { %4797 = vmatpush1.bf16.msra.mxu1 %v6756_v24  ;;  %v4463_v46 = vpop.f32.mrf.mxu0  ;;  %4785 = vmatprep.subr.bf16.mxu0 %v6761_v27  ;;  %v6770_v8 = vld [vmem:[%s9382_s1 + $0xeec] ss:$16 sps:$4 sm:$0xff]   ;;  %v6816_v42 = vld [vmem:[%s9382_s1 + $0xfe8] ss:$16 sps:$4 sm:$0xff]  }
 0x205   :  { %v4504_v36 = vpop.f32.mrf.mxu1  ;;  %4798 = vmatprep.subr.bf16.mxu1 %v6764_v29  ;;  %v4503_v38 = vadd.f32 %v4502_v30, %v4462_v2  ;;  %v4464_v32 = vadd.f32 %v4463_v46, %v8569_v11  ;;  %4828 = vmatprep.mubr.bf16.mxu1 %v7679_v54  ;;  %v6773_v54 = vld [vmem:[%s9382_s1 + $0xc8c] ss:$16 sps:$4 sm:$0xff]   ;;  %v6813_v29 = vld [vmem:[%s9382_s1 + $0xda8] ss:$16 sps:$4 sm:$0xff]  }
 0x206   :  { %v4465_v40 = vpop.f32.mrf.mxu0  ;;  %v6776_v11 = vld [vmem:[%s9382_s1 + $0xecc] ss:$16 sps:$4 sm:$0xff]  }
 0x207   :  { %v4506_v44 = vpop.f32.mrf.mxu1  ;;  %v4505_v17 = vadd.f32 %v4504_v36, %v4464_v32  ;;  %4786 = vmatpush2.bf16.msra.mxu0 %v6759_v31  ;;  %v6815_v24 = vld [vmem:[%s9382_s1 + $0xdac] ss:$16 sps:$4 sm:$0xff]   ;;  %v6819_v31 = vld [vmem:[%s9382_s1 + $0xd88] ss:$16 sps:$4 sm:$0xff]  }
 0x208   :  { %4799 = vmatpush1.bf16.msra.mxu1 %v6762_v13  ;;  %v4466_v47 = vpop.f32.mrf.mxu0  ;;  %4837 = vmatprep.subr.bf16.mxu0 %v6770_v8  ;;  %v6818_v27 = vld [vmem:[%s9382_s1 + $0xfec] ss:$16 sps:$4 sm:$0xff]   ;;  %v6822_v13 = vld [vmem:[%s9382_s1 + $0xfc8] ss:$16 sps:$4 sm:$0xff]  }
 0x209   :  { %v4507_v48 = vpop.f32.mrf.mxu1  ;;  %4800 = vmatprep.subr.bf16.mxu1 %v6767_v50  ;;  %v6821_v30 = vld [vmem:[%s9382_s1 + $0xd8c] ss:$16 sps:$4 sm:$0xff]   ;;  %v6825_v50 = vld [vmem:[%s9382_s1 + $0xd68] ss:$16 sps:$4 sm:$0xff]  }
 0x20a   :  { %v4543_v18 = vpop.f32.mrf.mxu0  ;;  %4788 = vmatmul.mubr.bf16.vlgmr.msra.gmra.mxu0 %v7683_v35  ;;  %v6782_v35 = vld [vmem:[%s9382_s1 + $0xeac] ss:$16 sps:$4 sm:$0xff]   ;;  %v6828_v8 = vld [vmem:[%s9382_s1 + $0xfa8] ss:$16 sps:$4 sm:$0xff]  }
 0x20b   :  { %v8782_v51 = vadd.f32 %v4543_v18, %v4503_v38  ;;  %4838 = vmatpush1.bf16.msra.mxu0 %v6768_v45  ;;  %4869 = vmatprep.mubr.bf16.mxu0 %v7699_v59  ;;  %v6788_v59 = vld [vmem:[%s9382_s1 + $0xe8c] ss:$16 sps:$4 sm:$0xff]   ;;  %v6831_v40 = vld [vmem:[%s9382_s1 + $0xd48] ss:$16 sps:$4 sm:$0xff]  }
 0x20c   :  { %4801 = vmatpush1.bf16.msra.mxu1 %v6765_v56  ;;  %v4545_v23 = vpop.f32.mrf.mxu0  ;;  %4839 = vmatprep.subr.bf16.mxu0 %v6776_v11  ;;  %v6824_v2 = vld [vmem:[%s9382_s1 + $0xfcc] ss:$16 sps:$4 sm:$0xff]   ;;  %v6834_v44 = vld [vmem:[%s9382_s1 + $0xf88] ss:$16 sps:$4 sm:$0xff]  }
 0x20d   :  { %4802 = vmatprep.subr.bf16.mxu1 %v6773_v54  ;;  %v8796_v58 = vadd.f32 %v4545_v23, %v4505_v17  ;;  %v6827_v46 = vld [vmem:[%s9382_s1 + $0xd6c] ss:$16 sps:$4 sm:$0xff]   ;;  %v6837_v45 = vld [vmem:[%s9382_s1 + $0xd28] ss:$16 sps:$4 sm:$0xff]  }
 0x20e   :  { %v4547_v61 = vpop.f32.mrf.mxu0  ;;  %v6830_v36 = vld [vmem:[%s9382_s1 + $0xfac] ss:$16 sps:$4 sm:$0xff]   ;;  %v6840_v47 = vld [vmem:[%s9382_s1 + $0xf68] ss:$16 sps:$4 sm:$0xff]  }
 0x20f   :  { %4840 = vmatpush1.bf16.msra.mxu0 %v6774_v53  ;;  %v6833_v38 = vld [vmem:[%s9382_s1 + $0xd4c] ss:$16 sps:$4 sm:$0xff]   ;;  %v6843_v11 = vld [vmem:[%s9382_s1 + $0xd08] ss:$16 sps:$4 sm:$0xff]  }
 0x210   :  { %4803 = vmatpush1.bf16.msra.mxu1 %v6771_v52  ;;  %v4548_v62 = vpop.f32.mrf.mxu0  ;;  %4841 = vmatprep.subr.bf16.mxu0 %v6782_v35  ;;  %v6836_v32 = vld [vmem:[%s9382_s1 + $0xf8c] ss:$16 sps:$4 sm:$0xff]   ;;  %v6846_v18 = vld [vmem:[%s9382_s1 + $0xf48] ss:$16 sps:$4 sm:$0xff]  }
 0x211   :  { %4804 = vmatprep.subr.bf16.mxu1 %v6779_v57  ;;  %v6839_v17 = vld [vmem:[%s9382_s1 + $0xd2c] ss:$16 sps:$4 sm:$0xff]   ;;  %v6849_v23 = vld [vmem:[%s9382_s1 + $0xf28] ss:$16 sps:$4 sm:$0xff]   ;;  %v4089_v62 = vsub.s32 3, %v7131_v43 }
 0x212   :  { %v6842_v56 = vld [vmem:[%s9382_s1 + $0xf6c] ss:$16 sps:$4 sm:$0xff]   ;;  %v6852_v57 = vld [vmem:[%s9382_s1 + $0x10e8] ss:$16 sps:$4 sm:$0xff]  }
 0x213   :  { %4842 = vmatpush1.bf16.msra.mxu0 %v6780_v49  ;;  %v6845_v48 = vld [vmem:[%s9382_s1 + $0xd0c] ss:$16 sps:$4 sm:$0xff]  }
 0x214   :  { %4805 = vmatpush1.bf16.msra.mxu1 %v6777_v60  ;;  %4843 = vmatprep.subr.bf16.mxu0 %v6788_v59  ;;  %v6848_v54 = vld [vmem:[%s9382_s1 + $0xf4c] ss:$16 sps:$4 sm:$0xff]   ;;  %v4085_v60 = vsub.s32 2, %v7131_v43  ;;  %v6858_v59 = vld [vmem:[%s9382_s1 + $0x10c8] ss:$16 sps:$4 sm:$0xff]  }
 0x215   :  { %4806 = vmatprep.subr.bf16.mxu1 %v6785_v63  ;;  %v6851_v52 = vld [vmem:[%s9382_s1 + $0xf2c] ss:$16 sps:$4 sm:$0xff]   ;;  %v6855_v63 = vld [vmem:[%s9382_s1 + $0xf08] ss:$16 sps:$4 sm:$0xff]   ;;  %v6957_v43 = vld [vmem:[%s9383_s2] sm:$0xf] }
 0x216   :  { %v6854_v53 = vld [vmem:[%s9382_s1 + $0x10ec] ss:$16 sps:$4 sm:$0xff]   ;;  %s6982_s2 = smov 127  }
 0x217   :  { %4844 = vmatpush1.bf16.msra.mxu0 %v6786_v3  ;;  %v6857_v35 = vld [vmem:[%s9382_s1 + $0xf0c] ss:$16 sps:$4 sm:$0xff]  }
 0x218   :  { %4807 = vmatpush1.bf16.msra.mxu1 %v6783_v1  ;;  %4845 = vmatprep.subr.bf16.mxu0 %v6794_v26  ;;  %v6860_v61 = vld [vmem:[%s9382_s1 + $0x10cc] ss:$16 sps:$4 sm:$0xff]  }
 0x219   :  { %4808 = vmatprep.subr.bf16.mxu1 %v6791_v4  ;;  %v6863_v3 = vld [vmem:[%s9382_s1 + $0x10ac] ss:$16 sps:$4 sm:$0xff]   ;;  %v4086_v4 = vrot.slane %v6957_v43, %v4085_v60  ;;  %v6918_v60 = vld [vmem:[%s9382_s1 + $0x13c8] ss:$16 sps:$4 sm:$0xff]  }
 0x21b   :  { %4846 = vmatpush1.bf16.msra.mxu0 %v6792_v0  ;;  %v6861_v0 = vld [vmem:[%s9382_s1 + $0x10a8] ss:$16 sps:$4 sm:$0xff]  }
 0x21c   :  { %4809 = vmatpush1.bf16.msra.mxu1 %v6789_v33  ;;  %4847 = vmatprep.subr.bf16.mxu0 %v6800_v10  ;;  %v4090_v33 = vrot.slane %v6957_v43, %v4089_v62  ;;  %v6926_v62 = vld [vmem:[%s9382_s1 + $0x13ac] ss:$16 sps:$4 sm:$0xff]   ;;  %v6930_v43 = vld [vmem:[%s9382_s1 + $0x1388] ss:$16 sps:$4 sm:$0xff]  }
 0x21d   :  { %4810 = vmatprep.subr.bf16.mxu1 %v6797_v9  ;;  %v6864_v9 = vld [vmem:[%s9382_s1 + $0x12e8] ss:$16 sps:$4 sm:$0xff]  }
 0x21f   :  { %4848 = vmatpush1.bf16.msra.mxu0 %v6798_v14 }
 0x220   :  { %4811 = vmatpush1.bf16.msra.mxu1 %v6795_v12  ;;  %4849 = vmatprep.subr.bf16.mxu0 %v6806_v20  ;;  %v6869_v12 = vld [vmem:[%s9382_s1 + $0x108c] ss:$16 sps:$4 sm:$0xff]  }
 0x221   :  { %4812 = vmatprep.subr.bf16.mxu1 %v6803_v16 }
 0x223   :  { %4850 = vmatpush1.bf16.msra.mxu0 %v6804_v37  ;;  %v6867_v37 = vld [vmem:[%s9382_s1 + $0x1088] ss:$16 sps:$4 sm:$0xff]  }
 0x224   :  { %4813 = vmatpush2.bf16.msra.mxu1 %v6801_v41  ;;  %4851 = vmatprep.subr.bf16.mxu0 %v6812_v5 }
 0x225   :  { %4814 = vmatprep.subr.bf16.mxu1 %v6809_v21  ;;  %v6870_v21 = vld [vmem:[%s9382_s1 + $0x12c8] ss:$16 sps:$4 sm:$0xff]  }
 0x227   :  { %4852 = vmatpush1.bf16.msra.mxu0 %v6810_v6 }
 0x228   :  { %4815 = vmatpush2.bf16.msra.mxu1 %v6807_v22  ;;  %4853 = vmatprep.subr.bf16.mxu0 %v6818_v27  ;;  %v6878_v22 = vld [vmem:[%s9382_s1 + $0x12ac] ss:$16 sps:$4 sm:$0xff]   ;;  %v6873_v27 = vld [vmem:[%s9382_s1 + $0x1068] ss:$16 sps:$4 sm:$0xff]  }
 0x229   :  { %4816 = vmatprep.subr.bf16.mxu1 %v6815_v24 }
 0x22b   :  { %4854 = vmatpush2.bf16.msra.mxu0 %v6816_v42 }
 0x22c   :  { %4817 = vmatpush2.bf16.msra.mxu1 %v6813_v29  ;;  %4855 = vmatprep.subr.bf16.mxu0 %v6824_v2  ;;  %v6876_v29 = vld [vmem:[%s9382_s1 + $0x12a8] ss:$16 sps:$4 sm:$0xff]  }
 0x22d   :  { %4818 = vmatprep.subr.bf16.mxu1 %v6821_v30  ;;  %v6881_v30 = vld [vmem:[%s9382_s1 + $0x104c] ss:$16 sps:$4 sm:$0xff]   ;;  %v6879_v2 = vld [vmem:[%s9382_s1 + $0x1048] ss:$16 sps:$4 sm:$0xff]  }
 0x22f   :  { %4856 = vmatpush2.bf16.msra.mxu0 %v6822_v13  ;;  %v6887_v13 = vld [vmem:[%s9382_s1 + $0x102c] ss:$16 sps:$4 sm:$0xff]  }
 0x230   :  { %4819 = vmatpush2.bf16.msra.mxu1 %v6819_v31  ;;  %4857 = vmatprep.subr.bf16.mxu0 %v6830_v36  ;;  %v6882_v31 = vld [vmem:[%s9382_s1 + $0x1288] ss:$16 sps:$4 sm:$0xff]  }
 0x231   :  { %4820 = vmatprep.subr.bf16.mxu1 %v6827_v46  ;;  %v6890_v46 = vld [vmem:[%s9382_s1 + $0x126c] ss:$16 sps:$4 sm:$0xff]   ;;  %v6885_v36 = vld [vmem:[%s9382_s1 + $0x1028] ss:$16 sps:$4 sm:$0xff]  }
 0x233   :  { %4858 = vmatpush2.bf16.msra.mxu0 %v6828_v8  ;;  %v6893_v8 = vld [vmem:[%s9382_s1 + $0x100c] ss:$16 sps:$4 sm:$0xff]  }
 0x234   :  { %4821 = vmatpush2.bf16.msra.mxu1 %v6825_v50  ;;  %4859 = vmatprep.subr.bf16.mxu0 %v6836_v32  ;;  %v6888_v50 = vld [vmem:[%s9382_s1 + $0x1268] ss:$16 sps:$4 sm:$0xff]  }
 0x235   :  { %4822 = vmatprep.subr.bf16.mxu1 %v6833_v38  ;;  %v6896_v38 = vld [vmem:[%s9382_s1 + $0x124c] ss:$16 sps:$4 sm:$0xff]   ;;  %v6891_v32 = vld [vmem:[%s9382_s1 + $0x1008] ss:$16 sps:$4 sm:$0xff]  }
 0x237   :  { %4860 = vmatpush2.bf16.msra.mxu0 %v6834_v44  ;;  %v6899_v44 = vld [vmem:[%s9382_s1 + $0x11ec] ss:$16 sps:$4 sm:$0xff]  }
 0x238   :  { %4823 = vmatpush2.bf16.msra.mxu1 %v6831_v40  ;;  %4861 = vmatprep.subr.bf16.mxu0 %v6842_v56  ;;  %v6894_v40 = vld [vmem:[%s9382_s1 + $0x1248] ss:$16 sps:$4 sm:$0xff]  }
 0x239   :  { %4824 = vmatprep.subr.bf16.mxu1 %v6839_v17  ;;  %v6902_v17 = vld [vmem:[%s9382_s1 + $0x122c] ss:$16 sps:$4 sm:$0xff]   ;;  %v6897_v56 = vld [vmem:[%s9382_s1 + $0x11e8] ss:$16 sps:$4 sm:$0xff]  }
 0x23b   :  { %4862 = vmatpush2.bf16.msra.mxu0 %v6840_v47  ;;  %v6905_v47 = vld [vmem:[%s9382_s1 + $0x11cc] ss:$16 sps:$4 sm:$0xff]  }
 0x23c   :  { %4825 = vmatpush2.bf16.msra.mxu1 %v6837_v45  ;;  %4863 = vmatprep.subr.bf16.mxu0 %v6848_v54  ;;  %v6900_v45 = vld [vmem:[%s9382_s1 + $0x1228] ss:$16 sps:$4 sm:$0xff]  }
 0x23d   :  { %4826 = vmatprep.subr.bf16.mxu1 %v6845_v48  ;;  %v6908_v48 = vld [vmem:[%s9382_s1 + $0x120c] ss:$16 sps:$4 sm:$0xff]   ;;  %v6903_v54 = vld [vmem:[%s9382_s1 + $0x11c8] ss:$16 sps:$4 sm:$0xff]  }
 0x23f   :  { %4864 = vmatpush2.bf16.msra.mxu0 %v6846_v18  ;;  %v6911_v18 = vld [vmem:[%s9382_s1 + $0x11ac] ss:$16 sps:$4 sm:$0xff]  }
 0x240   :  { %4827 = vmatpush2.bf16.msra.mxu1 %v6843_v11  ;;  %4865 = vmatprep.subr.bf16.mxu0 %v6851_v52  ;;  %v6906_v11 = vld [vmem:[%s9382_s1 + $0x1208] ss:$16 sps:$4 sm:$0xff]   ;;  %v6914_v52 = vld [vmem:[%s9382_s1 + $0x13ec] ss:$16 sps:$4 sm:$0xff]  }
 0x241   :  { %4878 = vmatprep.subr.bf16.mxu1 %v6854_v53  ;;  %v6909_v53 = vld [vmem:[%s9382_s1 + $0x11a8] ss:$16 sps:$4 sm:$0xff]  }
 0x243   :  { %v4584_v49 = vpop.f32.mrf.mxu1  ;;  %4829 = vmatmul.mubr.bf16.vlgmr.msra.gmra.mxu1 %v7897_v19  ;;  %4866 = vmatpush2.bf16.msra.mxu0 %v6849_v23  ;;  %v6866_v19 = vld [vmem:[%s9382_s1 + $0x12ec] ss:$16 sps:$4 sm:$0xff]   ;;  %v6912_v23 = vld [vmem:[%s9382_s1 + $0x13e8] ss:$16 sps:$4 sm:$0xff]  }
 0x244   :  { %4879 = vmatpush1.bf16.msra.mxu1 %v6852_v57  ;;  %4867 = vmatprep.subr.bf16.mxu0 %v6857_v35  ;;  %v4585_v14 = vadd.f32 %v4584_v49, %v4086_v4  ;;  %v6917_v57 = vld [vmem:[%s9382_s1 + $0x118c] ss:$16 sps:$4 sm:$0xff]  }
 0x245   :  { %v4586_v1 = vpop.f32.mrf.mxu1  ;;  %4880 = vmatprep.subr.bf16.mxu1 %v6860_v61  ;;  %4910 = vmatprep.mubr.bf16.mxu1 %v7908_v25  ;;  %v6872_v25 = vld [vmem:[%s9382_s1 + $0x12cc] ss:$16 sps:$4 sm:$0xff]   ;;  %v6915_v61 = vld [vmem:[%s9382_s1 + $0x1188] ss:$16 sps:$4 sm:$0xff]  }
 0x246   :  { %v4587_v20 = vadd.f32 %v4586_v1, %v4090_v33  ;;  %v6920_v35 = vld [vmem:[%s9382_s1 + $0x13cc] ss:$16 sps:$4 sm:$0xff]   ;;  %v6933_v33 = vld [vmem:[%s9382_s1 + $0x1128] ss:$16 sps:$4 sm:$0xff]  }
 0x247   :  { %v4588_v26 = vpop.f32.mrf.mxu1  ;;  %4868 = vmatpush2.bf16.msra.mxu0 %v6855_v63  ;;  %v6923_v49 = vld [vmem:[%s9382_s1 + $0x116c] ss:$16 sps:$4 sm:$0xff]   ;;  %v6921_v63 = vld [vmem:[%s9382_s1 + $0x1168] ss:$16 sps:$4 sm:$0xff]  }
 0x248   :  { %4881 = vmatpush1.bf16.msra.mxu1 %v6858_v59  ;;  %4919 = vmatprep.subr.bf16.mxu0 %v6866_v19  ;;  %v6924_v59 = vld [vmem:[%s9382_s1 + $0x13a8] ss:$16 sps:$4 sm:$0xff]   ;;  %v6929_v1 = vld [vmem:[%s9382_s1 + $0x114c] ss:$16 sps:$4 sm:$0xff]  }
 0x249   :  { %v4589_v10 = vpop.f32.mrf.mxu1  ;;  %4882 = vmatprep.subr.bf16.mxu1 %v6863_v3  ;;  %v6932_v3 = vld [vmem:[%s9382_s1 + $0x138c] ss:$16 sps:$4 sm:$0xff]   ;;  %v6927_v19 = vld [vmem:[%s9382_s1 + $0x1148] ss:$16 sps:$4 sm:$0xff]  }
 0x24a   :  { %v4625_v16 = vpop.f32.mrf.mxu0  ;;  %4870 = vmatmul.mubr.bf16.vlgmr.msra.gmra.mxu0 %v7912_v39  ;;  %v6875_v39 = vld [vmem:[%s9382_s1 + $0x106c] ss:$16 sps:$4 sm:$0xff]  }
 0x24b   :  { %v8987_v41 = vadd.f32 %v4625_v16, %v4585_v14  ;;  %4920 = vmatpush1.bf16.msra.mxu0 %v6864_v9  ;;  %4951 = vmatprep.mubr.bf16.mxu0 %v7928_v34  ;;  %v6884_v34 = vld [vmem:[%s9382_s1 + $0x128c] ss:$16 sps:$4 sm:$0xff]  }
 0x24c   :  { %4883 = vmatpush1.bf16.msra.mxu1 %v6861_v0  ;;  %v4627_v5 = vpop.f32.mrf.mxu0  ;;  %4921 = vmatprep.subr.bf16.mxu0 %v6872_v25  ;;  %v6935_v4 = vld [vmem:[%s9382_s1 + $0x112c] ss:$16 sps:$4 sm:$0xff]   ;;  %v6936_v0 = vld [vmem:[%s9382_s1 + $0x1368] ss:$16 sps:$4 sm:$0xff]  }
 0x24d   :  { %4884 = vmatprep.subr.bf16.mxu1 %v6869_v12  ;;  %v9001_v6 = vadd.f32 %v4627_v5, %v4587_v20  ;;  %v6938_v26 = vld [vmem:[%s9382_s1 + $0x136c] ss:$16 sps:$4 sm:$0xff]   ;;  %v6939_v12 = vld [vmem:[%s9382_s1 + $0x1108] ss:$16 sps:$4 sm:$0xff]  }
 0x24e   :  { %v4629_v24 = vpop.f32.mrf.mxu0  ;;  %v6941_v9 = vld [vmem:[%s9382_s1 + $0x110c] ss:$16 sps:$4 sm:$0xff]   ;;  %v6942_v25 = vld [vmem:[%s9382_s1 + $0x1348] ss:$16 sps:$4 sm:$0xff]  }
 0x24f   :  { %4922 = vmatpush1.bf16.msra.mxu0 %v6870_v21  ;;  %v6944_v10 = vld [vmem:[%s9382_s1 + $0x134c] ss:$16 sps:$4 sm:$0xff]   ;;  %v6945_v20 = vld [vmem:[%s9382_s1 + $0x1328] ss:$16 sps:$4 sm:$0xff]  }
 0x250   :  { %4885 = vmatpush1.bf16.msra.mxu1 %v6867_v37  ;;  %v4630_v42 = vpop.f32.mrf.mxu0  ;;  %4923 = vmatprep.subr.bf16.mxu0 %v6878_v22  ;;  %v6947_v14 = vld [vmem:[%s9382_s1 + $0x132c] ss:$16 sps:$4 sm:$0xff]   ;;  %v6948_v37 = vld [vmem:[%s9382_s1 + $0x1428] ss:$16 sps:$4 sm:$0xff]  }
 0x251   :  { %4886 = vmatprep.subr.bf16.mxu1 %v6875_v39  ;;  %v6950_v16 = vld [vmem:[%s9382_s1 + $0x142c] ss:$16 sps:$4 sm:$0xff]   ;;  %v6951_v24 = vld [vmem:[%s9382_s1 + $0x1308] ss:$16 sps:$4 sm:$0xff]  }
 0x252   :  { %v6953_v21 = vld [vmem:[%s9382_s1 + $0x130c] ss:$16 sps:$4 sm:$0xff]  }
 0x253   :  { %4924 = vmatpush1.bf16.msra.mxu0 %v6876_v29  ;;  %v6956_v5 = vld [vmem:[%s9382_s1 + $0x140c] ss:$16 sps:$4 sm:$0xff]  }
 0x254   :  { %4887 = vmatpush1.bf16.msra.mxu1 %v6873_v27  ;;  %4925 = vmatprep.subr.bf16.mxu0 %v6884_v34  ;;  %v6954_v27 = vld [vmem:[%s9382_s1 + $0x1408] ss:$16 sps:$4 sm:$0xff]  }
 0x255   :  { %4888 = vmatprep.subr.bf16.mxu1 %v6881_v30  ;;  %v5020_v34 = vld [vmem:[%s9384_s3 + $0x78] sm:$0xff] }
 0x257   :  { %4926 = vmatpush1.bf16.msra.mxu0 %v6882_v31  ;;  %v5019_v31 = vld [vmem:[%s9384_s3 + $0x70] sm:$0xff] }
 0x258   :  { %4889 = vmatpush1.bf16.msra.mxu1 %v6879_v2  ;;  %4927 = vmatprep.subr.bf16.mxu0 %v6890_v46  ;;  %v5002_v2 = vmax.f32 %v8796_v58, 0.0  ;;  %v5034_v58 = vld [vmem:[%s9384_s3 + $0xe8] sm:$0xff] }
 0x259   :  { %4890 = vmatprep.subr.bf16.mxu1 %v6887_v13 }
 0x25b   :  { %4928 = vmatpush1.bf16.msra.mxu0 %v6888_v50 }
 0x25c   :  { %4891 = vmatpush1.bf16.msra.mxu1 %v6885_v36  ;;  %4929 = vmatprep.subr.bf16.mxu0 %v6896_v38  ;;  %v5032_v38 = vld [vmem:[%s9384_s3 + $0xd8] sm:$0xff] }
 0x25d   :  { %4892 = vmatprep.subr.bf16.mxu1 %v6893_v8  ;;  %v5017_v8 = vld [vmem:[%s9384_s3 + $0x60] sm:$0xff] }
 0x25f   :  { %4930 = vmatpush1.bf16.msra.mxu0 %v6894_v40 }
 0x260   :  { %4893 = vmatpush1.bf16.msra.mxu1 %v6891_v32  ;;  %4931 = vmatprep.subr.bf16.mxu0 %v6902_v17  ;;  %v5016_v32 = vld [vmem:[%s9384_s3 + $0x58] sm:$0xff] }
 0x261   :  { %4894 = vmatprep.subr.bf16.mxu1 %v6899_v44  ;;  %v5068_v44 = vld [vmem:[%s9384_s3 + $0x1f8] sm:$0xff] }
 0x262   :  { %v5052_v17 = vld [vmem:[%s9384_s3 + $0x178] sm:$0xff] }
 0x263   :  { %4932 = vmatpush1.bf16.msra.mxu0 %v6900_v45  ;;  %v5031_v45 = vld [vmem:[%s9384_s3 + $0xd0] sm:$0xff] }
 0x264   :  { %4895 = vmatpush2.bf16.msra.mxu1 %v6897_v56  ;;  %4933 = vmatprep.subr.bf16.mxu0 %v6908_v48  ;;  %v5067_v56 = vld [vmem:[%s9384_s3 + $0x1f0] sm:$0xff] }
 0x265   :  { %4896 = vmatprep.subr.bf16.mxu1 %v6905_v47  ;;  %v5051_v47 = vld [vmem:[%s9384_s3 + $0x170] sm:$0xff] }
 0x266   :  { %v5015_v48 = vld [vmem:[%s9384_s3 + $0x50] sm:$0xff] }
 0x267   :  { %4934 = vmatpush1.bf16.msra.mxu0 %v6906_v11  ;;  %v5030_v11 = vld [vmem:[%s9384_s3 + $0xc8] sm:$0xff] }
 0x268   :  { %4897 = vmatpush2.bf16.msra.mxu1 %v6903_v54  ;;  %4935 = vmatprep.subr.bf16.mxu0 %v6914_v52  ;;  %v5066_v54 = vld [vmem:[%s9384_s3 + $0x1e8] sm:$0xff] }
 0x269   :  { %4898 = vmatprep.subr.bf16.mxu1 %v6911_v18  ;;  %v5050_v18 = vld [vmem:[%s9384_s3 + $0x168] sm:$0xff] }
 0x26a   :  { %v5014_v52 = vld [vmem:[%s9384_s3 + $0x48] sm:$0xff] }
 0x26b   :  { %4936 = vmatpush2.bf16.msra.mxu0 %v6912_v23  ;;  %v5029_v23 = vld [vmem:[%s9384_s3 + $0xc0] sm:$0xff] }
 0x26c   :  { %4899 = vmatpush2.bf16.msra.mxu1 %v6909_v53  ;;  %4937 = vmatprep.subr.bf16.mxu0 %v6920_v35  ;;  %v5065_v53 = vld [vmem:[%s9384_s3 + $0x1e0] sm:$0xff] }
 0x26d   :  { %4900 = vmatprep.subr.bf16.mxu1 %v6917_v57  ;;  %v5049_v57 = vld [vmem:[%s9384_s3 + $0x160] sm:$0xff] }
 0x26e   :  { %v5013_v35 = vld [vmem:[%s9384_s3 + $0x40] sm:$0xff] }
 0x26f   :  { %4938 = vmatpush2.bf16.msra.mxu0 %v6918_v60  ;;  %v5028_v60 = vld [vmem:[%s9384_s3 + $0xb8] sm:$0xff] }
 0x270   :  { %4901 = vmatpush2.bf16.msra.mxu1 %v6915_v61  ;;  %4939 = vmatprep.subr.bf16.mxu0 %v6926_v62  ;;  %v5064_v61 = vld [vmem:[%s9384_s3 + $0x1d8] sm:$0xff] }
 0x271   :  { %4902 = vmatprep.subr.bf16.mxu1 %v6923_v49  ;;  %v5048_v49 = vld [vmem:[%s9384_s3 + $0x158] sm:$0xff] }
 0x272   :  { %v5012_v62 = vld [vmem:[%s9384_s3 + $0x38] sm:$0xff] }
 0x273   :  { %4940 = vmatpush2.bf16.msra.mxu0 %v6924_v59  ;;  %v5027_v59 = vld [vmem:[%s9384_s3 + $0xb0] sm:$0xff] }
 0x274   :  { %4903 = vmatpush2.bf16.msra.mxu1 %v6921_v63  ;;  %4941 = vmatprep.subr.bf16.mxu0 %v6932_v3  ;;  %v5063_v63 = vld [vmem:[%s9384_s3 + $0x1d0] sm:$0xff] }
 0x275   :  { %4904 = vmatprep.subr.bf16.mxu1 %v6929_v1  ;;  %v5047_v1 = vld [vmem:[%s9384_s3 + $0x150] sm:$0xff] }
 0x276   :  { %v5011_v3 = vld [vmem:[%s9384_s3 + $0x30] sm:$0xff] }
 0x277   :  { %4942 = vmatpush2.bf16.msra.mxu0 %v6930_v43  ;;  %v5026_v43 = vld [vmem:[%s9384_s3 + $0xa8] sm:$0xff] }
 0x278   :  { %4905 = vmatpush2.bf16.msra.mxu1 %v6927_v19  ;;  %4943 = vmatprep.subr.bf16.mxu0 %v6938_v26  ;;  %v5062_v19 = vld [vmem:[%s9384_s3 + $0x1c8] sm:$0xff] }
 0x279   :  { %4906 = vmatprep.subr.bf16.mxu1 %v6935_v4  ;;  %v5046_v4 = vld [vmem:[%s9384_s3 + $0x148] sm:$0xff] }
 0x27a   :  { %v5010_v26 = vld [vmem:[%s9384_s3 + $0x28] sm:$0xff] }
 0x27b   :  { %4944 = vmatpush2.bf16.msra.mxu0 %v6936_v0  ;;  %v5009_v0 = vld [vmem:[%s9384_s3 + $0x20] sm:$0xff] }
 0x27c   :  { %4907 = vmatpush2.bf16.msra.mxu1 %v6933_v33  ;;  %4945 = vmatprep.subr.bf16.mxu0 %v6944_v10  ;;  %v5025_v33 = vld [vmem:[%s9384_s3 + $0xa0] sm:$0xff]  ;;  %v5008_v10 = vld [vmem:[%s9384_s3 + $0x18] sm:$0xff] }
 0x27d   :  { %4908 = vmatprep.subr.bf16.mxu1 %v6941_v9  ;;  %v5024_v9 = vld [vmem:[%s9384_s3 + $0x98] sm:$0xff] }
 0x27f   :  { %4946 = vmatpush2.bf16.msra.mxu0 %v6942_v25  ;;  %v5007_v25 = vld [vmem:[%s9384_s3 + $0x10] sm:$0xff] }
 0x280   :  { %4909 = vmatpush2.bf16.msra.mxu1 %v6939_v12  ;;  %4947 = vmatprep.subr.bf16.mxu0 %v6947_v14  ;;  %v5023_v12 = vld [vmem:[%s9384_s3 + $0x90] sm:$0xff]  ;;  %v5022_v14 = vld [vmem:[%s9384_s3 + $0x88] sm:$0xff] }
 0x281   :  { %4972 = vmatprep.subr.bf16.mxu1 %v6950_v16  ;;  %v5006_v16 = vld [vmem:[%s9384_s3 + $0x8] sm:$0xff] }
 0x283   :  { %v4666_v39 = vpop.f32.mrf.mxu1  ;;  %4911 = vmatmul.mubr.bf16.vlgmr.msra.gmra.mxu1 %v8108_v15  ;;  %4948 = vmatpush2.bf16.msra.mxu0 %v6945_v20  ;;  %v5036_v15 = vld [vmem:[%s9384_s3 + $0xf8] sm:$0xff]  ;;  %v5021_v20 = vld [vmem:[%s9384_s3 + $0x80] sm:$0xff] }
 0x284   :  { %v4667_v22 = vadd.f32 %v4666_v39, %v8987_v41  ;;  %4973 = vmatpush1.bf16.msra.mxu1 %v6948_v37  ;;  %4949 = vmatprep.subr.bf16.mxu0 %v6953_v21  ;;  %v5005_v37 = vld [vmem:[%s9384_s3] sm:$0xff]  ;;  %v5001_v21 = vmax.f32 %v8782_v51, 0.0  ;;  %v5060_v51 = vld [vmem:[%s9384_s3 + $0x1b8] sm:$0xff] }
 0x285   :  { %v4668_v29 = vpop.f32.mrf.mxu1  ;;  %4974 = vmatprep.subr.bf16.mxu1 %v6956_v5  ;;  %4992 = vmatprep.mubr.bf16.mxu1 %v6981_v7  ;;  %v5061_v5 = vld [vmem:[%s9384_s3 + $0x1c0] sm:$0xff] }
 0x286   :  { %v4669_v42 = vadd.f32 %v4668_v29, %v9001_v6  ;;  %v5035_v6 = vld [vmem:[%s9384_s3 + $0xf0] sm:$0xff]  ;;  %v5044_v29 = vld [vmem:[%s9384_s3 + $0x138] sm:$0xff] }
 0x287   :  { %v4670_v41 = vpop.f32.mrf.mxu1  ;;  %4950 = vmatpush2.bf16.msra.mxu0 %v6951_v24 }
 0x288   :  { %4975 = vmatpush1.bf16.msra.mxu1 %v6954_v27  ;;  %5904 = vmatprep.subr.mxu0 %v5036_v15  ;;  %v5059_v15 = vld [vmem:[%s9384_s3 + $0x1b0] sm:$0xff] }
 0x289   :  { %v4671_v30 = vpop.f32.mrf.mxu1  ;;  %5939 = vmatprep.subr.mxu1 %v5068_v44  ;;  %v5038_v44 = vld [vmem:[%s9384_s3 + $0x108] sm:$0xff] }
 0x28a   :  { %v4707_v7 = vpop.f32.mrf.mxu0  ;;  %4952 = vmatmul.mubr.bf16.vlgmr.msra.gmra.mxu0 %v8132_v28  ;;  %v5018_v28 = vld [vmem:[%s9384_s3 + $0x68] sm:$0xff]  ;;  %v5043_v30 = vld [vmem:[%s9384_s3 + $0x130] sm:$0xff] }
 0x28b   :  { %5903 = vmatmul.mubr.msk.bf16.vlgmr.msra.gmra.mxu1 %vm4095_vm0, %v8168_v55  ;;  %v9186_v13 = vadd.f32 %v4707_v7, %v4667_v22  ;;  %5905 = vmatpush3.msra.mxu0 %v5020_v34  ;;  %v5033_v55 = vld [vmem:[%s9384_s3 + $0xe0] sm:$0xff]  ;;  %v5058_v34 = vld [vmem:[%s9384_s3 + $0x1a8] sm:$0xff] }
 0x28c   :  { %5134 = vmatprep.mubr.f32.mxu0 %v5002_v2  ;;  %v4709_v46 = vpop.f32.mrf.mxu0  ;;  %5906 = vmatprep.subr.mxu0 %v5035_v6  ;;  %v5045_v22 = vld [vmem:[%s9384_s3 + $0x140] sm:$0xff]  ;;  %v5042_v6 = vld [vmem:[%s9384_s3 + $0x128] sm:$0xff] }
 0x28d   :  { %v9194_v36 = vadd.f32 %v4709_v46, %v4669_v42  ;;  %5907 = vmatpush3.msra.mxu0 %v5019_v31  ;;  %5940 = vmatpush3.msra.mxu1 %v5052_v17  ;;  %v5057_v7 = vld [vmem:[%s9384_s3 + $0x1a0] sm:$0xff]  ;;  %v5056_v46 = vld [vmem:[%s9384_s3 + $0x198] sm:$0xff] }
 0x28e   :  { %v4711_v50 = vpop.f32.mrf.mxu0  ;;  %5908 = vmatprep.subr.mxu0 %v5034_v58  ;;  %5941 = vmatprep.subr.mxu1 %v5067_v56  ;;  %v5053_v17 = vld [vmem:[%s9384_s3 + $0x180] sm:$0xff] }
 0x28f   :  { %5909 = vmatpush3.msra.mxu0 %v5018_v28  ;;  %5942 = vmatpush3.msra.mxu1 %v5051_v47  ;;  %v5055_v50 = vld [vmem:[%s9384_s3 + $0x190] sm:$0xff]  ;;  %v5037_v56 = vld [vmem:[%s9384_s3 + $0x100] sm:$0xff] }
 0x290   :  { %v4712_v40 = vpop.f32.mrf.mxu0  ;;  %5910 = vmatprep.subr.mxu0 %v5033_v55  ;;  %5943 = vmatprep.subr.mxu1 %v5066_v54 }
 0x291   :  { %5911 = vmatpush3.msra.mxu0 %v5017_v8  ;;  %5944 = vmatpush3.msra.mxu1 %v5050_v18 }
 0x292   :  { %5912 = vmatprep.subr.mxu0 %v5032_v38  ;;  %5945 = vmatprep.subr.mxu1 %v5065_v53  ;;  %v5039_v38 = vld [vmem:[%s9384_s3 + $0x110] sm:$0xff] }
 0x293   :  { %5913 = vmatpush3.msra.mxu0 %v5016_v32  ;;  %5946 = vmatpush3.msra.mxu1 %v5049_v57  ;;  %v5054_v32 = vld [vmem:[%s9384_s3 + $0x188] sm:$0xff] }
 0x294   :  { %5914 = vmatprep.subr.mxu0 %v5031_v45  ;;  %5947 = vmatprep.subr.mxu1 %v5064_v61 }
 0x295   :  { %5915 = vmatpush3.msra.mxu0 %v5015_v48  ;;  %5948 = vmatpush3.msra.mxu1 %v5048_v49 }
 0x296   :  { %5916 = vmatprep.subr.mxu0 %v5030_v11  ;;  %5949 = vmatprep.subr.mxu1 %v5063_v63 }
 0x297   :  { %5917 = vmatpush3.msra.mxu0 %v5014_v52  ;;  %5950 = vmatpush3.msra.mxu1 %v5047_v1 }
 0x298   :  { %5918 = vmatprep.subr.mxu0 %v5029_v23  ;;  %5951 = vmatprep.subr.mxu1 %v5062_v19 }
 0x299   :  { %5919 = vmatpush3.msra.mxu0 %v5013_v35  ;;  %5952 = vmatpush3.msra.mxu1 %v5046_v4 }
 0x29a   :  { %5920 = vmatprep.subr.mxu0 %v5028_v60  ;;  %5953 = vmatprep.subr.mxu1 %v5061_v5 }
 0x29b   :  { %5921 = vmatpush3.msra.mxu0 %v5012_v62  ;;  %5954 = vmatpush3.msra.mxu1 %v5045_v22 }
 0x29c   :  { %5922 = vmatprep.subr.mxu0 %v5027_v59  ;;  %5955 = vmatprep.subr.mxu1 %v5060_v51 }
 0x29d   :  { %5923 = vmatpush3.msra.mxu0 %v5011_v3  ;;  %5956 = vmatpush3.msra.mxu1 %v5044_v29 }
 0x29e   :  { %5924 = vmatprep.subr.mxu0 %v5026_v43  ;;  %5957 = vmatprep.subr.mxu1 %v5059_v15 }
 0x29f   :  { %5925 = vmatpush3.msra.mxu0 %v5010_v26  ;;  %5958 = vmatpush3.msra.mxu1 %v5043_v30 }
 0x2a0   :  { %5926 = vmatprep.subr.mxu0 %v5025_v33  ;;  %5959 = vmatprep.subr.mxu1 %v5058_v34 }
 0x2a1   :  { %5927 = vmatpush3.msra.mxu0 %v5009_v0  ;;  %5960 = vmatpush3.msra.mxu1 %v5042_v6 }
 0x2a2   :  { %5928 = vmatprep.subr.mxu0 %v5024_v9  ;;  %5961 = vmatprep.subr.mxu1 %v5057_v7 }
 0x2a3   :  { %5929 = vmatpush3.msra.mxu0 %v5008_v10 }
 0x2a4   :  { %5930 = vmatprep.subr.mxu0 %v5023_v12 }
 0x2a5   :  { %5931 = vmatpush3.msra.mxu0 %v5007_v25 }
 0x2a6   :  { %5932 = vmatprep.subr.mxu0 %v5022_v14 }
 0x2a7   :  { %5933 = vmatpush3.msra.mxu0 %v5006_v16 }
 0x2a8   :  { %5934 = vmatprep.subr.mxu0 %v5021_v20 }
 0x2a9   :  { %5935 = vmatpush3.msra.mxu0 %v5005_v37 }
 0x2aa   :  { %5135 = vmatmul.mubr.f32.vlgmr.msra.gmra.mxu0 %v5001_v21 }
 0x2c3   :  { %v4748_v39 = vpop.f32.mrf.mxu1 }
 0x2c4   :  { %v4749_v24 = vadd.f32 %v4748_v39, %v9186_v13  ;;  %v5041_v13 = vld [vmem:[%s9384_s3 + $0x120] sm:$0xff] }
 0x2c5   :  { %v4750_v27 = vpop.f32.mrf.mxu1  ;;  %5962 = vmatpush3.msra.mxu1 %v5041_v13  ;;  %v5069_v39 = vld [vmem:[%s9385_s4] sm:$0x1] }
 0x2c6   :  { %v4751_v42 = vadd.f32 %v4750_v27, %v9194_v36  ;;  %5963 = vmatprep.subr.mxu1 %v5056_v46  ;;  %v5040_v36 = vld [vmem:[%s9384_s3 + $0x118] sm:$0xff] }
 0x2c7   :  { %v4752_v41 = vpop.f32.mrf.mxu1  ;;  %5964 = vmatpush3.msra.mxu1 %v5040_v36 }
 0x2c8   :  { %5965 = vmatprep.subr.mxu1 %v5055_v50 }
 0x2c9   :  { %v4753_v2 = vpop.f32.mrf.mxu1  ;;  %5966 = vmatpush3.msra.mxu1 %v5039_v38 }
 0x2ca   :  { %v4789_v31 = vpop.f32.mrf.mxu0  ;;  %5967 = vmatprep.subr.mxu1 %v5054_v32 }
 0x2cb   :  { %v4790_v58 = vadd.f32 %v4789_v31, %v4749_v24  ;;  %5968 = vmatpush3.msra.mxu1 %v5038_v44 }
 0x2cc   :  { %v4791_v28 = vpop.f32.mrf.mxu0  ;;  %5969 = vmatprep.subr.mxu1 %v5053_v17 }
 0x2cd   :  { %v4792_v55 = vadd.f32 %v4791_v28, %v4751_v42  ;;  %5970 = vmatpush3.msra.mxu1 %v5037_v56 }
 0x2ce   :  { %v4793_v8 = vpop.f32.mrf.mxu0 }
 0x2d0   :  { %v4794_v40 = vpop.f32.mrf.mxu0 }
 0x303   :  { %v4830_v45 = vpop.f32.mrf.mxu1 }
 0x304   :  { %v4831_v47 = vadd.f32 %v4830_v45, %v4790_v58 }
 0x305   :  { %v4832_v48 = vpop.f32.mrf.mxu1 }
 0x306   :  { %v4833_v54 = vadd.f32 %v4832_v48, %v4792_v55 }
 0x307   :  { %v4834_v11 = vpop.f32.mrf.mxu1 }
 0x309   :  { %v4835_v18 = vpop.f32.mrf.mxu1 }
 0x30a   :  { %v4871_v52 = vpop.f32.mrf.mxu0 }
 0x30b   :  { %v4872_v49 = vadd.f32 %v4871_v52, %v4831_v47 }
 0x30c   :  { %v4873_v53 = vpop.f32.mrf.mxu0 }
 0x30d   :  { %v4874_v63 = vadd.f32 %v4873_v53, %v4833_v54 }
 0x30e   :  { %v4875_v23 = vpop.f32.mrf.mxu0 }
 0x310   :  { %v4876_v57 = vpop.f32.mrf.mxu0 }
 0x343   :  { %v4912_v35 = vpop.f32.mrf.mxu1 }
 0x344   :  { %v4913_v59 = vadd.f32 %v4912_v35, %v4872_v49 }
 0x345   :  { %v4914_v61 = vpop.f32.mrf.mxu1 }
 0x346   :  { %v4915_v19 = vadd.f32 %v4914_v61, %v4874_v63 }
 0x347   :  { %v4916_v60 = vpop.f32.mrf.mxu1 }
 0x349   :  { %v4917_v62 = vpop.f32.mrf.mxu1 }
 0x34a   :  { %v4953_v1 = vpop.f32.mrf.mxu0 }
 0x34b   :  { %v4994_v3 = vpop.f32.mrf.mxu1  ;;  %v4954_v43 = vadd.f32 %v4953_v1, %v4913_v59 }
 0x34c   :  { %v4955_v4 = vpop.f32.mrf.mxu0 }
 0x34d   :  { %v4996_v26 = vpop.f32.mrf.mxu1  ;;  %v4956_v33 = vadd.f32 %v4955_v4, %v4915_v19  ;;  %v4995_v0 = vadd.f32 %v4994_v3, %v4954_v43 }
 0x34e   :  { %v4957_v9 = vpop.f32.mrf.mxu0 }
 0x34f   :  { %v4998_v10 = vpop.f32.mrf.mxu1  ;;  %v4997_v12 = vadd.f32 %v4996_v26, %v4956_v33  ;;  %v5003_v20 = vmax.f32 %v4995_v0, 0.0 }
 0x350   :  { %v4958_v25 = vpop.f32.mrf.mxu0 }
 0x351   :  { %v4999_v14 = vpop.f32.mrf.mxu1  ;;  %v5004_v16 = vmax.f32 %v4997_v12, 0.0 }
 0x353   :  { %5204 = vmatprep.mubr.f32.mxu1 %v5004_v16 }
 0x354   :  { %5205 = vmatmul.mubr.f32.vlgmr.msra.gmra.mxu1 %v5003_v20 }
 0x36a   :  { %v5936_v37 = vpop.f32.mrf.mxu0 }
 0x36c   :  { %v5937_v21 = vpop.f32.mrf.mxu0 }
 0x36d   :  { %v5938_v5 = vadd.f32 %v5937_v21, %v5936_v37 }
 0x36f   :  { %v5137_v51 = vadd.f32 %v5938_v5, %v5069_v39 }
 0x414   :  { %v5971_v22 = vpop.f32.mrf.mxu1 }
 0x416   :  { %v5972_v24 = vpop.f32.mrf.mxu1 }
 0x417   :  { %v5973_v27 = vadd.f32 %v5972_v24, %v5971_v22 }
 0x419   :  { %v5207_v29 = vadd.f32 %v5973_v27, %v5137_v51 }
 0x41b   :  { %5231 = vperm.xlu1 %5980, %v5207_v29   ;;  %5211 = vrot.lane.b32.xlu0 %v5207_v29, %s6982_s2 }
 0x48d   :  { %v5212_v42 = vpop.permute.xlu0 %5211 }
 0x48e   :  { %v5215_v15 = vsel %vm5214_vm1, %v5212_v42, 0.0 }
 0x48f   :  { %5216 = vadd.xlane.f32.xlu0 %v5215_v15 }
 0x496   :  { %v5232_v46 = vpop.permute.xlu1 %5231 }
 0x518   :  { %v5217_v41 = vpop.xlane.xlu0 %5216 }
 0x519   :  { %v5218_v30 = vrot.slane %v5217_v41, 4 }
 0x51b   :  { %v5219_v34 = vadd.f32 %v5218_v30, %v5217_v41 }
 0x51d   :  { %v5220_v2 = vrot.slane %v5219_v34, 2 }
 0x51f   :  { %v5221_v6 = vadd.f32 %v5220_v2, %v5219_v34 }
 0x521   :  { %v5222_v7 = vrot.slane %v5221_v6, 1 }
 0x523   :  { %v5223_v31 = vadd.f32 %v5222_v7, %v5221_v6 }
 0x525   :  { %5974 = vpush %v5223_v31 }
 0x556   :  { %s5975_s4 = spop %5974 }
 0x557   :  { %s5227_s28 = smul.f32 0.16666667, %s5975_s4 }
 0x559   :  { %v5228_v13 = vstv %s5227_s28 }
 0x55a   :  { %v5229_v58 = vsub.f32 %v5207_v29, %v5228_v13 }
 0x55c   :  { %v5234_v28 = vadd.f32 %v5232_v46, %v5229_v58 }
 0x55e   :  { %5236 = vrot.lane.b32.xlu1 %v5234_v28, %s6982_s2 }
 0x5d0   :  { %v5237_v36 = vpop.permute.xlu1 %5236 }
 0x5d1   :  { %5239 = vst.msk [vmem:[#allocation2] sm:$0x1] %vm5214_vm1, %v5237_v36 }
 0x5d2   :  { %6969 = shalt.err (!%p6966_p4)
}
 0x5d3   :  { %5249 = dma.vmem_to_hbm [thread:$0]  %s5247_s30, 16, %s9386_s5, [#allocation3]  }
 0x5d4   :  { %6978 = dma.done.wait [#allocation3], 16  }
 0x5d5   :  { %6979 = vsyncadd [#allocation3], 4294967280 }
 0x5d6   :  { %5253 = vsyncpa [#allocation3], 1 }

</bundles_post_ra>
